<compile_context>
chip_gen: v5e
topology: v5e:2x2
jax: 0.10.0
libtpu: 0.0.40
codegen_flags: <defaults>
</compile_context>

<pallas_src>
import numpy as np
import jax
import jax.numpy as jnp
from jax.experimental import pallas as pl
from jax.experimental.pallas import tpu as pltpu


_NPROJ = 128  # MXU output lane width; col0 = attention score, col1 = output proj, rest zero.


def feature_extractor_kernel(layer_ref,   # VMEM (TB, S, D)      one layer's token embeddings
                             w3_ref,      # VMEM (D, NPROJ)      fused per-layer projection
                             mask_ref,    # VMEM (TB, S, 1) f32  attention mask (1 = keep)
                             ba_ref,      # SMEM (1,)            attention Linear bias
                             bo_ref,      # SMEM (1,)            output Linear bias
                             out_ref,     # VMEM (TB, 1, 1)      final logits
                             acc_ref):    # VMEM (TB, S, NPROJ) f32 accumulator (scratch)
    l = pl.program_id(1)
    last = pl.num_programs(1) - 1
    tb, s, d = layer_ref.shape
    nproj = w3_ref.shape[-1]

    # One MXU matmul per streamed layer block: both D-contractions (score + output
    # projection, with the layer weight and the l==0 'first'-layer term already
    # folded into w3 on the host).  f32 accumulation regardless of storage dtype.
    x = layer_ref[...]                                          # (TB, S, D), f32 or bf16
    y = jnp.dot(x.reshape(tb * s, d), w3_ref[...],
                preferred_element_type=jnp.float32)             # (TB*S, NPROJ) f32
    y = y.reshape(tb, s, nproj)

    @pl.when(l == 0)
    def _():
        acc_ref[...] = y

    @pl.when(l > 0)
    def _():
        acc_ref[...] += y

    @pl.when(l == last)
    def _():
        # Epilogue (once per batch block), in the MXU's natural sublane-S layout.
        # scores = Linear([first ; inp]); masked_fill_(mask == 0, -100000) exactly
        # as in the PyTorch module; softmax over the sequence axis.
        raw = acc_ref[:, :, 0:1] + ba_ref[0]                    # (TB, S, 1)
        score = jnp.where(mask_ref[...] > 0.5, raw, jnp.float32(-100000.0))
        m = jnp.max(score, axis=1, keepdims=True)               # (TB, 1, 1)
        e = jnp.exp(score - m)                                  # (TB, S, 1)
        pout = acc_ref[:, :, 1:2]                               # (TB, S, 1)  <inp, W_out> per token
        num = jnp.sum(e * pout, axis=1, keepdims=True)          # (TB, 1, 1)
        den = jnp.sum(e, axis=1, keepdims=True)                 # (TB, 1, 1)
        # exact divide: runs once per batch block on (TB,1) values -> free.
        out_ref[...] = num / den + bo_ref[0]


def _vmem_capacity_bytes():
    try:
        return int(pltpu.get_tpu_info().vmem_capacity_bytes)
    except Exception:
        return 64 << 20          # conservative fallback (v7x per-TensorCore VMEM)


def _pick_batch_tile(B, S, D, emb_itemsize):
    """Largest batch tile whose working set stays inside ~70% of this chip's VMEM
    (~90 MiB on 128-MiB v5e/v6e, ~45 MiB on 64-MiB v7x -> headroom for compiler
    scratch), while keeping >= 2 batch blocks so the 'parallel' batch axis can
    shard across v7x's two TensorCores.  Returns (TB, vmem_limit_bytes)."""
    budget = int(0.70 * _vmem_capacity_bytes())
    per_row = (2 * S * D * emb_itemsize        # double-buffered streamed layer block
               + 2 * S * _NPROJ * 4            # double-buffered (TB,S,1) mask block (lane-padded)
               + S * _NPROJ * 4)               # f32 accumulator scratch
    fixed = 2 * D * _NPROJ * emb_itemsize + (2 << 20)   # w3 double-buffer + margin
    cap = max(1, (budget - fixed) // per_row)
    if B >= 2:
        cap = min(cap, B // 2)                 # >= 2 batch blocks for megacore sharding
    cap = min(cap, B)
    divisors = [t for t in range(1, int(cap) + 1) if B % t == 0]
    mult8 = [t for t in divisors if t % 8 == 0]
    tb = max(mult8) if mult8 else max(divisors)
    vmem_limit = int(max(budget, fixed + tb * per_row))
    return tb, vmem_limit


def feature_extractor_forward(all_layer_embeddings, attention_mask,
                              layer_weights, attn_weight, attn_bias,
                              out_weight, out_bias):
    """all_layer_embeddings: (L, B, S, D) (f32 or bf16); attention_mask: (B, S), 1 = keep.
    Assumes featurewise_attention=False and use_layer_pooling=True (module defaults)."""
    L, B, S, D = all_layer_embeddings.shape
    assert S % 8 == 0 and D % 128 == 0, "pad S to a multiple of 8 and D to a multiple of 128"
    emb_dtype = all_layer_embeddings.dtype
    itemsize = jnp.dtype(emb_dtype).itemsize
    TB, vmem_limit = _pick_batch_tile(B, S, D, itemsize)

    # ---- host-side parameter fusion (O(L*D) glue; not worth a kernel) -------
    # TODO(synk): WeightedLayerPooling `layer_start` is not exposed here; all
    #             supplied layers are pooled with the (normalized) learnable weights.
    lw = (layer_weights / jnp.sum(layer_weights)).astype(jnp.float32)   # (L,)
    wa_first = attn_weight[0, :D].astype(jnp.float32)                   # (D,)
    wa_inp = attn_weight[0, D:].astype(jnp.float32)                     # (D,)
    wo_vec = out_weight[0, :].astype(jnp.float32)                       # (D,)
    w3 = jnp.zeros((L, D, _NPROJ), jnp.float32)
    w3 = w3.at[:, :, 0].set(lw[:, None] * wa_inp[None, :])
    w3 = w3.at[0, :, 0].add(wa_first)
    w3 = w3.at[:, :, 1].set(lw[:, None] * wo_vec[None, :])
    w3 = w3.astype(emb_dtype)                       # bf16 weights when streaming bf16

    mask3 = attention_mask.reshape(B, S, 1).astype(jnp.float32)
    ba = attn_bias.reshape(1).astype(jnp.float32)
    bo = out_bias.reshape(1).astype(jnp.float32)

    smem = pl.BlockSpec(memory_space=pltpu.MemorySpace.SMEM)
    grid = (B // TB, L)

    out = pl.pallas_call(
        feature_extractor_kernel,
        out_shape=jax.ShapeDtypeStruct((B, 1, 1), jnp.float32),
        grid_spec=pltpu.PrefetchScalarGridSpec(
            num_scalar_prefetch=0,
            grid=grid,
            in_specs=[
                # one (layer, batch-block) tile of token embeddings per grid step
                pl.BlockSpec((pl.Squeezed(), TB, S, D), lambda b, l: (l, b, 0, 0)),
                # fused per-layer projection weights
                pl.BlockSpec((pl.Squeezed(), D, _NPROJ), lambda b, l: (l, 0, 0)),
                # attention mask for this batch block (re-DMAed only when b changes)
                pl.BlockSpec((TB, S, 1), lambda b, l: (b, 0, 0)),
                smem,   # attention Linear bias (1,)
                smem,   # output Linear bias (1,)
            ],
            out_specs=pl.BlockSpec((TB, 1, 1), lambda b, l: (b, 0, 0)),
            scratch_shapes=[pltpu.VMEM((TB, S, _NPROJ), jnp.float32)],
        ),
        compiler_params=pltpu.CompilerParams(
            dimension_semantics=("parallel", "arbitrary"),
            vmem_limit_bytes=vmem_limit,
        ),
    )(all_layer_embeddings, w3, mask3, ba, bo)
    return out.reshape(B, 1)


def reference_forward(layers, mask, lw, wa, ba, wo, bo):
    """Pure-JAX reference mirroring the PyTorch module semantics."""
    inp = jnp.tensordot(lw, layers, axes=1) / jnp.sum(lw)      # WeightedLayerPooling
    first = layers[0]
    cat = jnp.concatenate([first, inp], axis=-1)               # (B, S, 2D)
    scores = cat @ wa.T + ba                                   # (B, S, 1)
    scores = jnp.where(mask[..., None] == 0.0, -100000.0, scores)
    w = jax.nn.softmax(scores, axis=1)
    sent = jnp.sum(w * inp, axis=1)                            # (B, D)
    return sent @ wo.T + bo                                    # (B, 1)


if __name__ == "__main__":
    # Small but lane-dense shapes: S and D multiples of 128 (per review).
    L, B, S, D = 4, 16, 128, 128

    key = jax.random.PRNGKey(0)
    k_lay, k_wa, k_ba, k_wo, k_bo = jax.random.split(key, 5)

    # synthetic "transformer outputs": all hidden-layer token embeddings
    all_layer_embeddings = jax.random.normal(k_lay, (L, B, S, D), jnp.float32)
    # deterministic prefix attention mask with varying sequence lengths
    lengths = 8 + (jnp.arange(B) * (S - 8)) // max(B - 1, 1)
    attention_mask = (jnp.arange(S)[None, :] < lengths[:, None]).astype(jnp.float32)

    # parameters (deterministic init; torch-Linear-like uniform +-1/sqrt(fan_in))
    layer_weights = jnp.linspace(0.5, 2.0, L).astype(jnp.float32)   # WeightedLayerPooling
    bnd_a = 1.0 / np.sqrt(2 * D)
    attn_weight = jax.random.uniform(k_wa, (1, 2 * D), jnp.float32, -bnd_a, bnd_a)
    attn_bias = jax.random.uniform(k_ba, (1,), jnp.float32, -bnd_a, bnd_a)
    bnd_o = 1.0 / np.sqrt(D)
    out_weight = jax.random.uniform(k_wo, (1, D), jnp.float32, -bnd_o, bnd_o)
    out_bias = jax.random.uniform(k_bo, (1,), jnp.float32, -bnd_o, bnd_o)

    # ---- f32 storage path --------------------------------------------------
    out = feature_extractor_forward(all_layer_embeddings, attention_mask,
                                    layer_weights, attn_weight, attn_bias,
                                    out_weight, out_bias)
    out = jax.block_until_ready(out)
    ref = reference_forward(all_layer_embeddings, attention_mask,
                            layer_weights, attn_weight, attn_bias,
                            out_weight, out_bias)
    np.testing.assert_allclose(np.asarray(out), np.asarray(ref), rtol=2e-2, atol=2e-2)

    # ---- bf16 storage path (halves HBM traffic; MXU consumes bf16 natively) -
    emb_bf16 = all_layer_embeddings.astype(jnp.bfloat16)
    out_bf = feature_extractor_forward(emb_bf16, attention_mask,
                                       layer_weights, attn_weight, attn_bias,
                                       out_weight, out_bias)
    out_bf = jax.block_until_ready(out_bf)
    ref_bf = reference_forward(emb_bf16.astype(jnp.float32), attention_mask,
                               layer_weights, attn_weight, attn_bias,
                               out_weight, out_bias)
    np.testing.assert_allclose(np.asarray(out_bf), np.asarray(ref_bf), rtol=6e-2, atol=6e-2)

    print("KERNEL_OK")
</pallas_src>

<mosaic_0001>
module attributes {stable_mosaic.version = 11 : i64} {
  func.func @feature_extractor_kernel(%arg0: i32, %arg1: i32, %arg2: memref<1x8x128x128xf32, #tpu.memory_space<vmem>>, %arg3: memref<1x128x128xf32, #tpu.memory_space<vmem>>, %arg4: memref<8x128x1xf32, #tpu.memory_space<vmem>>, %arg5: memref<1xf32, #tpu.memory_space<smem>>, %arg6: memref<1xf32, #tpu.memory_space<smem>>, %arg7: memref<8x1x1xf32, #tpu.memory_space<vmem>>, %arg8: memref<8x128x128xf32, #tpu.memory_space<vmem>>) attributes {dimension_semantics = [#tpu.dimension_semantics<parallel>, #tpu.dimension_semantics<arbitrary>], iteration_bounds = array<i64: 2, 4>, scalar_prefetch = 0 : i64, scratch_operands = 1 : i64, tpu.core_type = #tpu.core_type<tc>, window_params = [{transform_indices = @transform_0, window_bounds = array<i64: 1, 8, 128, 128>}, {transform_indices = @transform_1, window_bounds = array<i64: 1, 128, 128>}, {transform_indices = @transform_2, window_bounds = array<i64: 8, 128, 1>}, {transform_indices = @transform_3, window_bounds = array<i64: 1>}, {transform_indices = @transform_4, window_bounds = array<i64: 1>}, {transform_indices = @transform_5, window_bounds = array<i64: 8, 1, 1>}]} {
    %c0 = arith.constant 0 : index
    %c0_0 = arith.constant 0 : index
    %c0_1 = arith.constant 0 : index
    %c0_2 = arith.constant 0 : index
    %0 = vector.load %arg2[%c0, %c0_0, %c0_1, %c0_2] : memref<1x8x128x128xf32, #tpu.memory_space<vmem>>, vector<1x8x128x128xf32>
    %1 = vector.shape_cast %0 : vector<1x8x128x128xf32> to vector<8x128x128xf32>
    %2 = vector.shape_cast %1 : vector<8x128x128xf32> to vector<1024x128xf32>
    %c0_3 = arith.constant 0 : index
    %c0_4 = arith.constant 0 : index
    %c0_5 = arith.constant 0 : index
    %3 = vector.load %arg3[%c0_3, %c0_4, %c0_5] : memref<1x128x128xf32, #tpu.memory_space<vmem>>, vector<1x128x128xf32>
    %4 = vector.shape_cast %3 : vector<1x128x128xf32> to vector<128x128xf32>
    %cst = arith.constant dense<0.000000e+00> : vector<1024x128xf32>
    %5 = tpu.matmul %2, %4, %cst {dimension_numbers = #tpu.dot_dimension_numbers<[1], [0], [0], [1], [0, 0, 1, 1], [], []>} : vector<1024x128xf32>, vector<128x128xf32>, vector<1024x128xf32> -> vector<1024x128xf32>
    %6 = vector.shape_cast %5 : vector<1024x128xf32> to vector<8x128x128xf32>
    %c0_i32 = arith.constant 0 : i32
    %7 = arith.cmpi eq, %arg1, %c0_i32 : i32
    %8 = arith.extui %7 : i1 to i32
    %c0_i32_6 = arith.constant 0 : i32
    %9 = arith.cmpi ne, %8, %c0_i32_6 : i32
    scf.if %9 {
      %c0_10 = arith.constant 0 : index
      %c0_11 = arith.constant 0 : index
      %c0_12 = arith.constant 0 : index
      %16 = vector.load %arg8[%c0_10, %c0_11, %c0_12] : memref<8x128x128xf32, #tpu.memory_space<vmem>>, vector<8x128x128xf32>
      tpu.vector_store %arg8[%c0_10, %c0_11, %c0_12], %6 {strides = array<i32>} : memref<8x128x128xf32, #tpu.memory_space<vmem>>, vector<8x128x128xf32>,
    } else {
    }
    %c0_i32_7 = arith.constant 0 : i32
    %10 = arith.cmpi sgt, %arg1, %c0_i32_7 : i32
    %11 = arith.extui %10 : i1 to i32
    %c0_i32_8 = arith.constant 0 : i32
    %12 = arith.cmpi ne, %11, %c0_i32_8 : i32
    scf.if %12 {
      %c0_10 = arith.constant 0 : index
      %c0_11 = arith.constant 0 : index
      %c0_12 = arith.constant 0 : index
      %16 = vector.load %arg8[%c0_10, %c0_11, %c0_12] : memref<8x128x128xf32, #tpu.memory_space<vmem>>, vector<8x128x128xf32>
      %17 = arith.addf %16, %6 : vector<8x128x128xf32>
      %c0_13 = arith.constant 0 : index
      %c0_14 = arith.constant 0 : index
      %c0_15 = arith.constant 0 : index
      %18 = vector.load %arg8[%c0_13, %c0_14, %c0_15] : memref<8x128x128xf32, #tpu.memory_space<vmem>>, vector<8x128x128xf32>
      tpu.vector_store %arg8[%c0_13, %c0_14, %c0_15], %17 {strides = array<i32>} : memref<8x128x128xf32, #tpu.memory_space<vmem>>, vector<8x128x128xf32>,
    } else {
    }
    %c3_i32 = arith.constant 3 : i32
    %13 = arith.cmpi eq, %arg1, %c3_i32 : i32
    %14 = arith.extui %13 : i1 to i32
    %c0_i32_9 = arith.constant 0 : i32
    %15 = arith.cmpi ne, %14, %c0_i32_9 : i32
    scf.if %15 {
      %c0_10 = arith.constant 0 : index
      %c0_11 = arith.constant 0 : index
      %c0_12 = arith.constant 0 : index
      %16 = vector.load %arg8[%c0_10, %c0_11, %c0_12] : memref<8x128x128xf32, #tpu.memory_space<vmem>>, vector<8x128x1xf32>
      %c0_13 = arith.constant 0 : index
      %17 = memref.load %arg5[%c0_13] : memref<1xf32, #tpu.memory_space<smem>>
      %18 = vector.broadcast %17 : f32 to vector<8x128x1xf32>
      %19 = arith.addf %16, %18 : vector<8x128x1xf32>
      %c0_14 = arith.constant 0 : index
      %c0_15 = arith.constant 0 : index
      %c0_16 = arith.constant 0 : index
      %20 = vector.load %arg4[%c0_14, %c0_15, %c0_16] : memref<8x128x1xf32, #tpu.memory_space<vmem>>, vector<8x128x1xf32>
      %cst_17 = arith.constant 5.000000e-01 : f32
      %21 = vector.broadcast %cst_17 : f32 to vector<8x128x1xf32>
      %22 = arith.cmpf ogt, %20, %21 : vector<8x128x1xf32>
      %cst_18 = arith.constant -1.000000e+05 : f32
      %23 = vector.broadcast %cst_18 : f32 to vector<8x128x1xf32>
      %24 = arith.select %22, %19, %23 : vector<8x128x1xi1>, vector<8x128x1xf32>
      %cst_19 = arith.constant dense<0xFF800000> : vector<8x1xf32>
      %25 = vector.multi_reduction <maximumf>, %24, %cst_19 [1] : vector<8x128x1xf32> to vector<8x1xf32>
      %26 = vector.shape_cast %25 : vector<8x1xf32> to vector<8x1x1xf32>
      %27 = vector.broadcast %26 : vector<8x1x1xf32> to vector<8x128x1xf32>
      %28 = arith.subf %24, %27 : vector<8x128x1xf32>
      %29 = math.exp %28 : vector<8x128x1xf32>
      %c0_20 = arith.constant 0 : index
      %c0_21 = arith.constant 0 : index
      %c1 = arith.constant 1 : index
      %30 = vector.load %arg8[%c0_20, %c0_21, %c1] : memref<8x128x128xf32, #tpu.memory_space<vmem>>, vector<8x128x1xf32>
      %31 = arith.mulf %29, %30 : vector<8x128x1xf32>
      %cst_22 = arith.constant dense<0.000000e+00> : vector<8x1xf32>
      %32 = vector.multi_reduction <add>, %31, %cst_22 [1] : vector<8x128x1xf32> to vector<8x1xf32>
      %33 = vector.shape_cast %32 : vector<8x1xf32> to vector<8x1x1xf32>
      %cst_23 = arith.constant dense<0.000000e+00> : vector<8x1xf32>
      %34 = vector.multi_reduction <add>, %29, %cst_23 [1] : vector<8x128x1xf32> to vector<8x1xf32>
      %35 = vector.shape_cast %34 : vector<8x1xf32> to vector<8x1x1xf32>
      %36 = arith.divf %33, %35 : vector<8x1x1xf32>
      %c0_24 = arith.constant 0 : index
      %37 = memref.load %arg6[%c0_24] : memref<1xf32, #tpu.memory_space<smem>>
      %38 = vector.broadcast %37 : f32 to vector<8x1x1xf32>
      %39 = arith.addf %36, %38 : vector<8x1x1xf32>
      %c0_25 = arith.constant 0 : index
      %c0_26 = arith.constant 0 : index
      %c0_27 = arith.constant 0 : index
      %40 = vector.load %arg7[%c0_25, %c0_26, %c0_27] : memref<8x1x1xf32, #tpu.memory_space<vmem>>, vector<8x1x1xf32>
      tpu.vector_store %arg7[%c0_25, %c0_26, %c0_27], %39 {strides = array<i32>} : memref<8x1x1xf32, #tpu.memory_space<vmem>>, vector<8x1x1xf32>,
    } else {
    }
    return
  }
  func.func @transform_0(%arg0: i32, %arg1: i32) -> (i32, i32, i32, i32) {
    %c0_i32 = arith.constant 0 : i32
    %c0_i32_0 = arith.constant 0 : i32
    %c0_i32_1 = arith.constant 0 : i32
    return %arg1, %arg0, %c0_i32, %c0_i32_0 : i32, i32, i32, i32
  }
  func.func @transform_1(%arg0: i32, %arg1: i32) -> (i32, i32, i32) {
    %c0_i32 = arith.constant 0 : i32
    %c0_i32_0 = arith.constant 0 : i32
    %c0_i32_1 = arith.constant 0 : i32
    return %arg1, %c0_i32, %c0_i32_0 : i32, i32, i32
  }
  func.func @transform_2(%arg0: i32, %arg1: i32) -> (i32, i32, i32) {
    %c0_i32 = arith.constant 0 : i32
    %c0_i32_0 = arith.constant 0 : i32
    %c0_i32_1 = arith.constant 0 : i32
    return %arg0, %c0_i32, %c0_i32_0 : i32, i32, i32
  }
  func.func @transform_3(%arg0: i32, %arg1: i32) -> i32 {
    %c0_i32 = arith.constant 0 : i32
    %c0_i32_0 = arith.constant 0 : i32
    return %c0_i32 : i32
  }
  func.func @transform_4(%arg0: i32, %arg1: i32) -> i32 {
    %c0_i32 = arith.constant 0 : i32
    %c0_i32_0 = arith.constant 0 : i32
    return %c0_i32 : i32
  }
  func.func @transform_5(%arg0: i32, %arg1: i32) -> (i32, i32, i32) {
    %c0_i32 = arith.constant 0 : i32
    %c0_i32_0 = arith.constant 0 : i32
    %c0_i32_1 = arith.constant 0 : i32
    return %arg0, %c0_i32, %c0_i32_0 : i32, i32, i32
  }
}

</mosaic_0001>

<bundles_post_ra>
// kernel: tpu_custom_call.1
= control target key start
LH: loop header
LB: loop body
LE: loop exit
PB: predicated region body
PF: predicated region fallthrough
CT: control target
= control target key end

     0   :  { %s8192_s0 = inlined_call_operand.hbm [shape: f32[4,16,128,128], index: 0, kind: input, shape index: {}]   ;;  %s8193_s1 = inlined_call_operand.hbm [shape: f32[4,128,128], index: 1, kind: input, shape index: {}]   ;;  %s8194_s2 = inlined_call_operand.vmem [shape: f32[16,128,1], index: 2, kind: input, shape index: {}]   ;;  %s8195_s3 = inlined_call_operand.<no memory space> [shape: f32[1], index: 3, kind: input, shape index: {}]   ;;  %s8196_s4 = inlined_call_operand.<no memory space> [shape: f32[1], index: 4, kind: input, shape index: {}]   ;;  %s8197_s5 = inlined_call_operand.vmem [shape: f32[16,1,1], index: 5, kind: output, shape index: {}]  }
   0x1   :  { %8274 = sst [smem:[#allocation119_spill]] %s8192_s0 }
   0x2   :  { %10 = sst [smem:[#allocation3]] %s8195_s3 }
   0x3   :  { %11 = sst [smem:[#allocation4]] %s8196_s4 }
   0x4   :  { %12 = vsyncpa [#allocation6], 0 }
   0x5   :  { %14 = vsyncpa [#allocation6 + $0x1], 0 }
   0x6   :  { %15 = vsyncpa [#allocation8], 0 }
   0x7   :  { %17 = vsyncpa [#allocation8 + $0x1], 0  ;;  %s4852_s22 = smov 0   ;;  %s4854_s23 = smov 0  }
   0x8   :  { %s4856_s24 = smov 0   ;;  %s4858_s25 = smov 0  }
   0x9   :  { %s4860_s26 = smov 0   ;;  %s4862_s27 = smov 0  }
   0xa   :  { %s4864_s3 = smov 0   ;;  %s4866_s28 = smov 0  }
   0xb   :  { %s4868_s4 = smov 0   ;;  %s4870_s29 = smov 0  }
   0xc   :  { %s4872_s30 = smov 0  }
   0xd LB: > { %8275 = sst [smem:[#allocation11_spill]] %s4803_s4  ;;  %s4207_s6 = sadd.s32 4294967295, %s4811_s30   ;;  %s4811_s30 = sphi %s4872_s30, %s23_s30   ;;  %s4807_s29 = sphi %s4870_s29, %s8651_s29   ;;  %s4803_s4 = sphi %s4868_s4, %s8650_s4   ;;  %s4799_s28 = sphi %s4866_s28, %s8649_s28   ;;  %s4795_s3 = sphi %s4864_s3, %s8648_s3   ;;  %s4791_s27 = sphi %s4862_s27, %s8657_s27   ;;  %s4787_s26 = sphi %s4860_s26, %s8656_s26   ;;  %s4783_s25 = sphi %s4858_s25, %s8655_s25   ;;  %s4779_s24 = sphi %s4856_s24, %s8654_s24   ;;  %s4775_s23 = sphi %s4854_s23, %s8653_s23   ;;  %s4771_s22 = sphi %s4852_s22, %s8652_s22  }
   0xe   : > { %8276 = sst [smem:[#allocation12_spill]] %s4807_s29  ;;  %s32_s7 = sadd.s32 1, %s4803_s4 }
   0xf   : > { %p33_p0 = scmp.ge.s32.totalorder %s32_s7, 4  ;;  %s35_s8 = sadd.s32 1, %s4807_s29 }
  0x10   : > { %s44_s9 = sadd.s32 1, %s4791_s27  ;;  %p51_p1 = scmp.ne.s32.totalorder %s4791_s27, %s4787_s26 }
  0x11   : > { %s8659_s7 = smov (%p33_p0, %s32_s7), 0  ;;  %s8661_s8 = smov (!%p33_p0, %s35_s8), %s4807_s29 }
  0x12   : > { %8277 = sst [smem:[#allocation13_spill]] %s8659_s7  ;;  %s4916_s10 = ssub.s32 %s4803_s4, %s8659_s7 }
  0x13   : > { %p52_p2 = scmp.eq.s32.totalorder %s4811_s30, 0  ;;  %p37_p3 = scmp.ge.s32.totalorder %s8661_s8, 2 }
  0x14   : > { %p57_p4 = scmp.ne.s32.totalorder %s4787_s26, %s4783_s25  ;;  %p4926_p6 = scmp.eq.s32.totalorder %s4207_s6, 0 }
  0x15   : > { %p4922_p5 = por %p52_p2, %p51_p1  ;;  %s8663_s8 = smov (%p37_p3, %s8661_s8), 0 }
  0x16   : > { %8280 = sst [smem:[#allocation14_spill]] %s8663_s8  ;;  %p4934_p7 = por %p4926_p6, %p57_p4 }
  0x17   : > { %p68_p8 = scmp.eq.s32.totalorder %s4916_s10, 0  ;;  %s40_s14 = ssub.s32 %s4807_s29, %s8663_s8 }
  0x18   : > { %s41_s15 = sor.u32 %s40_s14, %s4916_s10  ;;  %p4293_p9 = scmp.lt.s32.totalorder %s4811_s30, 8 }
  0x19   : > { %p42_p10 = scmp.eq.s32.totalorder %s41_s15, 0  ;;  %s207_s16 = sand.u32 1, %s4791_s27  }
  0x1a   : > { %s4211_s17 = sshll.u32 %s207_s16, 10  ;;  %s4231_s19 = sshll.u32 %s4807_s29, 7 }
  0x1b   : > { %s4945_s18 = scalar_select %p42_p10, %s4791_s27, %s44_s9  }
  0x1c   : > { %s4214_s20 = sshll.u32 %s4803_s4, 8  ;;  %s211_s21 = scalar_lea.vmem [#allocation5], %s4211_s17 }
  0x1d   : > { %s222_s25 = sshll.u32 %s211_s21, 4  ;;  %s217_s6 = sadd.s32 %s4231_s19, %s4214_s20  ;;  %s223_s25 = int_to_ptr.vmem [resolvable:$true] %s222_s25 }
  0x1e   : > { %s4215_s14 = sshll.u32 %s217_s6, 3  ;;  %p4287_p11 = pnand %p4293_p9, %p4922_p5 }
  0x1f   : > { %s8282_s0 = sld [smem:[#allocation119_spill]]  ;;  %s208_s19 = scalar_lea.sflag [#allocation6], %s207_s16 }
  0x20   : > { %s4813_s20 = smov 128   ;;  %s4814_s8 = smov 8  }
  0x21   : > { %p4219_p12 = scmp.ge.s32.totalorder %s4811_s30, 1  ;;  %p262_p13 = scmp.lt.s32.totalorder %s4811_s30, 9 }
  0x22   : > { %s70_s6 = sadd.s32 1, %s4779_s24  ;;  %p77_p1 = scmp.ne.s32.totalorder %s4779_s24, %s4775_s23 }
  0x23   : > { %p4958_p0 = pnand %p4219_p12, %p262_p13  ;;  %p83_p3 = scmp.ne.s32.totalorder %s4775_s23, %s4771_s22 }
  0x24   : > { %s4966_s9 = scalar_select %p68_p8, %s4779_s24, %s70_s6  }
  0x25   : > { %s219_s17 = scalar_lea.hbm %s8282_s0, %s4215_s14  ;;  %s232_s14 = sand.u32 1, %s4779_s24  }
  0x26   : > { %s220_s21 = sshll.u32 %s219_s17, 4  ;;  %s4232_s15 = sshll.u32 %s4803_s4, 7  ;;  %s221_s21 = int_to_ptr.hbm [resolvable:$true] %s220_s21 }
  0x27   : > { %4289 = dma.hbm_to_vmem [thread:$0]  (!%p4287_p11), %s221_s21, 16384, %s223_s25, %s208_s19, %s4813_s20, %s4813_s20, %s4814_s8  }
  0x28   : > { %p4976_p4 = por %p83_p3, %p4926_p6  ;;  %p79_p5 = por %p77_p1, %p52_p2 }
  0x29   : > { %s4216_s25 = sshll.u32 %s232_s14, 7  ;;  %s241_s19 = scalar_lea.hbm %s8193_s1, %s4232_s15 }
  0x2a   : > { %s242_s0 = sshll.u32 %s241_s19, 4  ;;  %s236_s10 = scalar_lea.vmem [#allocation7], %s4216_s25  ;;  %s243_s0 = int_to_ptr.hbm [resolvable:$true] %s242_s0 }
  0x2b   : > { %s244_s6 = sshll.u32 %s236_s10, 4  ;;  %p4290_p8 = pnand %p4293_p9, %p79_p5  ;;  %s245_s6 = int_to_ptr.vmem [resolvable:$true] %s244_s6 }
  0x2c   : > { %s233_s22 = scalar_lea.sflag [#allocation8], %s232_s14  ;;  %266 = sbr.rel (%p4958_p0) target bundleno = 1269 (0x4f5), region = 40 }
  0x2d   : > { %4292 = dma.hbm_to_vmem [thread:$0]  (!%p4290_p8), %s243_s0, 2048, %s245_s6, %s233_s22, %s4813_s20, %s4813_s20, %s4814_s8  }
  0x31   : > { %s268_s12 = sand.u32 1, %s4787_s26  }
  0x32   : > { %s4220_s7 = sshll.u32 %s268_s12, 10  ;;  %s269_s29 = scalar_lea.sflag [#allocation6], %s268_s12 }
  0x33   : > { %s4990_s4 = scalar_lea.vmem [#allocation5], %s4220_s7 }
  0x34   : > { %4762 = dma.done.wait (%p4934_p7), %s269_s29, 16384  }
  0x35   : > { %4764 = vsyncadd (%p4934_p7), %s269_s29, 4294950912  ;;  %s278_s15 = sand.u32 1, %s4775_s23  }
  0x36   : > { %s4221_s14 = sshll.u32 %s278_s15, 7  ;;  %s279_s0 = scalar_lea.sflag [#allocation8], %s278_s15 }
  0x37   : > { %s4997_s8 = scalar_lea.vmem [#allocation7], %s4221_s14 }
  0x38   : > { %4766 = dma.done.wait (%p4976_p4), %s279_s0, 2048  }
  0x39   : > { %4768 = vsyncadd (%p4976_p4), %s279_s0, 4294965248  ;;  %s4222_s7 = sshll.u32 %s4799_s28, 3  ;;  %v476_v0 = vld [vmem:[%s4997_s8 + $0x78] sm:$0xff]  ;;  %v475_v1 = vld [vmem:[%s4997_s8 + $0x70] sm:$0xff]  ;;  %p4226_p6 = scmp.ne.s32.totalorder %s4795_s3, 0 }
  0x3a   : > { %p322_p2 = scmp.lt.s32.totalorder %s4222_s7, 15  ;;  %4235 = vmatpush.msra.mxu2 %v476_v0  ;;  %4236 = vmatpush.msra.mxu3 %v476_v0  ;;  %v474_v2 = vld [vmem:[%s4997_s8 + $0x68] sm:$0xff]  ;;  %v473_v3 = vld [vmem:[%s4997_s8 + $0x60] sm:$0xff]  ;;  %v472_v4 = vld [vmem:[%s4997_s8 + $0x58] sm:$0xff] }
  0x3b   : > { %477 = vmatpush.msra.mxu0 %v476_v0  ;;  %4234 = vmatpush.msra.mxu1 %v476_v0  ;;  %v471_v5 = vld [vmem:[%s4997_s8 + $0x50] sm:$0xff]  ;;  %v470_v6 = vld [vmem:[%s4997_s8 + $0x48] sm:$0xff]  ;;  %v469_v7 = vld [vmem:[%s4997_s8 + $0x40] sm:$0xff] }
  0x3c   : > { %s8665_s7 = smov (!%p322_p2, %s4222_s7), 15  ;;  %4238 = vmatpush.msra.mxu2 %v475_v1  ;;  %4239 = vmatpush.msra.mxu3 %v475_v1  ;;  %v468_v8 = vld [vmem:[%s4997_s8 + $0x38] sm:$0xff]  ;;  %v467_v9 = vld [vmem:[%s4997_s8 + $0x30] sm:$0xff]  ;;  %v466_v10 = vld [vmem:[%s4997_s8 + $0x28] sm:$0xff] }
  0x3d   : > { %s4233_s29 = sshll.u32 %s8665_s7, 7  ;;  %s5007_s11 = scalar_lea.vmem %s8197_s5, %s8665_s7  ;;  %478 = vmatpush.msra.mxu0 %v475_v1  ;;  %4237 = vmatpush.msra.mxu1 %v475_v1  ;;  %v465_v11 = vld [vmem:[%s4997_s8 + $0x20] sm:$0xff]  ;;  %v464_v12 = vld [vmem:[%s4997_s8 + $0x18] sm:$0xff]  ;;  %v463_v13 = vld [vmem:[%s4997_s8 + $0x10] sm:$0xff] }
  0x3e   : > { %s5012_s16 = scalar_lea.vmem %s8194_s2, %s4233_s29  ;;  %4241 = vmatpush.msra.mxu2 %v474_v2  ;;  %4242 = vmatpush.msra.mxu3 %v474_v2  ;;  %v462_v14 = vld [vmem:[%s4997_s8 + $0x8] sm:$0xff]  ;;  %v461_v15 = vld [vmem:[%s4997_s8] sm:$0xff]  ;;  %v399_v24 = vld [vmem:[%s4990_s4 + $0x210] sm:$0xff] }
  0x3f   : > { %479 = vmatpush.msra.mxu0 %v474_v2  ;;  %4240 = vmatpush.msra.mxu1 %v474_v2  ;;  %v397_v16 = vld [vmem:[%s4990_s4 + $0x200] sm:$0xff]  ;;  %v398_v20 = vld [vmem:[%s4990_s4 + $0x208] sm:$0xff]  ;;  %v431_v25 = vld [vmem:[%s4990_s4 + $0x310] sm:$0xff] }
  0x40   : > { %4244 = vmatpush.msra.mxu2 %v473_v3  ;;  %4245 = vmatpush.msra.mxu3 %v473_v3  ;;  %v429_v17 = vld [vmem:[%s4990_s4 + $0x300] sm:$0xff]  ;;  %v430_v21 = vld [vmem:[%s4990_s4 + $0x308] sm:$0xff]  ;;  %v335_v26 = vld [vmem:[%s4990_s4 + $0x10] sm:$0xff] }
  0x41   : > { %480 = vmatpush.msra.mxu0 %v473_v3  ;;  %4243 = vmatpush.msra.mxu1 %v473_v3  ;;  %v333_v18 = vld [vmem:[%s4990_s4] sm:$0xff]  ;;  %v334_v22 = vld [vmem:[%s4990_s4 + $0x8] sm:$0xff]  ;;  %v367_v27 = vld [vmem:[%s4990_s4 + $0x110] sm:$0xff] }
  0x42   : > { %4247 = vmatpush.msra.mxu2 %v472_v4  ;;  %4248 = vmatpush.msra.mxu3 %v472_v4  ;;  %v365_v19 = vld [vmem:[%s4990_s4 + $0x100] sm:$0xff]  ;;  %v366_v23 = vld [vmem:[%s4990_s4 + $0x108] sm:$0xff]  ;;  %v400_v28 = vld [vmem:[%s4990_s4 + $0x218] sm:$0xff] }
  0x43   : > { %481 = vmatpush.msra.mxu0 %v472_v4  ;;  %4246 = vmatpush.msra.mxu1 %v472_v4  ;;  %v432_v29 = vld [vmem:[%s4990_s4 + $0x318] sm:$0xff]  ;;  %v401_v32 = vld [vmem:[%s4990_s4 + $0x220] sm:$0xff]  ;;  %v402_v36 = vld [vmem:[%s4990_s4 + $0x228] sm:$0xff] }
  0x44   : > { %4250 = vmatpush.msra.mxu2 %v471_v5  ;;  %4251 = vmatpush.msra.mxu3 %v471_v5  ;;  %v336_v30 = vld [vmem:[%s4990_s4 + $0x18] sm:$0xff]  ;;  %v433_v33 = vld [vmem:[%s4990_s4 + $0x320] sm:$0xff]  ;;  %v434_v37 = vld [vmem:[%s4990_s4 + $0x328] sm:$0xff] }
  0x45   : > { %482 = vmatpush.msra.mxu0 %v471_v5  ;;  %4249 = vmatpush.msra.mxu1 %v471_v5  ;;  %v368_v31 = vld [vmem:[%s4990_s4 + $0x118] sm:$0xff]  ;;  %v337_v34 = vld [vmem:[%s4990_s4 + $0x20] sm:$0xff]  ;;  %v338_v38 = vld [vmem:[%s4990_s4 + $0x28] sm:$0xff] }
  0x46   : > { %4253 = vmatpush.msra.mxu2 %v470_v6  ;;  %4254 = vmatpush.msra.mxu3 %v470_v6  ;;  %v369_v35 = vld [vmem:[%s4990_s4 + $0x120] sm:$0xff]  ;;  %v370_v39 = vld [vmem:[%s4990_s4 + $0x128] sm:$0xff]  ;;  %v403_v40 = vld [vmem:[%s4990_s4 + $0x230] sm:$0xff] }
  0x47   : > { %483 = vmatpush.msra.mxu0 %v470_v6  ;;  %4252 = vmatpush.msra.mxu1 %v470_v6  ;;  %v435_v41 = vld [vmem:[%s4990_s4 + $0x330] sm:$0xff]  ;;  %v404_v44 = vld [vmem:[%s4990_s4 + $0x238] sm:$0xff]  ;;  %v405_v48 = vld [vmem:[%s4990_s4 + $0x240] sm:$0xff] }
  0x48   : > { %4256 = vmatpush.msra.mxu2 %v469_v7  ;;  %4257 = vmatpush.msra.mxu3 %v469_v7  ;;  %v339_v42 = vld [vmem:[%s4990_s4 + $0x30] sm:$0xff]  ;;  %v436_v45 = vld [vmem:[%s4990_s4 + $0x338] sm:$0xff]  ;;  %v437_v49 = vld [vmem:[%s4990_s4 + $0x340] sm:$0xff] }
  0x49   : > { %484 = vmatpush.msra.mxu0 %v469_v7  ;;  %4255 = vmatpush.msra.mxu1 %v469_v7  ;;  %v371_v43 = vld [vmem:[%s4990_s4 + $0x130] sm:$0xff]  ;;  %v340_v46 = vld [vmem:[%s4990_s4 + $0x38] sm:$0xff]  ;;  %v341_v50 = vld [vmem:[%s4990_s4 + $0x40] sm:$0xff] }
  0x4a   : > { %4259 = vmatpush.msra.mxu2 %v468_v8  ;;  %4260 = vmatpush.msra.mxu3 %v468_v8  ;;  %v372_v47 = vld [vmem:[%s4990_s4 + $0x138] sm:$0xff]  ;;  %v373_v51 = vld [vmem:[%s4990_s4 + $0x140] sm:$0xff]  ;;  %v406_v52 = vld [vmem:[%s4990_s4 + $0x248] sm:$0xff] }
  0x4b   : > { %485 = vmatpush.msra.mxu0 %v468_v8  ;;  %4258 = vmatpush.msra.mxu1 %v468_v8  ;;  %v438_v53 = vld [vmem:[%s4990_s4 + $0x348] sm:$0xff]  ;;  %v407_v56 = vld [vmem:[%s4990_s4 + $0x250] sm:$0xff]  ;;  %v408_v60 = vld [vmem:[%s4990_s4 + $0x258] sm:$0xff] }
  0x4c   : > { %4262 = vmatpush.msra.mxu2 %v467_v9  ;;  %4263 = vmatpush.msra.mxu3 %v467_v9  ;;  %v342_v54 = vld [vmem:[%s4990_s4 + $0x48] sm:$0xff]  ;;  %v439_v57 = vld [vmem:[%s4990_s4 + $0x350] sm:$0xff]  ;;  %v440_v61 = vld [vmem:[%s4990_s4 + $0x358] sm:$0xff] }
  0x4d   : > { %486 = vmatpush.msra.mxu0 %v467_v9  ;;  %4261 = vmatpush.msra.mxu1 %v467_v9  ;;  %v374_v55 = vld [vmem:[%s4990_s4 + $0x148] sm:$0xff]  ;;  %v343_v58 = vld [vmem:[%s4990_s4 + $0x50] sm:$0xff]  ;;  %v344_v62 = vld [vmem:[%s4990_s4 + $0x58] sm:$0xff] }
  0x4e   : > { %4265 = vmatpush.msra.mxu2 %v466_v10  ;;  %4266 = vmatpush.msra.mxu3 %v466_v10  ;;  %v375_v59 = vld [vmem:[%s4990_s4 + $0x150] sm:$0xff]  ;;  %v376_v63 = vld [vmem:[%s4990_s4 + $0x158] sm:$0xff]  ;;  %v409_v0 = vld [vmem:[%s4990_s4 + $0x260] sm:$0xff] }
  0x4f   : > { %487 = vmatpush.msra.mxu0 %v466_v10  ;;  %4264 = vmatpush.msra.mxu1 %v466_v10  ;;  %v441_v1 = vld [vmem:[%s4990_s4 + $0x360] sm:$0xff]  ;;  %v410_v4 = vld [vmem:[%s4990_s4 + $0x268] sm:$0xff]  ;;  %v411_v8 = vld [vmem:[%s4990_s4 + $0x270] sm:$0xff] }
  0x50   : > { %4268 = vmatpush.msra.mxu2 %v465_v11  ;;  %4269 = vmatpush.msra.mxu3 %v465_v11  ;;  %v345_v2 = vld [vmem:[%s4990_s4 + $0x60] sm:$0xff]  ;;  %v442_v5 = vld [vmem:[%s4990_s4 + $0x368] sm:$0xff]  ;;  %v443_v9 = vld [vmem:[%s4990_s4 + $0x370] sm:$0xff] }
  0x51   : > { %488 = vmatpush.msra.mxu0 %v465_v11  ;;  %4267 = vmatpush.msra.mxu1 %v465_v11  ;;  %v377_v3 = vld [vmem:[%s4990_s4 + $0x160] sm:$0xff]  ;;  %v346_v6 = vld [vmem:[%s4990_s4 + $0x68] sm:$0xff]  ;;  %v347_v10 = vld [vmem:[%s4990_s4 + $0x70] sm:$0xff] }
  0x52   : > { %4271 = vmatpush.msra.mxu2 %v464_v12  ;;  %4272 = vmatpush.msra.mxu3 %v464_v12  ;;  %v378_v7 = vld [vmem:[%s4990_s4 + $0x168] sm:$0xff]  ;;  %v379_v11 = vld [vmem:[%s4990_s4 + $0x170] sm:$0xff] }
  0x53   : > { %489 = vmatpush.msra.mxu0 %v464_v12  ;;  %4270 = vmatpush.msra.mxu1 %v464_v12  ;;  %v412_v12 = vld [vmem:[%s4990_s4 + $0x278] sm:$0xff] }
  0x54   : > { %4274 = vmatpush.msra.mxu2 %v463_v13  ;;  %4275 = vmatpush.msra.mxu3 %v463_v13 }
  0x55   : > { %490 = vmatpush.msra.mxu0 %v463_v13  ;;  %4273 = vmatpush.msra.mxu1 %v463_v13  ;;  %v444_v13 = vld [vmem:[%s4990_s4 + $0x378] sm:$0xff] }
  0x56   : > { %4277 = vmatpush.msra.mxu2 %v462_v14  ;;  %4278 = vmatpush.msra.mxu3 %v462_v14 }
  0x57   : > { %491 = vmatpush.msra.mxu0 %v462_v14  ;;  %4276 = vmatpush.msra.mxu1 %v462_v14  ;;  %v348_v14 = vld [vmem:[%s4990_s4 + $0x78] sm:$0xff] }
  0x58   : > { %4280 = vmatpush.msra.mxu2 %v461_v15  ;;  %4281 = vmatpush.msra.mxu3 %v461_v15 }
  0x59   : > { %685 = vmatmul.f32.vlgmr.msra.gmra.mxu2 %v397_v16  ;;  %781 = vmatmul.f32.vlgmr.msra.gmra.mxu3 %v429_v17  ;;  %v413_v16 = vld [vmem:[%s4990_s4 + $0x280] sm:$0xff] }
  0x5a   : > { %492 = vmatpush.msra.mxu0 %v461_v15  ;;  %4279 = vmatpush.msra.mxu1 %v461_v15  ;;  %v380_v15 = vld [vmem:[%s4990_s4 + $0x178] sm:$0xff]  ;;  %v445_v17 = vld [vmem:[%s4990_s4 + $0x380] sm:$0xff] }
  0x5b   : > { %493 = vmatmul.f32.vlgmr.msra.gmra.mxu0 %v333_v18  ;;  %589 = vmatmul.f32.vlgmr.msra.gmra.mxu1 %v365_v19 }
  0x61   : > { %688 = vmatmul.f32.gmra.mxu2 %v398_v20  ;;  %784 = vmatmul.f32.gmra.mxu3 %v430_v21  ;;  %v349_v20 = vld [vmem:[%s4990_s4 + $0x80] sm:$0xff] }
  0x62   : > { %v381_v21 = vld [vmem:[%s4990_s4 + $0x180] sm:$0xff] }
  0x63   : > { %496 = vmatmul.f32.gmra.mxu0 %v334_v22  ;;  %592 = vmatmul.f32.gmra.mxu1 %v366_v23 }
  0x69   : > { %691 = vmatmul.f32.gmra.mxu2 %v399_v24  ;;  %787 = vmatmul.f32.gmra.mxu3 %v431_v25  ;;  %v414_v24 = vld [vmem:[%s4990_s4 + $0x288] sm:$0xff] }
  0x6a   : > { %v446_v25 = vld [vmem:[%s4990_s4 + $0x388] sm:$0xff] }
  0x6b   : > { %499 = vmatmul.f32.gmra.mxu0 %v335_v26  ;;  %595 = vmatmul.f32.gmra.mxu1 %v367_v27 }
  0x71   : > { %694 = vmatmul.f32.gmra.mxu2 %v400_v28  ;;  %790 = vmatmul.f32.gmra.mxu3 %v432_v29  ;;  %v350_v28 = vld [vmem:[%s4990_s4 + $0x88] sm:$0xff] }
  0x72   : > { %v382_v29 = vld [vmem:[%s4990_s4 + $0x188] sm:$0xff] }
  0x73   : > { %502 = vmatmul.f32.gmra.mxu0 %v336_v30  ;;  %598 = vmatmul.f32.gmra.mxu1 %v368_v31 }
  0x79   : > { %697 = vmatmul.f32.gmra.mxu2 %v401_v32  ;;  %793 = vmatmul.f32.gmra.mxu3 %v433_v33  ;;  %v415_v32 = vld [vmem:[%s4990_s4 + $0x290] sm:$0xff] }
  0x7a   : > { %v447_v33 = vld [vmem:[%s4990_s4 + $0x390] sm:$0xff] }
  0x7b   : > { %505 = vmatmul.f32.gmra.mxu0 %v337_v34  ;;  %601 = vmatmul.f32.gmra.mxu1 %v369_v35 }
  0x81   : > { %700 = vmatmul.f32.gmra.mxu2 %v402_v36  ;;  %796 = vmatmul.f32.gmra.mxu3 %v434_v37  ;;  %v351_v36 = vld [vmem:[%s4990_s4 + $0x90] sm:$0xff] }
  0x82   : > { %v383_v37 = vld [vmem:[%s4990_s4 + $0x190] sm:$0xff] }
  0x83   : > { %508 = vmatmul.f32.gmra.mxu0 %v338_v38  ;;  %604 = vmatmul.f32.gmra.mxu1 %v370_v39 }
  0x89   : > { %703 = vmatmul.f32.gmra.mxu2 %v403_v40  ;;  %799 = vmatmul.f32.gmra.mxu3 %v435_v41  ;;  %v416_v40 = vld [vmem:[%s4990_s4 + $0x298] sm:$0xff] }
  0x8a   : > { %v448_v41 = vld [vmem:[%s4990_s4 + $0x398] sm:$0xff] }
  0x8b   : > { %511 = vmatmul.f32.gmra.mxu0 %v339_v42  ;;  %607 = vmatmul.f32.gmra.mxu1 %v371_v43 }
  0x91   : > { %706 = vmatmul.f32.gmra.mxu2 %v404_v44  ;;  %802 = vmatmul.f32.gmra.mxu3 %v436_v45  ;;  %v352_v44 = vld [vmem:[%s4990_s4 + $0x98] sm:$0xff] }
  0x92   : > { %v384_v45 = vld [vmem:[%s4990_s4 + $0x198] sm:$0xff] }
  0x93   : > { %514 = vmatmul.f32.gmra.mxu0 %v340_v46  ;;  %610 = vmatmul.f32.gmra.mxu1 %v372_v47 }
  0x99   : > { %709 = vmatmul.f32.gmra.mxu2 %v405_v48  ;;  %805 = vmatmul.f32.gmra.mxu3 %v437_v49  ;;  %v417_v48 = vld [vmem:[%s4990_s4 + $0x2a0] sm:$0xff] }
  0x9a   : > { %v449_v49 = vld [vmem:[%s4990_s4 + $0x3a0] sm:$0xff] }
  0x9b   : > { %517 = vmatmul.f32.gmra.mxu0 %v341_v50  ;;  %613 = vmatmul.f32.gmra.mxu1 %v373_v51 }
  0xa1   : > { %712 = vmatmul.f32.gmra.mxu2 %v406_v52  ;;  %808 = vmatmul.f32.gmra.mxu3 %v438_v53  ;;  %v353_v52 = vld [vmem:[%s4990_s4 + $0xa0] sm:$0xff] }
  0xa2   : > { %v385_v53 = vld [vmem:[%s4990_s4 + $0x1a0] sm:$0xff] }
  0xa3   : > { %520 = vmatmul.f32.gmra.mxu0 %v342_v54  ;;  %616 = vmatmul.f32.gmra.mxu1 %v374_v55 }
  0xa9   : > { %715 = vmatmul.f32.gmra.mxu2 %v407_v56  ;;  %811 = vmatmul.f32.gmra.mxu3 %v439_v57  ;;  %v418_v56 = vld [vmem:[%s4990_s4 + $0x2a8] sm:$0xff] }
  0xaa   : > { %v450_v57 = vld [vmem:[%s4990_s4 + $0x3a8] sm:$0xff] }
  0xab   : > { %523 = vmatmul.f32.gmra.mxu0 %v343_v58  ;;  %619 = vmatmul.f32.gmra.mxu1 %v375_v59 }
  0xb1   : > { %718 = vmatmul.f32.gmra.mxu2 %v408_v60  ;;  %814 = vmatmul.f32.gmra.mxu3 %v440_v61  ;;  %v354_v60 = vld [vmem:[%s4990_s4 + $0xa8] sm:$0xff] }
  0xb2   : > { %v386_v61 = vld [vmem:[%s4990_s4 + $0x1a8] sm:$0xff] }
  0xb3   : > { %526 = vmatmul.f32.gmra.mxu0 %v344_v62  ;;  %622 = vmatmul.f32.gmra.mxu1 %v376_v63 }
  0xb9   : > { %721 = vmatmul.f32.gmra.mxu2 %v409_v0  ;;  %817 = vmatmul.f32.gmra.mxu3 %v441_v1  ;;  %v419_v0 = vld [vmem:[%s4990_s4 + $0x2b0] sm:$0xff] }
  0xba   : > { %v451_v1 = vld [vmem:[%s4990_s4 + $0x3b0] sm:$0xff] }
  0xbb   : > { %529 = vmatmul.f32.gmra.mxu0 %v345_v2  ;;  %625 = vmatmul.f32.gmra.mxu1 %v377_v3 }
  0xc1   : > { %724 = vmatmul.f32.gmra.mxu2 %v410_v4  ;;  %820 = vmatmul.f32.gmra.mxu3 %v442_v5  ;;  %v355_v4 = vld [vmem:[%s4990_s4 + $0xb0] sm:$0xff] }
  0xc2   : > { %v387_v5 = vld [vmem:[%s4990_s4 + $0x1b0] sm:$0xff] }
  0xc3   : > { %532 = vmatmul.f32.gmra.mxu0 %v346_v6  ;;  %628 = vmatmul.f32.gmra.mxu1 %v378_v7 }
  0xc9   : > { %727 = vmatmul.f32.gmra.mxu2 %v411_v8  ;;  %823 = vmatmul.f32.gmra.mxu3 %v443_v9  ;;  %v420_v8 = vld [vmem:[%s4990_s4 + $0x2b8] sm:$0xff] }
  0xca   : > { %v452_v9 = vld [vmem:[%s4990_s4 + $0x3b8] sm:$0xff] }
  0xcb   : > { %535 = vmatmul.f32.gmra.mxu0 %v347_v10  ;;  %631 = vmatmul.f32.gmra.mxu1 %v379_v11 }
  0xd1   : > { %730 = vmatmul.f32.gmra.mxu2 %v412_v12  ;;  %826 = vmatmul.f32.gmra.mxu3 %v444_v13  ;;  %v356_v12 = vld [vmem:[%s4990_s4 + $0xb8] sm:$0xff] }
  0xd2   : > { %v388_v13 = vld [vmem:[%s4990_s4 + $0x1b8] sm:$0xff] }
  0xd3   : > { %538 = vmatmul.f32.gmra.mxu0 %v348_v14  ;;  %634 = vmatmul.f32.gmra.mxu1 %v380_v15 }
  0xd8   : > { %v5096_v18 = vpop.f32.mrf.mxu0  ;;  %v5098_v19 = vpop.f32.mrf.mxu1 }
  0xd9   : > { %733 = vmatmul.f32.gmra.mxu2 %v413_v16  ;;  %829 = vmatmul.f32.gmra.mxu3 %v445_v17  ;;  %v421_v16 = vld [vmem:[%s4990_s4 + $0x2c0] sm:$0xff] }
  0xda   : > { %v453_v17 = vld [vmem:[%s4990_s4 + $0x3c0] sm:$0xff] }
  0xdb   : > { %541 = vmatmul.f32.gmra.mxu0 %v349_v20  ;;  %637 = vmatmul.f32.gmra.mxu1 %v381_v21 }
  0xdc   : > { %v5102_v22 = vpop.f32.mrf.mxu2  ;;  %v5104_v23 = vpop.f32.mrf.mxu3 }
  0xdd   : > { %8285 = vst [vmem:[#allocation15_spill] sm:$0xff] %v5102_v22 }
  0xde   : > { %8286 = vst [vmem:[#allocation16_spill] sm:$0xff] %v5104_v23 }
  0xe0   : > { %v5108_v26 = vpop.f32.mrf.mxu0  ;;  %v5110_v27 = vpop.f32.mrf.mxu1 }
  0xe1   : > { %736 = vmatmul.f32.gmra.mxu2 %v414_v24  ;;  %832 = vmatmul.f32.gmra.mxu3 %v446_v25  ;;  %v357_v24 = vld [vmem:[%s4990_s4 + $0xc0] sm:$0xff] }
  0xe2   : > { %v389_v25 = vld [vmem:[%s4990_s4 + $0x1c0] sm:$0xff] }
  0xe3   : > { %544 = vmatmul.f32.gmra.mxu0 %v350_v28  ;;  %640 = vmatmul.f32.gmra.mxu1 %v382_v29 }
  0xe4   : > { %v5114_v30 = vpop.f32.mrf.mxu2  ;;  %v5116_v31 = vpop.f32.mrf.mxu3 }
  0xe5   : > { %8287 = vst [vmem:[#allocation17_spill] sm:$0xff] %v5114_v30 }
  0xe6   : > { %8288 = vst [vmem:[#allocation18_spill] sm:$0xff] %v5116_v31 }
  0xe8   : > { %v5120_v34 = vpop.f32.mrf.mxu0  ;;  %v5122_v35 = vpop.f32.mrf.mxu1 }
  0xe9   : > { %739 = vmatmul.f32.gmra.mxu2 %v415_v32  ;;  %835 = vmatmul.f32.gmra.mxu3 %v447_v33  ;;  %v422_v32 = vld [vmem:[%s4990_s4 + $0x2c8] sm:$0xff] }
  0xea   : > { %v454_v33 = vld [vmem:[%s4990_s4 + $0x3c8] sm:$0xff] }
  0xeb   : > { %547 = vmatmul.f32.gmra.mxu0 %v351_v36  ;;  %643 = vmatmul.f32.gmra.mxu1 %v383_v37 }
  0xec   : > { %v5126_v38 = vpop.f32.mrf.mxu2  ;;  %v5128_v39 = vpop.f32.mrf.mxu3 }
  0xed   : > { %8289 = vst [vmem:[#allocation19_spill] sm:$0xff] %v5126_v38 }
  0xee   : > { %8290 = vst [vmem:[#allocation20_spill] sm:$0xff] %v5128_v39 }
  0xf0   : > { %v5132_v42 = vpop.f32.mrf.mxu0  ;;  %v5134_v43 = vpop.f32.mrf.mxu1 }
  0xf1   : > { %742 = vmatmul.f32.gmra.mxu2 %v416_v40  ;;  %838 = vmatmul.f32.gmra.mxu3 %v448_v41  ;;  %v358_v40 = vld [vmem:[%s4990_s4 + $0xc8] sm:$0xff] }
  0xf2   : > { %v390_v41 = vld [vmem:[%s4990_s4 + $0x1c8] sm:$0xff] }
  0xf3   : > { %550 = vmatmul.f32.gmra.mxu0 %v352_v44  ;;  %646 = vmatmul.f32.gmra.mxu1 %v384_v45 }
  0xf4   : > { %v5138_v46 = vpop.f32.mrf.mxu2  ;;  %v5140_v47 = vpop.f32.mrf.mxu3 }
  0xf5   : > { %8291 = vst [vmem:[#allocation21_spill] sm:$0xff] %v5138_v46 }
  0xf6   : > { %8292 = vst [vmem:[#allocation22_spill] sm:$0xff] %v5140_v47 }
  0xf8   : > { %v5144_v50 = vpop.f32.mrf.mxu0  ;;  %v5146_v51 = vpop.f32.mrf.mxu1 }
  0xf9   : > { %745 = vmatmul.f32.gmra.mxu2 %v417_v48  ;;  %841 = vmatmul.f32.gmra.mxu3 %v449_v49  ;;  %v423_v48 = vld [vmem:[%s4990_s4 + $0x2d0] sm:$0xff] }
  0xfa   : > { %v455_v49 = vld [vmem:[%s4990_s4 + $0x3d0] sm:$0xff] }
  0xfb   : > { %553 = vmatmul.f32.gmra.mxu0 %v353_v52  ;;  %649 = vmatmul.f32.gmra.mxu1 %v385_v53 }
  0xfc   : > { %v5150_v54 = vpop.f32.mrf.mxu2  ;;  %v5152_v55 = vpop.f32.mrf.mxu3 }
  0xfd   : > { %8293 = vst [vmem:[#allocation23_spill] sm:$0xff] %v5150_v54 }
  0xfe   : > { %8294 = vst [vmem:[#allocation24_spill] sm:$0xff] %v5152_v55 }
 0x100   : > { %v5156_v58 = vpop.f32.mrf.mxu0  ;;  %v5158_v59 = vpop.f32.mrf.mxu1 }
 0x101   : > { %748 = vmatmul.f32.gmra.mxu2 %v418_v56  ;;  %844 = vmatmul.f32.gmra.mxu3 %v450_v57  ;;  %v359_v56 = vld [vmem:[%s4990_s4 + $0xd0] sm:$0xff] }
 0x102   : > { %v391_v57 = vld [vmem:[%s4990_s4 + $0x1d0] sm:$0xff] }
 0x103   : > { %556 = vmatmul.f32.gmra.mxu0 %v354_v60  ;;  %652 = vmatmul.f32.gmra.mxu1 %v386_v61 }
 0x104   : > { %v5162_v62 = vpop.f32.mrf.mxu2  ;;  %v5164_v63 = vpop.f32.mrf.mxu3 }
 0x105   : > { %8295 = vst [vmem:[#allocation25_spill] sm:$0xff] %v5162_v62 }
 0x106   : > { %8296 = vst [vmem:[#allocation26_spill] sm:$0xff] %v5164_v63 }
 0x108   : > { %v5168_v2 = vpop.f32.mrf.mxu0  ;;  %v5170_v3 = vpop.f32.mrf.mxu1 }
 0x109   : > { %751 = vmatmul.f32.gmra.mxu2 %v419_v0  ;;  %847 = vmatmul.f32.gmra.mxu3 %v451_v1  ;;  %v424_v0 = vld [vmem:[%s4990_s4 + $0x2d8] sm:$0xff] }
 0x10a   : > { %v456_v1 = vld [vmem:[%s4990_s4 + $0x3d8] sm:$0xff] }
 0x10b   : > { %559 = vmatmul.f32.gmra.mxu0 %v355_v4  ;;  %655 = vmatmul.f32.gmra.mxu1 %v387_v5 }
 0x10c   : > { %v5174_v6 = vpop.f32.mrf.mxu2  ;;  %v5176_v7 = vpop.f32.mrf.mxu3 }
 0x10d   : > { %8297 = vst [vmem:[#allocation27_spill] sm:$0xff] %v5174_v6 }
 0x10e   : > { %8298 = vst [vmem:[#allocation28_spill] sm:$0xff] %v5176_v7 }
 0x110   : > { %v5180_v10 = vpop.f32.mrf.mxu0  ;;  %v5182_v11 = vpop.f32.mrf.mxu1 }
 0x111   : > { %754 = vmatmul.f32.gmra.mxu2 %v420_v8  ;;  %850 = vmatmul.f32.gmra.mxu3 %v452_v9  ;;  %v360_v8 = vld [vmem:[%s4990_s4 + $0xd8] sm:$0xff] }
 0x112   : > { %v392_v9 = vld [vmem:[%s4990_s4 + $0x1d8] sm:$0xff] }
 0x113   : > { %562 = vmatmul.f32.gmra.mxu0 %v356_v12  ;;  %658 = vmatmul.f32.gmra.mxu1 %v388_v13 }
 0x114   : > { %v5186_v14 = vpop.f32.mrf.mxu2  ;;  %v5188_v15 = vpop.f32.mrf.mxu3 }
 0x115   : > { %8299 = vst [vmem:[#allocation29_spill] sm:$0xff] %v5186_v14 }
 0x116   : > { %8300 = vst [vmem:[#allocation30_spill] sm:$0xff] %v5188_v15 }
 0x118   : > { %v5192_v20 = vpop.f32.mrf.mxu0  ;;  %v5194_v21 = vpop.f32.mrf.mxu1 }
 0x119   : > { %757 = vmatmul.f32.gmra.mxu2 %v421_v16  ;;  %853 = vmatmul.f32.gmra.mxu3 %v453_v17  ;;  %v425_v16 = vld [vmem:[%s4990_s4 + $0x2e0] sm:$0xff] }
 0x11a   : > { %v457_v17 = vld [vmem:[%s4990_s4 + $0x3e0] sm:$0xff] }
 0x11b   : > { %565 = vmatmul.f32.gmra.mxu0 %v357_v24  ;;  %661 = vmatmul.f32.gmra.mxu1 %v389_v25 }
 0x11c   : > { %v5198_v28 = vpop.f32.mrf.mxu2  ;;  %v5200_v29 = vpop.f32.mrf.mxu3 }
 0x11d   : > { %8301 = vst [vmem:[#allocation31_spill] sm:$0xff] %v5198_v28 }
 0x11e   : > { %8302 = vst [vmem:[#allocation32_spill] sm:$0xff] %v5200_v29  ;;  %v396_v29 = vld [vmem:[%s4990_s4 + $0x1f8] sm:$0xff] }
 0x120   : > { %v5204_v36 = vpop.f32.mrf.mxu0  ;;  %v5206_v37 = vpop.f32.mrf.mxu1 }
 0x121   : > { %760 = vmatmul.f32.gmra.mxu2 %v422_v32  ;;  %856 = vmatmul.f32.gmra.mxu3 %v454_v33  ;;  %v361_v32 = vld [vmem:[%s4990_s4 + $0xe0] sm:$0xff] }
 0x122   : > { %v393_v33 = vld [vmem:[%s4990_s4 + $0x1e0] sm:$0xff] }
 0x123   : > { %568 = vmatmul.f32.gmra.mxu0 %v358_v40  ;;  %664 = vmatmul.f32.gmra.mxu1 %v390_v41 }
 0x124   : > { %v5210_v44 = vpop.f32.mrf.mxu2  ;;  %v5212_v45 = vpop.f32.mrf.mxu3 }
 0x125   : > { %8303 = vst [vmem:[#allocation33_spill] sm:$0xff] %v5210_v44 }
 0x126   : > { %8304 = vst [vmem:[#allocation34_spill] sm:$0xff] %v5212_v45  ;;  %v364_v45 = vld [vmem:[%s4990_s4 + $0xf8] sm:$0xff] }
 0x128   : > { %v5216_v52 = vpop.f32.mrf.mxu0  ;;  %v5218_v53 = vpop.f32.mrf.mxu1 }
 0x129   : > { %763 = vmatmul.f32.gmra.mxu2 %v423_v48  ;;  %859 = vmatmul.f32.gmra.mxu3 %v455_v49  ;;  %v426_v48 = vld [vmem:[%s4990_s4 + $0x2e8] sm:$0xff] }
 0x12a   : > { %v458_v49 = vld [vmem:[%s4990_s4 + $0x3e8] sm:$0xff] }
 0x12b   : > { %571 = vmatmul.f32.gmra.mxu0 %v359_v56  ;;  %667 = vmatmul.f32.gmra.mxu1 %v391_v57 }
 0x12c   : > { %v5222_v60 = vpop.f32.mrf.mxu2  ;;  %v5224_v61 = vpop.f32.mrf.mxu3 }
 0x12d   : > { %8305 = vst [vmem:[#allocation35_spill] sm:$0xff] %v5222_v60 }
 0x12e   : > { %8306 = vst [vmem:[#allocation36_spill] sm:$0xff] %v5224_v61 }
 0x130   : > { %v5228_v4 = vpop.f32.mrf.mxu0  ;;  %v5230_v5 = vpop.f32.mrf.mxu1 }
 0x131   : > { %766 = vmatmul.f32.gmra.mxu2 %v424_v0  ;;  %862 = vmatmul.f32.gmra.mxu3 %v456_v1  ;;  %v362_v0 = vld [vmem:[%s4990_s4 + $0xe8] sm:$0xff] }
 0x132   : > { %v394_v1 = vld [vmem:[%s4990_s4 + $0x1e8] sm:$0xff] }
 0x133   : > { %574 = vmatmul.f32.gmra.mxu0 %v360_v8  ;;  %670 = vmatmul.f32.gmra.mxu1 %v392_v9 }
 0x134   : > { %v5234_v12 = vpop.f32.mrf.mxu2  ;;  %v5236_v13 = vpop.f32.mrf.mxu3 }
 0x135   : > { %8307 = vst [vmem:[#allocation37_spill] sm:$0xff] %v5234_v12 }
 0x136   : > { %8308 = vst [vmem:[#allocation38_spill] sm:$0xff] %v5236_v13  ;;  %v395_v13 = vld [vmem:[%s4990_s4 + $0x1f0] sm:$0xff] }
 0x138   : > { %v5240_v24 = vpop.f32.mrf.mxu0  ;;  %v5242_v25 = vpop.f32.mrf.mxu1 }
 0x139   : > { %8309 = vst [vmem:[#allocation39_spill] sm:$0xff] %v5242_v25  ;;  %769 = vmatmul.f32.gmra.mxu2 %v425_v16  ;;  %865 = vmatmul.f32.gmra.mxu3 %v457_v17  ;;  %v427_v16 = vld [vmem:[%s4990_s4 + $0x2f0] sm:$0xff] }
 0x13a   : > { %v459_v17 = vld [vmem:[%s4990_s4 + $0x3f0] sm:$0xff] }
 0x13b   : > { %577 = vmatmul.f32.gmra.mxu0 %v361_v32  ;;  %673 = vmatmul.f32.gmra.mxu1 %v393_v33 }
 0x13c   : > { %v5246_v40 = vpop.f32.mrf.mxu2  ;;  %v5248_v41 = vpop.f32.mrf.mxu3 }
 0x13d   : > { %8310 = vst [vmem:[#allocation40_spill] sm:$0xff] %v5246_v40 }
 0x13e   : > { %8311 = vst [vmem:[#allocation41_spill] sm:$0xff] %v5248_v41  ;;  %v363_v41 = vld [vmem:[%s4990_s4 + $0xf0] sm:$0xff] }
 0x140   : > { %v5252_v56 = vpop.f32.mrf.mxu0  ;;  %v5254_v57 = vpop.f32.mrf.mxu1 }
 0x141   : > { %8312 = vst [vmem:[#allocation42_spill] sm:$0xff] %v5254_v57  ;;  %772 = vmatmul.f32.gmra.mxu2 %v426_v48  ;;  %868 = vmatmul.f32.gmra.mxu3 %v458_v49 }
 0x143   : > { %580 = vmatmul.f32.gmra.mxu0 %v362_v0  ;;  %676 = vmatmul.f32.gmra.mxu1 %v394_v1  ;;  %v428_v0 = vld [vmem:[%s4990_s4 + $0x2f8] sm:$0xff] }
 0x144   : > { %v5258_v8 = vpop.f32.mrf.mxu2  ;;  %v5260_v9 = vpop.f32.mrf.mxu3  ;;  %v460_v1 = vld [vmem:[%s4990_s4 + $0x3f8] sm:$0xff] }
 0x145   : > { %8313 = vst [vmem:[#allocation43_spill] sm:$0xff] %v5258_v8 }
 0x146   : > { %8314 = vst [vmem:[#allocation44_spill] sm:$0xff] %v5260_v9 }
 0x148   : > { %v5264_v32 = vpop.f32.mrf.mxu0  ;;  %v5266_v33 = vpop.f32.mrf.mxu1 }
 0x149   : > { %8315 = vst [vmem:[#allocation45_spill] sm:$0xff] %v5266_v33  ;;  %775 = vmatmul.f32.gmra.mxu2 %v427_v16  ;;  %871 = vmatmul.f32.gmra.mxu3 %v459_v17 }
 0x14b   : > { %583 = vmatmul.f32.gmra.mxu0 %v363_v41  ;;  %679 = vmatmul.f32.gmra.mxu1 %v395_v13 }
 0x14c   : > { %v5270_v48 = vpop.f32.mrf.mxu2  ;;  %v5272_v49 = vpop.f32.mrf.mxu3 }
 0x14d   : > { %8316 = vst [vmem:[#allocation46_spill] sm:$0xff] %v5270_v48 }
 0x14e   : > { %8317 = vst [vmem:[#allocation47_spill] sm:$0xff] %v5272_v49 }
 0x150   : > { %v5276_v9 = vpop.f32.mrf.mxu0  ;;  %v5278_v61 = vpop.f32.mrf.mxu1 }
 0x151   : > { %8318 = vst [vmem:[#allocation48_spill] sm:$0xff] %v5278_v61  ;;  %778 = vmatmul.f32.gmra.mxu2 %v428_v0  ;;  %874 = vmatmul.f32.gmra.mxu3 %v460_v1 }
 0x153   : > { %586 = vmatmul.f32.gmra.mxu0 %v364_v45  ;;  %682 = vmatmul.f32.gmra.mxu1 %v396_v29 }
 0x154   : > { %v5282_v16 = vpop.f32.mrf.mxu2  ;;  %v5284_v41 = vpop.f32.mrf.mxu3 }
 0x155   : > { %8319 = vst [vmem:[#allocation49_spill] sm:$0xff] %v5282_v16 }
 0x156   : > { %8320 = vst [vmem:[#allocation50_spill] sm:$0xff] %v5284_v41 }
 0x158   : > { %v5286_v13 = vpop.f32.mrf.mxu0  ;;  %v5288_v17 = vpop.f32.mrf.mxu1 }
 0x159   : > { %8321 = vst [vmem:[#allocation51_spill] sm:$0xff] %v5288_v17 }
 0x15c   : > { %v5290_v49 = vpop.f32.mrf.mxu2  ;;  %v5292_v15 = vpop.f32.mrf.mxu3 }
 0x15d   : > { %8322 = vst [vmem:[#allocation52_spill] sm:$0xff] %v5290_v49 }
 0x15e   : > { %8323 = vst [vmem:[#allocation53_spill] sm:$0xff] %v5292_v15 }
 0x160   : > { %v5294_v7 = vpop.f32.mrf.mxu0  ;;  %v5296_v63 = vpop.f32.mrf.mxu1 }
 0x161   : > { %8324 = vst [vmem:[#allocation54_spill] sm:$0xff] %v5296_v63 }
 0x164   : > { %v5298_v0 = vpop.f32.mrf.mxu2  ;;  %v5300_v45 = vpop.f32.mrf.mxu3 }
 0x165   : > { %8325 = vst [vmem:[#allocation55_spill] sm:$0xff] %v5298_v0 }
 0x166   : > { %8326 = vst [vmem:[#allocation56_spill] sm:$0xff] %v5300_v45 }
 0x168   : > { %v5302_v29 = vpop.f32.mrf.mxu0  ;;  %v5304_v1 = vpop.f32.mrf.mxu1 }
 0x16c   : > { %v5306_v41 = vpop.f32.mrf.mxu2  ;;  %v5308_v55 = vpop.f32.mrf.mxu3 }
 0x16d   : > { %8327 = vst [vmem:[#allocation57_spill] sm:$0xff] %v5306_v41 }
 0x16e   : > { %8328 = vst [vmem:[#allocation58_spill] sm:$0xff] %v5308_v55 }
 0x170   : > { %v5310_v47 = vpop.f32.mrf.mxu0  ;;  %v5312_v39 = vpop.f32.mrf.mxu1 }
 0x174   : > { %v5314_v15 = vpop.f32.mrf.mxu2  ;;  %v5316_v31 = vpop.f32.mrf.mxu3 }
 0x175   : > { %8329 = vst [vmem:[#allocation59_spill] sm:$0xff] %v5314_v15 }
 0x176   : > { %8330 = vst [vmem:[#allocation60_spill] sm:$0xff] %v5316_v31 }
 0x178   : > { %v5318_v23 = vpop.f32.mrf.mxu0  ;;  %v5320_v0 = vpop.f32.mrf.mxu1 }
 0x17c   : > { %v5322_v45 = vpop.f32.mrf.mxu2  ;;  %v5324_v49 = vpop.f32.mrf.mxu3 }
 0x17d   : > { %8331 = vst [vmem:[#allocation61_spill] sm:$0xff] %v5322_v45 }
 0x17e   : > { %8332 = vst [vmem:[#allocation62_spill] sm:$0xff] %v5324_v49 }
 0x180   : > { %v5326_v16 = vpop.f32.mrf.mxu0  ;;  %v5328_v41 = vpop.f32.mrf.mxu1 }
 0x181   : > { %8333 = vst [vmem:[#allocation63_spill] sm:$0xff] %v5328_v41 }
 0x184   : > { %v5330_v55 = vpop.f32.mrf.mxu2  ;;  %v5332_v48 = vpop.f32.mrf.mxu3 }
 0x185   : > { %8334 = vst [vmem:[#allocation64_spill] sm:$0xff] %v5330_v55 }
 0x186   : > { %8335 = vst [vmem:[#allocation65_spill] sm:$0xff] %v5332_v48 }
 0x188   : > { %v5334_v8 = vpop.f32.mrf.mxu0  ;;  %v5336_v15 = vpop.f32.mrf.mxu1 }
 0x189   : > { %8336 = vst [vmem:[#allocation66_spill] sm:$0xff] %v5336_v15 }
 0x18c   : > { %v5338_v31 = vpop.f32.mrf.mxu2  ;;  %v5340_v40 = vpop.f32.mrf.mxu3 }
 0x18d   : > { %8337 = vst [vmem:[#allocation67_spill] sm:$0xff] %v5338_v31 }
 0x18e   : > { %8338 = vst [vmem:[#allocation68_spill] sm:$0xff] %v5340_v40 }
 0x190   : > { %v5342_v12 = vpop.f32.mrf.mxu0  ;;  %v5344_v45 = vpop.f32.mrf.mxu1 }
 0x191   : > { %8339 = vst [vmem:[#allocation69_spill] sm:$0xff] %v5344_v45 }
 0x194   : > { %v5346_v49 = vpop.f32.mrf.mxu2  ;;  %v5348_v60 = vpop.f32.mrf.mxu3 }
 0x195   : > { %8340 = vst [vmem:[#allocation70_spill] sm:$0xff] %v5346_v49 }
 0x196   : > { %8341 = vst [vmem:[#allocation71_spill] sm:$0xff] %v5348_v60 }
 0x198   : > { %v5350_v44 = vpop.f32.mrf.mxu0  ;;  %v5352_v55 = vpop.f32.mrf.mxu1 }
 0x199   : > { %8342 = vst [vmem:[#allocation72_spill] sm:$0xff] %v5352_v55 }
 0x19c   : > { %v5354_v48 = vpop.f32.mrf.mxu2  ;;  %v5356_v28 = vpop.f32.mrf.mxu3 }
 0x19d   : > { %8343 = vst [vmem:[#allocation73_spill] sm:$0xff] %v5354_v48 }
 0x19e   : > { %8344 = vst [vmem:[#allocation74_spill] sm:$0xff] %v5356_v28 }
 0x1a0   : > { %v5358_v14 = vpop.f32.mrf.mxu0  ;;  %v5360_v31 = vpop.f32.mrf.mxu1 }
 0x1a1   : > { %8345 = vst [vmem:[#allocation75_spill] sm:$0xff] %v5360_v31 }
 0x1a4   : > { %v5362_v40 = vpop.f32.mrf.mxu2  ;;  %v5364_v6 = vpop.f32.mrf.mxu3 }
 0x1a5   : > { %8346 = vst [vmem:[#allocation76_spill] sm:$0xff] %v5362_v40 }
 0x1a6   : > { %8347 = vst [vmem:[#allocation77_spill] sm:$0xff] %v5364_v6 }
 0x1a8   : > { %v5366_v62 = vpop.f32.mrf.mxu0  ;;  %v5368_v49 = vpop.f32.mrf.mxu1 }
 0x1a9   : > { %8348 = vst [vmem:[#allocation78_spill] sm:$0xff] %v5368_v49 }
 0x1ac   : > { %v5370_v60 = vpop.f32.mrf.mxu2  ;;  %v5372_v54 = vpop.f32.mrf.mxu3 }
 0x1ad   : > { %8349 = vst [vmem:[#allocation79_spill] sm:$0xff] %v5370_v60 }
 0x1ae   : > { %8350 = vst [vmem:[#allocation80_spill] sm:$0xff] %v5372_v54 }
 0x1b0   : > { %v5374_v46 = vpop.f32.mrf.mxu0  ;;  %v5376_v48 = vpop.f32.mrf.mxu1 }
 0x1b1   : > { %8351 = vst [vmem:[#allocation81_spill] sm:$0xff] %v5376_v48 }
 0x1b4   : > { %v5378_v28 = vpop.f32.mrf.mxu2  ;;  %v5380_v38 = vpop.f32.mrf.mxu3 }
 0x1b5   : > { %8352 = vst [vmem:[#allocation82_spill] sm:$0xff] %v5378_v28 }
 0x1b6   : > { %8353 = vst [vmem:[#allocation83_spill] sm:$0xff] %v5380_v38 }
 0x1b8   : > { %v5382_v30 = vpop.f32.mrf.mxu0  ;;  %v5384_v40 = vpop.f32.mrf.mxu1 }
 0x1b9   : > { %8354 = vst [vmem:[#allocation84_spill] sm:$0xff] %v5384_v40 }
 0x1bc   : > { %v5386_v6 = vpop.f32.mrf.mxu2  ;;  %v5388_v22 = vpop.f32.mrf.mxu3 }
 0x1bd   : > { %8355 = vst [vmem:[#allocation85_spill] sm:$0xff] %v5386_v6 }
 0x1be   : > { %8356 = vst [vmem:[#allocation86_spill] sm:$0xff] %v5388_v22 }
 0x1c0   : > { %v5390_v49 = vpop.f32.mrf.mxu0  ;;  %v5392_v60 = vpop.f32.mrf.mxu1 }
 0x1c1   : > { %8357 = vst [vmem:[#allocation87_spill] sm:$0xff] %v5392_v60 }
 0x1c4   : > { %v5394_v54 = vpop.f32.mrf.mxu2  ;;  %v5396_v31 = vpop.f32.mrf.mxu3 }
 0x1c5   : > { %8358 = vst [vmem:[#allocation88_spill] sm:$0xff] %v5396_v31 }
 0x1c8   : > { %v5398_v48 = vpop.f32.mrf.mxu0  ;;  %v5400_v28 = vpop.f32.mrf.mxu1 }
 0x1c9   : > { %8359 = vst [vmem:[#allocation89_spill] sm:$0xff] %v5400_v28 }
 0x1cc   : > { %v5402_v38 = vpop.f32.mrf.mxu2  ;;  %v5404_v55 = vpop.f32.mrf.mxu3 }
 0x1cd   : > { %8360 = vst [vmem:[#allocation90_spill] sm:$0xff] %v5404_v55 }
 0x1d0   : > { %v5406_v40 = vpop.f32.mrf.mxu0  ;;  %v5408_v6 = vpop.f32.mrf.mxu1 }
 0x1d1   : > { %8361 = vst [vmem:[#allocation91_spill] sm:$0xff] %v5408_v6 }
 0x1d2   : > { %881 = sbr.rel (%p4226_p6) target bundleno = 599 (0x257), region = 52 }
 0x1d4   : > { %v5410_v22 = vpop.f32.mrf.mxu2  ;;  %v5412_v45 = vpop.f32.mrf.mxu3 }
 0x1d5   : > { %8362 = vst [vmem:[#allocation92_spill] sm:$0xff] %v5410_v22 }
 0x1d6   : > { %8363 = vst [vmem:[#allocation93_spill] sm:$0xff] %v5412_v45 }
 0x1d7   : > { %882 = vst [vmem:[#allocation2 + $0x2b0] sm:$0xff] %v5096_v18 }
 0x1d8   : > { %883 = vst [vmem:[#allocation2 + $0x3b0] sm:$0xff] %v5108_v26 }
 0x1d9   : > { %884 = vst [vmem:[#allocation2 + $0xd8] sm:$0xff] %v5120_v34 }
 0x1da   : > { %885 = vst [vmem:[#allocation2 + $0x18] sm:$0xff] %v5132_v42 }
 0x1db   : > { %886 = vst [vmem:[#allocation2 + $0x50] sm:$0xff] %v5144_v50 }
 0x1dc   : > { %887 = vst [vmem:[#allocation2 + $0x368] sm:$0xff] %v5156_v58 }
 0x1dd   : > { %888 = vst [vmem:[#allocation2 + $0x330] sm:$0xff] %v5168_v2 }
 0x1de   : > { %889 = vst [vmem:[#allocation2 + $0x48] sm:$0xff] %v5180_v10 }
 0x1df   : > { %890 = vst [vmem:[#allocation2 + $0x380] sm:$0xff] %v5192_v20 }
 0x1e0   : > { %891 = vst [vmem:[#allocation2 + $0x110] sm:$0xff] %v5204_v36 }
 0x1e1   : > { %892 = vst [vmem:[#allocation2 + $0x118] sm:$0xff] %v5216_v52 }
 0x1e2   : > { %893 = vst [vmem:[#allocation2 + $0x98] sm:$0xff] %v5228_v4 }
 0x1e3   : > { %894 = vst [vmem:[#allocation2 + $0x320] sm:$0xff] %v5240_v24 }
 0x1e4   : > { %895 = vst [vmem:[#allocation2 + $0x150] sm:$0xff] %v5252_v56 }
 0x1e5   : > { %896 = vst [vmem:[#allocation2 + $0x108] sm:$0xff] %v5264_v32 }
 0x1e6   : > { %897 = vst [vmem:[#allocation2 + $0x60] sm:$0xff] %v5276_v9 }
 0x1e7   : > { %898 = vst [vmem:[#allocation2 + $0x2e0] sm:$0xff] %v5286_v13 }
 0x1e8   : > { %899 = vst [vmem:[#allocation2 + $0x388] sm:$0xff] %v5294_v7 }
 0x1e9   : > { %900 = vst [vmem:[#allocation2 + $0x338] sm:$0xff] %v5302_v29 }
 0x1ea   : > { %901 = vst [vmem:[#allocation2 + $0x340] sm:$0xff] %v5310_v47 }
 0x1eb   : > { %902 = vst [vmem:[#allocation2 + $0x80] sm:$0xff] %v5318_v23 }
 0x1ec   : > { %903 = vst [vmem:[#allocation2 + $0x1a8] sm:$0xff] %v5326_v16 }
 0x1ed   : > { %904 = vst [vmem:[#allocation2 + $0x1b8] sm:$0xff] %v5334_v8 }
 0x1ee   : > { %905 = vst [vmem:[#allocation2 + $0x168] sm:$0xff] %v5342_v12 }
 0x1ef   : > { %906 = vst [vmem:[#allocation2 + $0x3e8] sm:$0xff] %v5350_v44 }
 0x1f0   : > { %907 = vst [vmem:[#allocation2 + $0x2f8] sm:$0xff] %v5358_v14 }
 0x1f1   : > { %908 = vst [vmem:[#allocation2 + $0x290] sm:$0xff] %v5366_v62 }
 0x1f2   : > { %909 = vst [vmem:[#allocation2 + $0x28] sm:$0xff] %v5374_v46 }
 0x1f3   : > { %910 = vst [vmem:[#allocation2 + $0x138] sm:$0xff] %v5382_v30 }
 0x1f4   : > { %911 = vst [vmem:[#allocation2 + $0xc0] sm:$0xff] %v5390_v49 }
 0x1f5   : > { %912 = vst [vmem:[#allocation2 + $0x1c0] sm:$0xff] %v5398_v48 }
 0x1f6   : > { %913 = vst [vmem:[#allocation2 + $0x280] sm:$0xff] %v5406_v40 }
 0x1f7   : > { %914 = vst [vmem:[#allocation2 + $0x100] sm:$0xff] %v5098_v19 }
 0x1f8   : > { %915 = vst [vmem:[#allocation2 + $0x3c0] sm:$0xff] %v5110_v27 }
 0x1f9   : > { %916 = vst [vmem:[#allocation2 + $0x158] sm:$0xff] %v5122_v35 }
 0x1fa   : > { %917 = vst [vmem:[#allocation2 + $0x3e0] sm:$0xff] %v5134_v43 }
 0x1fb   : > { %918 = vst [vmem:[#allocation2 + $0x218] sm:$0xff] %v5146_v51 }
 0x1fc   : > { %919 = vst [vmem:[#allocation2 + $0x3f8] sm:$0xff] %v5158_v59 }
 0x1fd   : > { %920 = vst [vmem:[#allocation2 + $0x8] sm:$0xff] %v5170_v3 }
 0x1fe   : > { %921 = vst [vmem:[#allocation2 + $0x128] sm:$0xff] %v5182_v11 }
 0x1ff   : > { %922 = vst [vmem:[#allocation2 + $0x2a0] sm:$0xff] %v5194_v21 }
 0x200   : > { %923 = vst [vmem:[#allocation2 + $0x3f0] sm:$0xff] %v5206_v37 }
 0x201   : > { %924 = vst [vmem:[#allocation2 + $0xa0] sm:$0xff] %v5218_v53 }
 0x202   : > { %925 = vst [vmem:[#allocation2 + $0x2c0] sm:$0xff] %v5230_v5 }
 0x203   : > { %926 = vst [vmem:[#allocation2 + $0xb0] sm:$0xff] %v5242_v25  ;;  %v8364_v25 = vld [vmem:[#allocation69_spill] sm:$0xff] }
 0x204   : > { %927 = vst [vmem:[#allocation2 + $0x1e0] sm:$0xff] %v5254_v57  ;;  %v8365_v57 = vld [vmem:[#allocation72_spill] sm:$0xff] }
 0x205   : > { %928 = vst [vmem:[#allocation2 + $0x1f0] sm:$0xff] %v5266_v33  ;;  %v8366_v33 = vld [vmem:[#allocation75_spill] sm:$0xff] }
 0x206   : > { %929 = vst [vmem:[#allocation2 + $0x10] sm:$0xff] %v5278_v61  ;;  %v8367_v61 = vld [vmem:[#allocation78_spill] sm:$0xff] }
 0x207   : > { %930 = vst [vmem:[#allocation2 + $0x230] sm:$0xff] %v5288_v17  ;;  %v8368_v17 = vld [vmem:[#allocation81_spill] sm:$0xff] }
 0x208   : > { %931 = vst [vmem:[#allocation2 + $0x240] sm:$0xff] %v5296_v63  ;;  %v8369_v63 = vld [vmem:[#allocation84_spill] sm:$0xff] }
 0x209   : > { %932 = vst [vmem:[#allocation2 + $0x90] sm:$0xff] %v5304_v1 }
 0x20a   : > { %933 = vst [vmem:[#allocation2 + $0x3a0] sm:$0xff] %v5312_v39 }
 0x20b   : > { %934 = vst [vmem:[#allocation2 + $0x208] sm:$0xff] %v5320_v0 }
 0x20c   : > { %935 = vst [vmem:[#allocation2 + $0xd0] sm:$0xff] %v5328_v41  ;;  %v8370_v41 = vld [vmem:[#allocation15_spill] sm:$0xff] }
 0x20d   : > { %936 = vst [vmem:[#allocation2 + $0x88] sm:$0xff] %v5336_v15  ;;  %v8371_v15 = vld [vmem:[#allocation17_spill] sm:$0xff] }
 0x20e   : > { %937 = vst [vmem:[#allocation2 + $0x2f0] sm:$0xff] %v8364_v25  ;;  %v8372_v25 = vld [vmem:[#allocation19_spill] sm:$0xff] }
 0x20f   : > { %938 = vst [vmem:[#allocation2 + $0x358] sm:$0xff] %v8365_v57  ;;  %v8373_v57 = vld [vmem:[#allocation21_spill] sm:$0xff] }
 0x210   : > { %939 = vst [vmem:[#allocation2 + $0x268] sm:$0xff] %v8366_v33  ;;  %v8374_v33 = vld [vmem:[#allocation23_spill] sm:$0xff] }
 0x211   : > { %940 = vst [vmem:[#allocation2 + $0x350] sm:$0xff] %v8367_v61  ;;  %v8375_v61 = vld [vmem:[#allocation25_spill] sm:$0xff] }
 0x212   : > { %941 = vst [vmem:[#allocation2 + $0x188] sm:$0xff] %v8368_v17  ;;  %v8376_v17 = vld [vmem:[#allocation27_spill] sm:$0xff] }
 0x213   : > { %942 = vst [vmem:[#allocation2 + $0x1d8] sm:$0xff] %v8369_v63  ;;  %v8377_v63 = vld [vmem:[#allocation29_spill] sm:$0xff] }
 0x214   : > { %943 = vst [vmem:[#allocation2 + $0x30] sm:$0xff] %v5392_v60  ;;  %v8378_v60 = vld [vmem:[#allocation31_spill] sm:$0xff] }
 0x215   : > { %944 = vst [vmem:[#allocation2 + $0x140] sm:$0xff] %v5400_v28  ;;  %v8379_v28 = vld [vmem:[#allocation33_spill] sm:$0xff] }
 0x216   : > { %945 = vst [vmem:[#allocation2 + $0x2a8] sm:$0xff] %v5408_v6  ;;  %v8380_v6 = vld [vmem:[#allocation35_spill] sm:$0xff] }
 0x217   : > { %946 = vst [vmem:[#allocation2 + $0x130] sm:$0xff] %v8370_v41  ;;  %v8381_v41 = vld [vmem:[#allocation37_spill] sm:$0xff] }
 0x218   : > { %947 = vst [vmem:[#allocation2 + $0x200] sm:$0xff] %v8371_v15  ;;  %v8382_v15 = vld [vmem:[#allocation40_spill] sm:$0xff] }
 0x219   : > { %948 = vst [vmem:[#allocation2 + $0x318] sm:$0xff] %v8372_v25  ;;  %v8383_v25 = vld [vmem:[#allocation43_spill] sm:$0xff] }
 0x21a   : > { %949 = vst [vmem:[#allocation2 + $0x220] sm:$0xff] %v8373_v57  ;;  %v8384_v57 = vld [vmem:[#allocation46_spill] sm:$0xff] }
 0x21b   : > { %950 = vst [vmem:[#allocation2 + $0x70] sm:$0xff] %v8374_v33  ;;  %v8385_v33 = vld [vmem:[#allocation49_spill] sm:$0xff] }
 0x21c   : > { %951 = vst [vmem:[#allocation2 + $0x300] sm:$0xff] %v8375_v61  ;;  %v8386_v61 = vld [vmem:[#allocation52_spill] sm:$0xff] }
 0x21d   : > { %952 = vst [vmem:[#allocation2 + $0xe0] sm:$0xff] %v8376_v17  ;;  %v8387_v17 = vld [vmem:[#allocation55_spill] sm:$0xff] }
 0x21e   : > { %953 = vst [vmem:[#allocation2 + $0x178] sm:$0xff] %v8377_v63  ;;  %v8388_v63 = vld [vmem:[#allocation57_spill] sm:$0xff] }
 0x21f   : > { %954 = vst [vmem:[#allocation2 + $0x328] sm:$0xff] %v8378_v60  ;;  %v8389_v60 = vld [vmem:[#allocation59_spill] sm:$0xff] }
 0x220   : > { %955 = vst [vmem:[#allocation2 + $0x260] sm:$0xff] %v8379_v28  ;;  %v8390_v28 = vld [vmem:[#allocation61_spill] sm:$0xff] }
 0x221   : > { %956 = vst [vmem:[#allocation2 + $0x3b8] sm:$0xff] %v8380_v6  ;;  %v8391_v6 = vld [vmem:[#allocation64_spill] sm:$0xff] }
 0x222   : > { %957 = vst [vmem:[#allocation2 + $0x2b8] sm:$0xff] %v8381_v41  ;;  %v8392_v41 = vld [vmem:[#allocation67_spill] sm:$0xff] }
 0x223   : > { %958 = vst [vmem:[#allocation2 + $0x248] sm:$0xff] %v8382_v15  ;;  %v8393_v15 = vld [vmem:[#allocation70_spill] sm:$0xff] }
 0x224   : > { %959 = vst [vmem:[#allocation2 + $0x40] sm:$0xff] %v8383_v25  ;;  %v8394_v25 = vld [vmem:[#allocation73_spill] sm:$0xff] }
 0x225   : > { %960 = vst [vmem:[#allocation2 + $0x20] sm:$0xff] %v8384_v57  ;;  %v8395_v57 = vld [vmem:[#allocation76_spill] sm:$0xff] }
 0x226   : > { %961 = vst [vmem:[#allocation2 + $0xe8] sm:$0xff] %v8385_v33  ;;  %v8396_v33 = vld [vmem:[#allocation79_spill] sm:$0xff] }
 0x227   : > { %962 = vst [vmem:[#allocation2 + $0x288] sm:$0xff] %v8386_v61  ;;  %v8397_v61 = vld [vmem:[#allocation82_spill] sm:$0xff] }
 0x228   : > { %963 = vst [vmem:[#allocation2 + $0x3a8] sm:$0xff] %v8387_v17  ;;  %v8398_v17 = vld [vmem:[#allocation85_spill] sm:$0xff] }
 0x229   : > { %964 = vst [vmem:[#allocation2 + $0x3c8] sm:$0xff] %v8388_v63  ;;  %v8399_v63 = vld [vmem:[#allocation16_spill] sm:$0xff] }
 0x22a   : > { %965 = vst [vmem:[#allocation2 + $0x160] sm:$0xff] %v8389_v60  ;;  %v8400_v60 = vld [vmem:[#allocation18_spill] sm:$0xff] }
 0x22b   : > { %966 = vst [vmem:[#allocation2 + $0x2c8] sm:$0xff] %v8390_v28  ;;  %v8401_v28 = vld [vmem:[#allocation20_spill] sm:$0xff] }
 0x22c   : > { %967 = vst [vmem:[#allocation2 + $0x210] sm:$0xff] %v8391_v6  ;;  %v8402_v6 = vld [vmem:[#allocation22_spill] sm:$0xff] }
 0x22d   : > { %968 = vst [vmem:[#allocation2 + $0x3d8] sm:$0xff] %v8392_v41  ;;  %v8403_v41 = vld [vmem:[#allocation24_spill] sm:$0xff] }
 0x22e   : > { %969 = vst [vmem:[#allocation2 + $0x1e8] sm:$0xff] %v8393_v15  ;;  %v8404_v15 = vld [vmem:[#allocation26_spill] sm:$0xff] }
 0x22f   : > { %970 = vst [vmem:[#allocation2 + $0x1b0] sm:$0xff] %v8394_v25  ;;  %v8405_v25 = vld [vmem:[#allocation28_spill] sm:$0xff] }
 0x230   : > { %971 = vst [vmem:[#allocation2 + $0x1c8] sm:$0xff] %v8395_v57  ;;  %v8406_v57 = vld [vmem:[#allocation30_spill] sm:$0xff] }
 0x231   : > { %972 = vst [vmem:[#allocation2 + $0x2d0] sm:$0xff] %v8396_v33  ;;  %v8407_v33 = vld [vmem:[#allocation32_spill] sm:$0xff] }
 0x232   : > { %973 = vst [vmem:[#allocation2 + $0x1d0] sm:$0xff] %v8397_v61  ;;  %v8408_v61 = vld [vmem:[#allocation34_spill] sm:$0xff] }
 0x233   : > { %974 = vst [vmem:[#allocation2 + $0x58] sm:$0xff] %v8398_v17  ;;  %v8409_v17 = vld [vmem:[#allocation36_spill] sm:$0xff] }
 0x234   : > { %975 = vst [vmem:[#allocation2 + $0x120] sm:$0xff] %v5394_v54 }
 0x235   : > { %976 = vst [vmem:[#allocation2 + $0x198] sm:$0xff] %v5402_v38 }
 0x236   : > { %977 = vst [vmem:[#allocation2 + $0x2e8] sm:$0xff] %v5410_v22 }
 0x237   : > { %978 = vst [vmem:[#allocation2 + $0x1f8] sm:$0xff] %v8399_v63  ;;  %v8410_v63 = vld [vmem:[#allocation38_spill] sm:$0xff] }
 0x238   : > { %979 = vst [vmem:[#allocation2 + $0x238] sm:$0xff] %v8400_v60  ;;  %v8411_v60 = vld [vmem:[#allocation41_spill] sm:$0xff] }
 0x239   : > { %980 = vst [vmem:[#allocation2 + $0x398] sm:$0xff] %v8401_v28  ;;  %v8412_v28 = vld [vmem:[#allocation44_spill] sm:$0xff] }
 0x23a   : > { %981 = vst [vmem:[#allocation2 + $0x390] sm:$0xff] %v8402_v6  ;;  %v8413_v6 = vld [vmem:[#allocation47_spill] sm:$0xff] }
 0x23b   : > { %982 = vst [vmem:[#allocation2 + $0x1a0] sm:$0xff] %v8403_v41  ;;  %v8414_v41 = vld [vmem:[#allocation50_spill] sm:$0xff] }
 0x23c   : > { %983 = vst [vmem:[#allocation2 + $0xa8] sm:$0xff] %v8404_v15  ;;  %v8415_v15 = vld [vmem:[#allocation53_spill] sm:$0xff] }
 0x23d   : > { %984 = vst [vmem:[#allocation2 + $0x258] sm:$0xff] %v8405_v25  ;;  %v8416_v25 = vld [vmem:[#allocation56_spill] sm:$0xff] }
 0x23e   : > { %985 = vst [vmem:[#allocation2 + $0x2d8] sm:$0xff] %v8406_v57  ;;  %v8417_v57 = vld [vmem:[#allocation58_spill] sm:$0xff] }
 0x23f   : > { %986 = vst [vmem:[#allocation2 + $0xf0] sm:$0xff] %v8407_v33  ;;  %v8418_v33 = vld [vmem:[#allocation60_spill] sm:$0xff] }
 0x240   : > { %987 = vst [vmem:[#allocation2 + $0x180] sm:$0xff] %v8408_v61  ;;  %v8419_v61 = vld [vmem:[#allocation62_spill] sm:$0xff] }
 0x241   : > { %988 = vst [vmem:[#allocation2 + $0x170] sm:$0xff] %v8409_v17  ;;  %v8420_v17 = vld [vmem:[#allocation65_spill] sm:$0xff] }
 0x242   : > { %989 = vst [vmem:[#allocation2 + $0x3d0] sm:$0xff] %v8410_v63  ;;  %v8421_v63 = vld [vmem:[#allocation68_spill] sm:$0xff] }
 0x243   : > { %990 = vst [vmem:[#allocation2 + $0x250] sm:$0xff] %v8411_v60  ;;  %v8422_v60 = vld [vmem:[#allocation71_spill] sm:$0xff] }
 0x244   : > { %991 = vst [vmem:[#allocation2 + $0x378] sm:$0xff] %v8412_v28  ;;  %v8423_v28 = vld [vmem:[#allocation74_spill] sm:$0xff] }
 0x245   : > { %992 = vst [vmem:[#allocation2 + $0xb8] sm:$0xff] %v8413_v6  ;;  %v8424_v6 = vld [vmem:[#allocation77_spill] sm:$0xff] }
 0x246   : > { %993 = vst [vmem:[#allocation2 + $0x38] sm:$0xff] %v8414_v41  ;;  %v8425_v41 = vld [vmem:[#allocation80_spill] sm:$0xff] }
 0x247   : > { %994 = vst [vmem:[#allocation2 + $0x78] sm:$0xff] %v8415_v15  ;;  %v8426_v15 = vld [vmem:[#allocation83_spill] sm:$0xff] }
 0x248   : > { %995 = vst [vmem:[#allocation2 + $0x308] sm:$0xff] %v8416_v25  ;;  %v8427_v25 = vld [vmem:[#allocation86_spill] sm:$0xff] }
 0x249   : > { %996 = vst [vmem:[#allocation2 + $0x370] sm:$0xff] %v8417_v57 }
 0x24a   : > { %997 = vst [vmem:[#allocation2 + $0xc8] sm:$0xff] %v8418_v33 }
 0x24b   : > { %998 = vst [vmem:[#allocation2 + $0x278] sm:$0xff] %v8419_v61 }
 0x24c   : > { %999 = vst [vmem:[#allocation2 + $0x360] sm:$0xff] %v8420_v17 }
 0x24d   : > { %1000 = vst [vmem:[#allocation2 + $0x228] sm:$0xff] %v8421_v63 }
 0x24e   : > { %1001 = vst [vmem:[#allocation2 + $0x348] sm:$0xff] %v8422_v60 }
 0x24f   : > { %1002 = vst [vmem:[#allocation2 + $0x148] sm:$0xff] %v8423_v28 }
 0x250   : > { %1003 = vst [vmem:[#allocation2 + $0xf8] sm:$0xff] %v8424_v6 }
 0x251   : > { %1004 = vst [vmem:[#allocation2 + $0x68] sm:$0xff] %v8425_v41 }
 0x252   : > { %1005 = vst [vmem:[#allocation2] sm:$0xff] %v8426_v15 }
 0x253   : > { %1006 = vst [vmem:[#allocation2 + $0x298] sm:$0xff] %v8427_v25 }
 0x254   : > { %1007 = vst [vmem:[#allocation2 + $0x270] sm:$0xff] %v5396_v31 }
 0x255   : > { %1008 = vst [vmem:[#allocation2 + $0x310] sm:$0xff] %v5404_v55 }
 0x256   : > { %1009 = vst [vmem:[#allocation2 + $0x190] sm:$0xff] %v5412_v45 }
 0x257 PF: > { %p4227_p7 = scmp.le.s32.totalorder %s4795_s3, 0 }
 0x259   : > { %1013 = sbr.rel (%p4227_p7) target bundleno = 737 (0x2e1), region = 56 }
 0x25e   : > { %v1014_v57 = vld [vmem:[#allocation2 + $0x2b0] sm:$0xff]  ;;  %v1016_v61 = vld [vmem:[#allocation2 + $0xd8] sm:$0xff]  ;;  %v1019_v41 = vld [vmem:[#allocation2 + $0x368] sm:$0xff] }
 0x25f   : > { %v1015_v33 = vld [vmem:[#allocation2 + $0x3b0] sm:$0xff]  ;;  %v1142_v17 = vadd.f32 %v1014_v57, %v5096_v18  ;;  %v1144_v60 = vadd.f32 %v1016_v61, %v5120_v34  ;;  %v1017_v28 = vld [vmem:[#allocation2 + $0x18] sm:$0xff]  ;;  %v1021_v55 = vld [vmem:[#allocation2 + $0x48] sm:$0xff]  ;;  %v1147_v31 = vadd.f32 %v1019_v41, %v5156_v58 }
 0x260   : > { %v1143_v63 = vadd.f32 %v1015_v33, %v5108_v26  ;;  %v1018_v6 = vld [vmem:[#allocation2 + $0x50] sm:$0xff]  ;;  %v1145_v15 = vadd.f32 %v1017_v28, %v5132_v42  ;;  %v1022_v22 = vld [vmem:[#allocation2 + $0x380] sm:$0xff]  ;;  %v1149_v34 = vadd.f32 %v1021_v55, %v5180_v10  ;;  %v1024_v57 = vld [vmem:[#allocation2 + $0x118] sm:$0xff] }
 0x261   : > { %v1020_v25 = vld [vmem:[#allocation2 + $0x330] sm:$0xff]  ;;  %1270 = vst [vmem:[#allocation2 + $0x2b0] sm:$0xff] %v1142_v17  ;;  %v1146_v45 = vadd.f32 %v1018_v6, %v5144_v50  ;;  %v1150_v42 = vadd.f32 %v1022_v22, %v5192_v20  ;;  %v1025_v33 = vld [vmem:[#allocation2 + $0x98] sm:$0xff]  ;;  %v1026_v61 = vld [vmem:[#allocation2 + $0x320] sm:$0xff]  ;;  %v1152_v58 = vadd.f32 %v1024_v57, %v5216_v52 }
 0x262   : > { %1271 = vst [vmem:[#allocation2 + $0x3b0] sm:$0xff] %v1143_v63  ;;  %v1148_v18 = vadd.f32 %v1020_v25, %v5168_v2  ;;  %v1023_v26 = vld [vmem:[#allocation2 + $0x110] sm:$0xff]  ;;  %v1153_v2 = vadd.f32 %v1025_v33, %v5228_v4  ;;  %v1028_v63 = vld [vmem:[#allocation2 + $0x108] sm:$0xff]  ;;  %v1154_v55 = vadd.f32 %v1026_v61, %v5240_v24  ;;  %v1029_v10 = vld [vmem:[#allocation2 + $0x60] sm:$0xff] }
 0x263   : > { %1272 = vst [vmem:[#allocation2 + $0xd8] sm:$0xff] %v1144_v60  ;;  %v1151_v50 = vadd.f32 %v1023_v26, %v5204_v36  ;;  %v1027_v17 = vld [vmem:[#allocation2 + $0x150] sm:$0xff]  ;;  %v1030_v20 = vld [vmem:[#allocation2 + $0x2e0] sm:$0xff]  ;;  %v1031_v36 = vld [vmem:[#allocation2 + $0x388] sm:$0xff]  ;;  %v1157_v52 = vadd.f32 %v1029_v10, %v5276_v9 }
 0x264   : > { %1273 = vst [vmem:[#allocation2 + $0x18] sm:$0xff] %v1145_v15  ;;  %v1155_v22 = vadd.f32 %v1027_v17, %v5252_v56  ;;  %v1158_v4 = vadd.f32 %v1030_v20, %v5286_v13  ;;  %v1033_v60 = vld [vmem:[#allocation2 + $0x340] sm:$0xff]  ;;  %v1159_v24 = vadd.f32 %v1031_v36, %v5294_v7  ;;  %v1035_v6 = vld [vmem:[#allocation2 + $0x1a8] sm:$0xff]  ;;  %v1036_v41 = vld [vmem:[#allocation2 + $0x1b8] sm:$0xff] }
 0x265   : > { %1274 = vst [vmem:[#allocation2 + $0x50] sm:$0xff] %v1146_v45  ;;  %v1032_v45 = vld [vmem:[#allocation2 + $0x338] sm:$0xff]  ;;  %v1034_v28 = vld [vmem:[#allocation2 + $0x80] sm:$0xff]  ;;  %v1037_v15 = vld [vmem:[#allocation2 + $0x168] sm:$0xff]  ;;  %v1163_v13 = vadd.f32 %v1035_v6, %v5326_v16  ;;  %v1164_v7 = vadd.f32 %v1036_v41, %v5334_v8 }
 0x266   : > { %1275 = vst [vmem:[#allocation2 + $0x368] sm:$0xff] %v1147_v31  ;;  %v1156_v31 = vadd.f32 %v1028_v63, %v5264_v32  ;;  %v1160_v56 = vadd.f32 %v1032_v45, %v5302_v29  ;;  %v1161_v32 = vadd.f32 %v1033_v60, %v5310_v47  ;;  %v1162_v9 = vadd.f32 %v1034_v28, %v5318_v23  ;;  %v1038_v25 = vld [vmem:[#allocation2 + $0x3e8] sm:$0xff]  ;;  %v1040_v26 = vld [vmem:[#allocation2 + $0x290] sm:$0xff]  ;;  %v1042_v57 = vld [vmem:[#allocation2 + $0x138] sm:$0xff] }
 0x267   : > { %1276 = vst [vmem:[#allocation2 + $0x330] sm:$0xff] %v1148_v18  ;;  %v1039_v18 = vld [vmem:[#allocation2 + $0x2f8] sm:$0xff]  ;;  %v1165_v29 = vadd.f32 %v1037_v15, %v5342_v12  ;;  %v1166_v47 = vadd.f32 %v1038_v25, %v5350_v44  ;;  %v1168_v16 = vadd.f32 %v1040_v26, %v5366_v62  ;;  %v1044_v33 = vld [vmem:[#allocation2 + $0x1c0] sm:$0xff]  ;;  %v1170_v12 = vadd.f32 %v1042_v57, %v5382_v30  ;;  %v1052_v10 = vld [vmem:[#allocation2 + $0x8] sm:$0xff] }
 0x268   : > { %1277 = vst [vmem:[#allocation2 + $0x48] sm:$0xff] %v1149_v34  ;;  %v1041_v34 = vld [vmem:[#allocation2 + $0x28] sm:$0xff]  ;;  %v1167_v23 = vadd.f32 %v1039_v18, %v5358_v14  ;;  %v1046_v61 = vld [vmem:[#allocation2 + $0x100] sm:$0xff]  ;;  %v1172_v14 = vadd.f32 %v1044_v33, %v5398_v48  ;;  %v1048_v17 = vld [vmem:[#allocation2 + $0x158] sm:$0xff] }
 0x269   : > { %1278 = vst [vmem:[#allocation2 + $0x380] sm:$0xff] %v1150_v42  ;;  %v1043_v42 = vld [vmem:[#allocation2 + $0xc0] sm:$0xff]  ;;  %v1169_v8 = vadd.f32 %v1041_v34, %v5374_v46  ;;  %v1174_v46 = vadd.f32 %v1046_v61, %v5098_v19  ;;  %v1050_v63 = vld [vmem:[#allocation2 + $0x218] sm:$0xff]  ;;  %v1058_v45 = vld [vmem:[#allocation2 + $0xb0] sm:$0xff] }
 0x26a   : > { %1279 = vst [vmem:[#allocation2 + $0x110] sm:$0xff] %v1151_v50  ;;  %v1045_v50 = vld [vmem:[#allocation2 + $0x280] sm:$0xff]  ;;  %v1171_v44 = vadd.f32 %v1043_v42, %v5390_v49  ;;  %v1176_v49 = vadd.f32 %v1048_v17, %v5122_v35  ;;  %v1060_v60 = vld [vmem:[#allocation2 + $0x1f0] sm:$0xff]  ;;  %v1070_v33 = vld [vmem:[#allocation2 + $0x358] sm:$0xff] }
 0x26b   : > { %1280 = vst [vmem:[#allocation2 + $0x118] sm:$0xff] %v1152_v58  ;;  %v1047_v58 = vld [vmem:[#allocation2 + $0x3c0] sm:$0xff]  ;;  %v1173_v62 = vadd.f32 %v1045_v50, %v5406_v40  ;;  %v1178_v40 = vadd.f32 %v1050_v63, %v5146_v51  ;;  %v1061_v28 = vld [vmem:[#allocation2 + $0x10] sm:$0xff] }
 0x26c   : > { %1281 = vst [vmem:[#allocation2 + $0x98] sm:$0xff] %v1153_v2  ;;  %v1049_v2 = vld [vmem:[#allocation2 + $0x3e0] sm:$0xff]  ;;  %v1175_v30 = vadd.f32 %v1047_v58, %v5110_v27  ;;  %v1180_v27 = vadd.f32 %v1052_v10, %v5170_v3  ;;  %v1062_v6 = vld [vmem:[#allocation2 + $0x230] sm:$0xff]  ;;  %v8437_v58 = vld [vmem:[#allocation72_spill] sm:$0xff] }
 0x26d   : > { %1282 = vst [vmem:[#allocation2 + $0x320] sm:$0xff] %v1154_v55  ;;  %v1051_v55 = vld [vmem:[#allocation2 + $0x3f8] sm:$0xff]  ;;  %v1177_v48 = vadd.f32 %v1049_v2, %v5134_v43  ;;  %v1054_v20 = vld [vmem:[#allocation2 + $0x2a0] sm:$0xff]  ;;  %v1064_v15 = vld [vmem:[#allocation2 + $0x90] sm:$0xff] }
 0x26e   : > { %1283 = vst [vmem:[#allocation2 + $0x150] sm:$0xff] %v1155_v22  ;;  %v1053_v22 = vld [vmem:[#allocation2 + $0x128] sm:$0xff]  ;;  %v1179_v19 = vadd.f32 %v1051_v55, %v5158_v59  ;;  %v1056_v36 = vld [vmem:[#allocation2 + $0xa0] sm:$0xff]  ;;  %v1182_v43 = vadd.f32 %v1054_v20, %v5194_v21  ;;  %v1192_v26 = vadd.f32 %v1064_v15, %v5304_v1  ;;  %v8436_v61 = vld [vmem:[#allocation69_spill] sm:$0xff] }
 0x26f   : > { %1284 = vst [vmem:[#allocation2 + $0x108] sm:$0xff] %v1156_v31  ;;  %v1055_v31 = vld [vmem:[#allocation2 + $0x3f0] sm:$0xff]  ;;  %v1181_v35 = vadd.f32 %v1053_v22, %v5182_v11  ;;  %v1184_v59 = vadd.f32 %v1056_v36, %v5218_v53  ;;  %v1063_v41 = vld [vmem:[#allocation2 + $0x240] sm:$0xff]  ;;  %v8439_v2 = vld [vmem:[#allocation78_spill] sm:$0xff] }
 0x270   : > { %1285 = vst [vmem:[#allocation2 + $0x60] sm:$0xff] %v1157_v52  ;;  %v1057_v52 = vld [vmem:[#allocation2 + $0x2c0] sm:$0xff]  ;;  %v1183_v51 = vadd.f32 %v1055_v31, %v5206_v37  ;;  %v1075_v63 = vld [vmem:[#allocation2 + $0x30] sm:$0xff]  ;;  %v8441_v10 = vld [vmem:[#allocation84_spill] sm:$0xff] }
 0x271   : > { %1286 = vst [vmem:[#allocation2 + $0x2e0] sm:$0xff] %v1158_v4  ;;  %v1059_v4 = vld [vmem:[#allocation2 + $0x1e0] sm:$0xff]  ;;  %v1185_v3 = vadd.f32 %v1057_v52, %v5230_v5  ;;  %v1077_v22 = vld [vmem:[#allocation2 + $0x2a8] sm:$0xff]  ;;  %v8443_v31 = vld [vmem:[#allocation89_spill] sm:$0xff] }
 0x272   : > { %1287 = vst [vmem:[#allocation2 + $0x388] sm:$0xff] %v1159_v24  ;;  %v8428_v24 = vld [vmem:[#allocation39_spill] sm:$0xff] }
 0x273   : > { %1288 = vst [vmem:[#allocation2 + $0x338] sm:$0xff] %v1160_v56  ;;  %v1186_v11 = vadd.f32 %v1058_v45, %v8428_v24  ;;  %v8429_v56 = vld [vmem:[#allocation42_spill] sm:$0xff]  ;;  %v1065_v25 = vld [vmem:[#allocation2 + $0x3a0] sm:$0xff]  ;;  %v1082_v24 = vld [vmem:[#allocation2 + $0x70] sm:$0xff] }
 0x274   : > { %1289 = vst [vmem:[#allocation2 + $0x340] sm:$0xff] %v1161_v32  ;;  %v1187_v21 = vadd.f32 %v1059_v4, %v8429_v56  ;;  %v8430_v32 = vld [vmem:[#allocation45_spill] sm:$0xff]  ;;  %v1193_v34 = vadd.f32 %v1065_v25, %v5312_v39  ;;  %v8434_v42 = vld [vmem:[#allocation63_spill] sm:$0xff]  ;;  %v1198_v39 = vadd.f32 %v1070_v33, %v8437_v58  ;;  %v1093_v58 = vld [vmem:[#allocation2 + $0xe8] sm:$0xff] }
 0x275   : > { %1290 = vst [vmem:[#allocation2 + $0x80] sm:$0xff] %v1162_v9  ;;  %v1188_v37 = vadd.f32 %v1060_v60, %v8430_v32  ;;  %v8431_v9 = vld [vmem:[#allocation48_spill] sm:$0xff]  ;;  %v8438_v17 = vld [vmem:[#allocation75_spill] sm:$0xff] }
 0x276   : > { %1291 = vst [vmem:[#allocation2 + $0x1a8] sm:$0xff] %v1163_v13  ;;  %v1189_v53 = vadd.f32 %v1061_v28, %v8431_v9  ;;  %v8432_v13 = vld [vmem:[#allocation51_spill] sm:$0xff]  ;;  %v1085_v9 = vld [vmem:[#allocation2 + $0x178] sm:$0xff] }
 0x277   : > { %1292 = vst [vmem:[#allocation2 + $0x1b8] sm:$0xff] %v1164_v7  ;;  %v1190_v5 = vadd.f32 %v1062_v6, %v8432_v13  ;;  %v8433_v7 = vld [vmem:[#allocation54_spill] sm:$0xff]  ;;  %v1079_v36 = vld [vmem:[#allocation2 + $0x200] sm:$0xff]  ;;  %v1086_v13 = vld [vmem:[#allocation2 + $0x328] sm:$0xff] }
 0x278   : > { %1293 = vst [vmem:[#allocation2 + $0x168] sm:$0xff] %v1165_v29  ;;  %v1191_v18 = vadd.f32 %v1063_v41, %v8433_v7  ;;  %v1066_v29 = vld [vmem:[#allocation2 + $0x208] sm:$0xff]  ;;  %v8445_v45 = vld [vmem:[#allocation15_spill] sm:$0xff] }
 0x279   : > { %1294 = vst [vmem:[#allocation2 + $0x3e8] sm:$0xff] %v1166_v47  ;;  %v1067_v47 = vld [vmem:[#allocation2 + $0xd0] sm:$0xff]  ;;  %v1194_v57 = vadd.f32 %v1066_v29, %v5320_v0  ;;  %v1081_v4 = vld [vmem:[#allocation2 + $0x220] sm:$0xff] }
 0x27a   : > { %1295 = vst [vmem:[#allocation2 + $0x2f8] sm:$0xff] %v1167_v23  ;;  %v1068_v23 = vld [vmem:[#allocation2 + $0x88] sm:$0xff]  ;;  %v1083_v56 = vld [vmem:[#allocation2 + $0x300] sm:$0xff] }
 0x27b   : > { %1296 = vst [vmem:[#allocation2 + $0x290] sm:$0xff] %v1168_v16  ;;  %v1069_v16 = vld [vmem:[#allocation2 + $0x2f0] sm:$0xff]  ;;  %v1084_v32 = vld [vmem:[#allocation2 + $0xe0] sm:$0xff] }
 0x27c   : > { %1297 = vst [vmem:[#allocation2 + $0x28] sm:$0xff] %v1169_v8  ;;  %v1195_v8 = vadd.f32 %v1067_v47, %v8434_v42  ;;  %v1197_v1 = vadd.f32 %v1069_v16, %v8436_v61  ;;  %v1087_v7 = vld [vmem:[#allocation2 + $0x260] sm:$0xff]  ;;  %v1090_v42 = vld [vmem:[#allocation2 + $0x248] sm:$0xff] }
 0x27d   : > { %1298 = vst [vmem:[#allocation2 + $0x138] sm:$0xff] %v1170_v12  ;;  %v8435_v12 = vld [vmem:[#allocation66_spill] sm:$0xff]  ;;  %v8453_v47 = vld [vmem:[#allocation31_spill] sm:$0xff] }
 0x27e   : > { %1299 = vst [vmem:[#allocation2 + $0xc0] sm:$0xff] %v1171_v44  ;;  %v1196_v50 = vadd.f32 %v1068_v23, %v8435_v12  ;;  %v1071_v44 = vld [vmem:[#allocation2 + $0x268] sm:$0xff]  ;;  %v1089_v23 = vld [vmem:[#allocation2 + $0x2b8] sm:$0xff]  ;;  %v1091_v12 = vld [vmem:[#allocation2 + $0x40] sm:$0xff] }
 0x27f   : > { %1300 = vst [vmem:[#allocation2 + $0x1c0] sm:$0xff] %v1172_v14  ;;  %v1072_v14 = vld [vmem:[#allocation2 + $0x350] sm:$0xff]  ;;  %v1199_v0 = vadd.f32 %v1071_v44, %v8438_v17  ;;  %v1092_v61 = vld [vmem:[#allocation2 + $0x20] sm:$0xff]  ;;  %v1094_v17 = vld [vmem:[#allocation2 + $0x288] sm:$0xff] }
 0x280   : > { %1301 = vst [vmem:[#allocation2 + $0x280] sm:$0xff] %v1173_v62  ;;  %v1073_v62 = vld [vmem:[#allocation2 + $0x188] sm:$0xff] }
 0x281   : > { %1302 = vst [vmem:[#allocation2 + $0x100] sm:$0xff] %v1174_v46  ;;  %v1074_v46 = vld [vmem:[#allocation2 + $0x1d8] sm:$0xff] }
 0x282   : > { %1303 = vst [vmem:[#allocation2 + $0x3c0] sm:$0xff] %v1175_v30  ;;  %v1200_v30 = vadd.f32 %v1072_v14, %v8439_v2  ;;  %v1095_v2 = vld [vmem:[#allocation2 + $0x3a8] sm:$0xff] }
 0x283   : > { %1304 = vst [vmem:[#allocation2 + $0x158] sm:$0xff] %v1176_v49  ;;  %v8440_v49 = vld [vmem:[#allocation81_spill] sm:$0xff] }
 0x284   : > { %1305 = vst [vmem:[#allocation2 + $0x3e0] sm:$0xff] %v1177_v48  ;;  %v1201_v55 = vadd.f32 %v1073_v62, %v8440_v49  ;;  %v1076_v48 = vld [vmem:[#allocation2 + $0x140] sm:$0xff]  ;;  %v1096_v49 = vld [vmem:[#allocation2 + $0x3c8] sm:$0xff] }
 0x285   : > { %1306 = vst [vmem:[#allocation2 + $0x218] sm:$0xff] %v1178_v40  ;;  %v1202_v40 = vadd.f32 %v1074_v46, %v8441_v10  ;;  %v1097_v10 = vld [vmem:[#allocation2 + $0x160] sm:$0xff] }
 0x286   : > { %1307 = vst [vmem:[#allocation2 + $0x3f8] sm:$0xff] %v1179_v19  ;;  %v8442_v19 = vld [vmem:[#allocation87_spill] sm:$0xff] }
 0x287   : > { %1308 = vst [vmem:[#allocation2 + $0x8] sm:$0xff] %v1180_v27  ;;  %v1203_v20 = vadd.f32 %v1075_v63, %v8442_v19  ;;  %v1078_v27 = vld [vmem:[#allocation2 + $0x130] sm:$0xff]  ;;  %v1098_v19 = vld [vmem:[#allocation2 + $0x2c8] sm:$0xff] }
 0x288   : > { %1309 = vst [vmem:[#allocation2 + $0x128] sm:$0xff] %v1181_v35  ;;  %v1204_v35 = vadd.f32 %v1076_v48, %v8443_v31  ;;  %v1099_v31 = vld [vmem:[#allocation2 + $0x210] sm:$0xff] }
 0x289   : > { %1310 = vst [vmem:[#allocation2 + $0x2a0] sm:$0xff] %v1182_v43  ;;  %v8444_v43 = vld [vmem:[#allocation91_spill] sm:$0xff] }
 0x28a   : > { %1311 = vst [vmem:[#allocation2 + $0x3f0] sm:$0xff] %v1183_v51  ;;  %v1205_v52 = vadd.f32 %v1077_v22, %v8444_v43  ;;  %v1080_v51 = vld [vmem:[#allocation2 + $0x318] sm:$0xff] }
 0x28b   : > { %1312 = vst [vmem:[#allocation2 + $0xa0] sm:$0xff] %v1184_v59  ;;  %v1206_v59 = vadd.f32 %v1078_v27, %v8445_v45  ;;  %v1100_v43 = vld [vmem:[#allocation2 + $0x3d8] sm:$0xff]  ;;  %v1101_v45 = vld [vmem:[#allocation2 + $0x1e8] sm:$0xff] }
 0x28c   : > { %1313 = vst [vmem:[#allocation2 + $0x2c0] sm:$0xff] %v1185_v3  ;;  %v8446_v3 = vld [vmem:[#allocation17_spill] sm:$0xff] }
 0x28d   : > { %1314 = vst [vmem:[#allocation2 + $0xb0] sm:$0xff] %v1186_v11  ;;  %v1207_v60 = vadd.f32 %v1079_v36, %v8446_v3  ;;  %v8447_v11 = vld [vmem:[#allocation19_spill] sm:$0xff]  ;;  %v1102_v3 = vld [vmem:[#allocation2 + $0x1b0] sm:$0xff] }
 0x28e   : > { %1315 = vst [vmem:[#allocation2 + $0x1e0] sm:$0xff] %v1187_v21  ;;  %v1208_v28 = vadd.f32 %v1080_v51, %v8447_v11  ;;  %v8448_v21 = vld [vmem:[#allocation21_spill] sm:$0xff]  ;;  %v1103_v11 = vld [vmem:[#allocation2 + $0x1c8] sm:$0xff] }
 0x28f   : > { %1316 = vst [vmem:[#allocation2 + $0x1f0] sm:$0xff] %v1188_v37  ;;  %v1209_v6 = vadd.f32 %v1081_v4, %v8448_v21  ;;  %v8449_v37 = vld [vmem:[#allocation23_spill] sm:$0xff]  ;;  %v1104_v21 = vld [vmem:[#allocation2 + $0x2d0] sm:$0xff] }
 0x290   : > { %1317 = vst [vmem:[#allocation2 + $0x10] sm:$0xff] %v1189_v53  ;;  %v1210_v41 = vadd.f32 %v1082_v24, %v8449_v37  ;;  %v8450_v53 = vld [vmem:[#allocation25_spill] sm:$0xff] }
 0x291   : > { %1318 = vst [vmem:[#allocation2 + $0x230] sm:$0xff] %v1190_v5  ;;  %v1211_v15 = vadd.f32 %v1083_v56, %v8450_v53  ;;  %v8451_v5 = vld [vmem:[#allocation27_spill] sm:$0xff]  ;;  %v1105_v37 = vld [vmem:[#allocation2 + $0x1d0] sm:$0xff]  ;;  %v1106_v53 = vld [vmem:[#allocation2 + $0x58] sm:$0xff] }
 0x292   : > { %1319 = vst [vmem:[#allocation2 + $0x240] sm:$0xff] %v1191_v18  ;;  %v1212_v25 = vadd.f32 %v1084_v32, %v8451_v5  ;;  %v8452_v18 = vld [vmem:[#allocation29_spill] sm:$0xff]  ;;  %v1107_v5 = vld [vmem:[#allocation2 + $0x120] sm:$0xff] }
 0x293   : > { %1320 = vst [vmem:[#allocation2 + $0x90] sm:$0xff] %v1192_v26  ;;  %v1213_v29 = vadd.f32 %v1085_v9, %v8452_v18  ;;  %v1088_v26 = vld [vmem:[#allocation2 + $0x3b8] sm:$0xff] }
 0x294   : > { %1321 = vst [vmem:[#allocation2 + $0x3a0] sm:$0xff] %v1193_v34  ;;  %v1214_v34 = vadd.f32 %v1086_v13, %v8453_v47  ;;  %v1108_v18 = vld [vmem:[#allocation2 + $0x198] sm:$0xff]  ;;  %v1109_v47 = vld [vmem:[#allocation2 + $0x2e8] sm:$0xff] }
 0x295   : > { %1322 = vst [vmem:[#allocation2 + $0x208] sm:$0xff] %v1194_v57  ;;  %v8454_v57 = vld [vmem:[#allocation33_spill] sm:$0xff] }
 0x296   : > { %1323 = vst [vmem:[#allocation2 + $0xd0] sm:$0xff] %v1195_v8  ;;  %v1215_v16 = vadd.f32 %v1087_v7, %v8454_v57  ;;  %v8455_v8 = vld [vmem:[#allocation35_spill] sm:$0xff]  ;;  %v1236_v57 = vadd.f32 %v1108_v18, %v5402_v38  ;;  %v1130_v18 = vld [vmem:[#allocation2 + $0x278] sm:$0xff] }
 0x297   : > { %1324 = vst [vmem:[#allocation2 + $0x88] sm:$0xff] %v1196_v50  ;;  %v1216_v33 = vadd.f32 %v1088_v26, %v8455_v8  ;;  %v8456_v50 = vld [vmem:[#allocation37_spill] sm:$0xff] }
 0x298   : > { %1325 = vst [vmem:[#allocation2 + $0x2f0] sm:$0xff] %v1197_v1  ;;  %v1217_v44 = vadd.f32 %v1089_v23, %v8456_v50  ;;  %v8457_v1 = vld [vmem:[#allocation40_spill] sm:$0xff]  ;;  %v1110_v23 = vld [vmem:[#allocation2 + $0x1f8] sm:$0xff] }
 0x299   : > { %1326 = vst [vmem:[#allocation2 + $0x358] sm:$0xff] %v1198_v39  ;;  %v1218_v14 = vadd.f32 %v1090_v42, %v8457_v1  ;;  %v8458_v39 = vld [vmem:[#allocation43_spill] sm:$0xff]  ;;  %v8474_v42 = vld [vmem:[#allocation92_spill] sm:$0xff] }
 0x29a   : > { %1327 = vst [vmem:[#allocation2 + $0x268] sm:$0xff] %v1199_v0  ;;  %v1219_v62 = vadd.f32 %v1091_v12, %v8458_v39  ;;  %v8459_v0 = vld [vmem:[#allocation46_spill] sm:$0xff]  ;;  %v1237_v8 = vadd.f32 %v1109_v47, %v8474_v42  ;;  %v8475_v12 = vld [vmem:[#allocation16_spill] sm:$0xff]  ;;  %v1131_v47 = vld [vmem:[#allocation2 + $0x360] sm:$0xff] }
 0x29b   : > { %1328 = vst [vmem:[#allocation2 + $0x350] sm:$0xff] %v1200_v30  ;;  %v1220_v46 = vadd.f32 %v1092_v61, %v8459_v0  ;;  %v8460_v30 = vld [vmem:[#allocation49_spill] sm:$0xff]  ;;  %v1238_v50 = vadd.f32 %v1110_v23, %v8475_v12  ;;  %v8476_v61 = vld [vmem:[#allocation18_spill] sm:$0xff]  ;;  %v1115_v39 = vld [vmem:[#allocation2 + $0xa8] sm:$0xff] }
 0x29c   : > { %1329 = vst [vmem:[#allocation2 + $0x188] sm:$0xff] %v1201_v55  ;;  %v1221_v63 = vadd.f32 %v1093_v58, %v8460_v30  ;;  %v8461_v55 = vld [vmem:[#allocation52_spill] sm:$0xff]  ;;  %v8480_v30 = vld [vmem:[#allocation26_spill] sm:$0xff] }
 0x29d   : > { %1330 = vst [vmem:[#allocation2 + $0x1d8] sm:$0xff] %v1202_v40  ;;  %v1222_v48 = vadd.f32 %v1094_v17, %v8461_v55  ;;  %v8462_v40 = vld [vmem:[#allocation55_spill] sm:$0xff]  ;;  %v8477_v58 = vld [vmem:[#allocation20_spill] sm:$0xff]  ;;  %v1116_v17 = vld [vmem:[#allocation2 + $0x258] sm:$0xff] }
 0x29e   : > { %1331 = vst [vmem:[#allocation2 + $0x30] sm:$0xff] %v1203_v20  ;;  %v1223_v22 = vadd.f32 %v1095_v2, %v8462_v40  ;;  %v8463_v20 = vld [vmem:[#allocation57_spill] sm:$0xff]  ;;  %v8479_v0 = vld [vmem:[#allocation24_spill] sm:$0xff]  ;;  %v1117_v2 = vld [vmem:[#allocation2 + $0x2d8] sm:$0xff] }
 0x29f   : > { %1332 = vst [vmem:[#allocation2 + $0x140] sm:$0xff] %v1204_v35  ;;  %v1224_v27 = vadd.f32 %v1096_v49, %v8463_v20  ;;  %v8464_v35 = vld [vmem:[#allocation59_spill] sm:$0xff]  ;;  %v1118_v49 = vld [vmem:[#allocation2 + $0xf0] sm:$0xff]  ;;  %v8481_v55 = vld [vmem:[#allocation28_spill] sm:$0xff] }
 0x2a0   : > { %1333 = vst [vmem:[#allocation2 + $0x2a8] sm:$0xff] %v1205_v52  ;;  %v1225_v36 = vadd.f32 %v1097_v10, %v8464_v35  ;;  %v8465_v52 = vld [vmem:[#allocation61_spill] sm:$0xff]  ;;  %v1119_v10 = vld [vmem:[#allocation2 + $0x180] sm:$0xff]  ;;  %v8482_v40 = vld [vmem:[#allocation30_spill] sm:$0xff] }
 0x2a1   : > { %1334 = vst [vmem:[#allocation2 + $0x130] sm:$0xff] %v1206_v59  ;;  %v1226_v51 = vadd.f32 %v1098_v19, %v8465_v52  ;;  %v8466_v59 = vld [vmem:[#allocation64_spill] sm:$0xff]  ;;  %v1120_v19 = vld [vmem:[#allocation2 + $0x170] sm:$0xff]  ;;  %v8484_v35 = vld [vmem:[#allocation34_spill] sm:$0xff] }
 0x2a2   : > { %1335 = vst [vmem:[#allocation2 + $0x200] sm:$0xff] %v1207_v60  ;;  %v1227_v4 = vadd.f32 %v1099_v31, %v8466_v59  ;;  %v8467_v60 = vld [vmem:[#allocation67_spill] sm:$0xff]  ;;  %v8483_v20 = vld [vmem:[#allocation32_spill] sm:$0xff]  ;;  %v1121_v31 = vld [vmem:[#allocation2 + $0x3d0] sm:$0xff] }
 0x2a3   : > { %1336 = vst [vmem:[#allocation2 + $0x318] sm:$0xff] %v1208_v28  ;;  %v1228_v24 = vadd.f32 %v1100_v43, %v8467_v60  ;;  %v8468_v28 = vld [vmem:[#allocation70_spill] sm:$0xff]  ;;  %v1122_v43 = vld [vmem:[#allocation2 + $0x250] sm:$0xff]  ;;  %v8485_v52 = vld [vmem:[#allocation36_spill] sm:$0xff] }
 0x2a4   : > { %1337 = vst [vmem:[#allocation2 + $0x220] sm:$0xff] %v1209_v6  ;;  %v1229_v56 = vadd.f32 %v1101_v45, %v8468_v28  ;;  %v8469_v6 = vld [vmem:[#allocation73_spill] sm:$0xff]  ;;  %v1123_v45 = vld [vmem:[#allocation2 + $0x378] sm:$0xff]  ;;  %v8488_v28 = vld [vmem:[#allocation44_spill] sm:$0xff] }
 0x2a5   : > { %1338 = vst [vmem:[#allocation2 + $0x70] sm:$0xff] %v1210_v41  ;;  %v1230_v32 = vadd.f32 %v1102_v3, %v8469_v6  ;;  %v8470_v41 = vld [vmem:[#allocation76_spill] sm:$0xff]  ;;  %v8486_v59 = vld [vmem:[#allocation38_spill] sm:$0xff]  ;;  %v8487_v60 = vld [vmem:[#allocation41_spill] sm:$0xff] }
 0x2a6   : > { %1339 = vst [vmem:[#allocation2 + $0x300] sm:$0xff] %v1211_v15  ;;  %v1231_v9 = vadd.f32 %v1103_v11, %v8470_v41  ;;  %v8471_v15 = vld [vmem:[#allocation79_spill] sm:$0xff]  ;;  %v1124_v3 = vld [vmem:[#allocation2 + $0xb8] sm:$0xff] }
 0x2a7   : > { %1340 = vst [vmem:[#allocation2 + $0xe0] sm:$0xff] %v1212_v25  ;;  %v1232_v13 = vadd.f32 %v1104_v21, %v8471_v15  ;;  %v8472_v25 = vld [vmem:[#allocation82_spill] sm:$0xff]  ;;  %v8489_v6 = vld [vmem:[#allocation47_spill] sm:$0xff]  ;;  %v8491_v15 = vld [vmem:[#allocation53_spill] sm:$0xff] }
 0x2a8   : > { %1341 = vst [vmem:[#allocation2 + $0x178] sm:$0xff] %v1213_v29  ;;  %v1233_v7 = vadd.f32 %v1105_v37, %v8472_v25  ;;  %v8473_v29 = vld [vmem:[#allocation85_spill] sm:$0xff]  ;;  %v1125_v11 = vld [vmem:[#allocation2 + $0x38] sm:$0xff]  ;;  %v1127_v37 = vld [vmem:[#allocation2 + $0x308] sm:$0xff] }
 0x2a9   : > { %1342 = vst [vmem:[#allocation2 + $0x328] sm:$0xff] %v1214_v34  ;;  %v1234_v26 = vadd.f32 %v1106_v53, %v8473_v29  ;;  %v1235_v34 = vadd.f32 %v1107_v5, %v5394_v54  ;;  %v1126_v21 = vld [vmem:[#allocation2 + $0x78] sm:$0xff]  ;;  %v1128_v53 = vld [vmem:[#allocation2 + $0x370] sm:$0xff]  ;;  %v1129_v5 = vld [vmem:[#allocation2 + $0xc8] sm:$0xff] }
 0x2aa   : > { %1343 = vst [vmem:[#allocation2 + $0x260] sm:$0xff] %v1215_v16  ;;  %v1111_v16 = vld [vmem:[#allocation2 + $0x238] sm:$0xff]  ;;  %v8492_v25 = vld [vmem:[#allocation56_spill] sm:$0xff] }
 0x2ab   : > { %1344 = vst [vmem:[#allocation2 + $0x3b8] sm:$0xff] %v1216_v33  ;;  %v1112_v33 = vld [vmem:[#allocation2 + $0x398] sm:$0xff]  ;;  %v1239_v1 = vadd.f32 %v1111_v16, %v8476_v61 }
 0x2ac   : > { %1345 = vst [vmem:[#allocation2 + $0x2b8] sm:$0xff] %v1217_v44  ;;  %v1113_v44 = vld [vmem:[#allocation2 + $0x390] sm:$0xff]  ;;  %v1240_v54 = vadd.f32 %v1112_v33, %v8477_v58  ;;  %v8490_v41 = vld [vmem:[#allocation50_spill] sm:$0xff] }
 0x2ad   : > { %1346 = vst [vmem:[#allocation2 + $0x248] sm:$0xff] %v1218_v14  ;;  %v1114_v14 = vld [vmem:[#allocation2 + $0x1a0] sm:$0xff]  ;;  %v8493_v29 = vld [vmem:[#allocation58_spill] sm:$0xff]  ;;  %v8496_v33 = vld [vmem:[#allocation65_spill] sm:$0xff] }
 0x2ae   : > { %1347 = vst [vmem:[#allocation2 + $0x40] sm:$0xff] %v1219_v62  ;;  %v8478_v62 = vld [vmem:[#allocation22_spill] sm:$0xff]  ;;  %v1259_v12 = vadd.f32 %v1131_v47, %v8496_v33 }
 0x2af   : > { %1348 = vst [vmem:[#allocation2 + $0x20] sm:$0xff] %v1220_v46  ;;  %v1241_v38 = vadd.f32 %v1113_v44, %v8478_v62  ;;  %v1242_v46 = vadd.f32 %v1114_v14, %v8479_v0  ;;  %v8495_v16 = vld [vmem:[#allocation62_spill] sm:$0xff]  ;;  %v8497_v44 = vld [vmem:[#allocation68_spill] sm:$0xff]  ;;  %v8498_v14 = vld [vmem:[#allocation71_spill] sm:$0xff] }
 0x2b0   : > { %1349 = vst [vmem:[#allocation2 + $0xe8] sm:$0xff] %v1221_v63  ;;  %v1243_v63 = vadd.f32 %v1115_v39, %v8480_v30  ;;  %v1258_v42 = vadd.f32 %v1130_v18, %v8495_v16  ;;  %v8499_v39 = vld [vmem:[#allocation74_spill] sm:$0xff] }
 0x2b1   : > { %1350 = vst [vmem:[#allocation2 + $0x288] sm:$0xff] %v1222_v48  ;;  %v1244_v48 = vadd.f32 %v1116_v17, %v8481_v55  ;;  %v8500_v17 = vld [vmem:[#allocation77_spill] sm:$0xff] }
 0x2b2   : > { %1351 = vst [vmem:[#allocation2 + $0x3a8] sm:$0xff] %v1223_v22  ;;  %v1245_v22 = vadd.f32 %v1117_v2, %v8482_v40  ;;  %v8501_v2 = vld [vmem:[#allocation80_spill] sm:$0xff] }
 0x2b3   : > { %1352 = vst [vmem:[#allocation2 + $0x3c8] sm:$0xff] %v1224_v27  ;;  %v1246_v27 = vadd.f32 %v1118_v49, %v8483_v20  ;;  %v8502_v49 = vld [vmem:[#allocation83_spill] sm:$0xff] }
 0x2b4   : > { %1353 = vst [vmem:[#allocation2 + $0x160] sm:$0xff] %v1225_v36  ;;  %v1247_v36 = vadd.f32 %v1119_v10, %v8484_v35  ;;  %v8503_v10 = vld [vmem:[#allocation86_spill] sm:$0xff]  ;;  %v8506_v35 = vld [vmem:[#allocation93_spill] sm:$0xff] }
 0x2b5   : > { %1354 = vst [vmem:[#allocation2 + $0x2c8] sm:$0xff] %v1226_v51  ;;  %v1248_v51 = vadd.f32 %v1120_v19, %v8485_v52  ;;  %v8504_v19 = vld [vmem:[#allocation88_spill] sm:$0xff] }
 0x2b6   : > { %1355 = vst [vmem:[#allocation2 + $0x210] sm:$0xff] %v1227_v4  ;;  %v1249_v4 = vadd.f32 %v1121_v31, %v8486_v59 }
 0x2b7   : > { %1356 = vst [vmem:[#allocation2 + $0x3d8] sm:$0xff] %v1228_v24  ;;  %v1250_v24 = vadd.f32 %v1122_v43, %v8487_v60 }
 0x2b8   : > { %1357 = vst [vmem:[#allocation2 + $0x1e8] sm:$0xff] %v1229_v56  ;;  %v1251_v56 = vadd.f32 %v1123_v45, %v8488_v28 }
 0x2b9   : > { %1358 = vst [vmem:[#allocation2 + $0x1b0] sm:$0xff] %v1230_v32  ;;  %v1252_v32 = vadd.f32 %v1124_v3, %v8489_v6 }
 0x2ba   : > { %1359 = vst [vmem:[#allocation2 + $0x1c8] sm:$0xff] %v1231_v9  ;;  %v1253_v9 = vadd.f32 %v1125_v11, %v8490_v41 }
 0x2bb   : > { %1360 = vst [vmem:[#allocation2 + $0x2d0] sm:$0xff] %v1232_v13  ;;  %v1254_v13 = vadd.f32 %v1126_v21, %v8491_v15 }
 0x2bc   : > { %1361 = vst [vmem:[#allocation2 + $0x1d0] sm:$0xff] %v1233_v7  ;;  %v1255_v7 = vadd.f32 %v1127_v37, %v8492_v25 }
 0x2bd   : > { %1362 = vst [vmem:[#allocation2 + $0x58] sm:$0xff] %v1234_v26  ;;  %v1256_v26 = vadd.f32 %v1128_v53, %v8493_v29 }
 0x2be   : > { %1363 = vst [vmem:[#allocation2 + $0x120] sm:$0xff] %v1235_v34  ;;  %v8494_v34 = vld [vmem:[#allocation60_spill] sm:$0xff] }
 0x2bf   : > { %1364 = vst [vmem:[#allocation2 + $0x198] sm:$0xff] %v1236_v57  ;;  %v1257_v23 = vadd.f32 %v1129_v5, %v8494_v34  ;;  %v1132_v57 = vld [vmem:[#allocation2 + $0x228] sm:$0xff] }
 0x2c0   : > { %1365 = vst [vmem:[#allocation2 + $0x2e8] sm:$0xff] %v1237_v8  ;;  %v1133_v8 = vld [vmem:[#allocation2 + $0x348] sm:$0xff]  ;;  %v1260_v61 = vadd.f32 %v1132_v57, %v8497_v44 }
 0x2c1   : > { %1366 = vst [vmem:[#allocation2 + $0x1f8] sm:$0xff] %v1238_v50  ;;  %v1134_v50 = vld [vmem:[#allocation2 + $0x148] sm:$0xff]  ;;  %v1261_v58 = vadd.f32 %v1133_v8, %v8498_v14 }
 0x2c2   : > { %1367 = vst [vmem:[#allocation2 + $0x238] sm:$0xff] %v1239_v1  ;;  %v1135_v1 = vld [vmem:[#allocation2 + $0xf8] sm:$0xff]  ;;  %v1262_v62 = vadd.f32 %v1134_v50, %v8499_v39 }
 0x2c3   : > { %1368 = vst [vmem:[#allocation2 + $0x398] sm:$0xff] %v1240_v54  ;;  %v1136_v54 = vld [vmem:[#allocation2 + $0x68] sm:$0xff]  ;;  %v1263_v0 = vadd.f32 %v1135_v1, %v8500_v17 }
 0x2c4   : > { %1369 = vst [vmem:[#allocation2 + $0x390] sm:$0xff] %v1241_v38  ;;  %v1137_v38 = vld [vmem:[#allocation2] sm:$0xff]  ;;  %v1264_v30 = vadd.f32 %v1136_v54, %v8501_v2 }
 0x2c5   : > { %1370 = vst [vmem:[#allocation2 + $0x1a0] sm:$0xff] %v1242_v46  ;;  %v1138_v46 = vld [vmem:[#allocation2 + $0x298] sm:$0xff]  ;;  %v1265_v55 = vadd.f32 %v1137_v38, %v8502_v49 }
 0x2c6   : > { %1371 = vst [vmem:[#allocation2 + $0xa8] sm:$0xff] %v1243_v63  ;;  %v1139_v63 = vld [vmem:[#allocation2 + $0x270] sm:$0xff]  ;;  %v1266_v40 = vadd.f32 %v1138_v46, %v8503_v10 }
 0x2c7   : > { %1372 = vst [vmem:[#allocation2 + $0x258] sm:$0xff] %v1244_v48  ;;  %v1140_v48 = vld [vmem:[#allocation2 + $0x310] sm:$0xff]  ;;  %v1267_v20 = vadd.f32 %v1139_v63, %v8504_v19 }
 0x2c8   : > { %1373 = vst [vmem:[#allocation2 + $0x2d8] sm:$0xff] %v1245_v22  ;;  %v1141_v22 = vld [vmem:[#allocation2 + $0x190] sm:$0xff] }
 0x2c9   : > { %1374 = vst [vmem:[#allocation2 + $0xf0] sm:$0xff] %v1246_v27  ;;  %v8505_v27 = vld [vmem:[#allocation90_spill] sm:$0xff] }
 0x2ca   : > { %1375 = vst [vmem:[#allocation2 + $0x180] sm:$0xff] %v1247_v36  ;;  %v1268_v31 = vadd.f32 %v1140_v48, %v8505_v27  ;;  %v1269_v36 = vadd.f32 %v1141_v22, %v8506_v35 }
 0x2cb   : > { %1376 = vst [vmem:[#allocation2 + $0x170] sm:$0xff] %v1248_v51 }
 0x2cc   : > { %1377 = vst [vmem:[#allocation2 + $0x3d0] sm:$0xff] %v1249_v4 }
 0x2cd   : > { %1378 = vst [vmem:[#allocation2 + $0x250] sm:$0xff] %v1250_v24 }
 0x2ce   : > { %1379 = vst [vmem:[#allocation2 + $0x378] sm:$0xff] %v1251_v56 }
 0x2cf   : > { %1380 = vst [vmem:[#allocation2 + $0xb8] sm:$0xff] %v1252_v32 }
 0x2d0   : > { %1381 = vst [vmem:[#allocation2 + $0x38] sm:$0xff] %v1253_v9 }
 0x2d1   : > { %1382 = vst [vmem:[#allocation2 + $0x78] sm:$0xff] %v1254_v13 }
 0x2d2   : > { %1383 = vst [vmem:[#allocation2 + $0x308] sm:$0xff] %v1255_v7 }
 0x2d3   : > { %1384 = vst [vmem:[#allocation2 + $0x370] sm:$0xff] %v1256_v26 }
 0x2d4   : > { %1385 = vst [vmem:[#allocation2 + $0xc8] sm:$0xff] %v1257_v23 }
 0x2d5   : > { %1386 = vst [vmem:[#allocation2 + $0x278] sm:$0xff] %v1258_v42 }
 0x2d6   : > { %1387 = vst [vmem:[#allocation2 + $0x360] sm:$0xff] %v1259_v12 }
 0x2d7   : > { %1388 = vst [vmem:[#allocation2 + $0x228] sm:$0xff] %v1260_v61 }
 0x2d8   : > { %1389 = vst [vmem:[#allocation2 + $0x348] sm:$0xff] %v1261_v58 }
 0x2d9   : > { %1390 = vst [vmem:[#allocation2 + $0x148] sm:$0xff] %v1262_v62 }
 0x2da   : > { %1391 = vst [vmem:[#allocation2 + $0xf8] sm:$0xff] %v1263_v0 }
 0x2db   : > { %1392 = vst [vmem:[#allocation2 + $0x68] sm:$0xff] %v1264_v30 }
 0x2dc   : > { %1393 = vst [vmem:[#allocation2] sm:$0xff] %v1265_v55 }
 0x2dd   : > { %1394 = vst [vmem:[#allocation2 + $0x298] sm:$0xff] %v1266_v40 }
 0x2de   : > { %1395 = vst [vmem:[#allocation2 + $0x270] sm:$0xff] %v1267_v20 }
 0x2df   : > { %1396 = vst [vmem:[#allocation2 + $0x310] sm:$0xff] %v1268_v31 }
 0x2e0   : > { %1397 = vst [vmem:[#allocation2 + $0x190] sm:$0xff] %v1269_v36 }
 0x2e1 PF: > { %p4228_p9 = scmp.ne.s32.totalorder %s4795_s3, 3 }
 0x2e3   : > { %1401 = sbr.rel (%p4228_p9) target bundleno = 1269 (0x4f5), region = 60 }
 0x2e8   : > { %v1404_v43 = vld [vmem:[#allocation2 + $0xd8] sm:$0xff]  ;;  %s1530_s28 = sld [smem:[#allocation3]]  ;;  %s4815_s4 = smov 127   ;;  %v1402_v52 = vld [vmem:[#allocation2 + $0x2b0] sm:$0xff]  ;;  %v1660_v45 = vld [vmem:[%s5012_s16] sm:$0xff]  ;;  %vm2044_vm1 = vcmask 7168  }
 0x2e9   : > { %2857 = vrot.lane.b32.xlu1 %v1404_v43, %s4815_s4  ;;  %v1662_v51 = vld [vmem:[%s5012_s16 + $0x10] sm:$0xff]  ;;  %2853 = vrot.lane.b32.xlu0 %v1402_v52, %s4815_s4  ;;  %v1663_v59 = vld [vmem:[%s5012_s16 + $0x18] sm:$0xff]  ;;  %vm1788_vm2 = vcmp.gt.f32.partialorder %v1660_v45, 0.5  ;;  %v1407_v29 = vld [vmem:[#allocation2 + $0x368] sm:$0xff]  ;;  %s6368_s3 = sld [smem:[#allocation4]] }
 0x2ea   : > { %v1661_v4 = vld [vmem:[%s5012_s16 + $0x8] sm:$0xff]  ;;  %v1406_v3 = vld [vmem:[#allocation2 + $0x50] sm:$0xff]  ;;  %vm1790_vm0 = vcmp.gt.f32.partialorder %v1662_v51, 0.5  ;;  %v1664_v60 = vld [vmem:[%s5012_s16 + $0x20] sm:$0xff]  ;;  %vm1791_vm3 = vcmp.gt.f32.partialorder %v1663_v59, 0.5 }
 0x2eb   : > { %2861 = vrot.lane.b32.xlu2 %v1406_v3, %s4815_s4  ;;  %v1405_v11 = vld [vmem:[#allocation2 + $0x18] sm:$0xff]  ;;  %v1403_v28 = vld [vmem:[#allocation2 + $0x3b0] sm:$0xff]  ;;  %vm1789_vm4 = vcmp.gt.f32.partialorder %v1661_v4, 0.5  ;;  %vm1792_vm5 = vcmp.gt.f32.partialorder %v1664_v60, 0.5  ;;  %v1665_v57 = vld [vmem:[%s5012_s16 + $0x28] sm:$0xff] }
 0x2ec   : > { %v1666_v13 = vld [vmem:[%s5012_s16 + $0x30] sm:$0xff]  ;;  %v1667_v47 = vld [vmem:[%s5012_s16 + $0x38] sm:$0xff]  ;;  %v1409_v42 = vld [vmem:[#allocation2 + $0x48] sm:$0xff]  ;;  %vm1793_vm8 = vcmp.gt.f32.partialorder %v1665_v57, 0.5 }
 0x2ed   : > { %v1408_v18 = vld [vmem:[#allocation2 + $0x330] sm:$0xff]  ;;  %vm1794_vm6 = vcmp.gt.f32.partialorder %v1666_v13, 0.5  ;;  %vm1795_vm7 = vcmp.gt.f32.partialorder %v1667_v47, 0.5  ;;  %v1669_v1 = vld [vmem:[%s5012_s16 + $0x48] sm:$0xff]  ;;  %v1410_v14 = vld [vmem:[#allocation2 + $0x380] sm:$0xff] }
 0x2ee   : > { %v5681_v24 = vstv %s1530_s28  ;;  %v1668_v58 = vld [vmem:[%s5012_s16 + $0x40] sm:$0xff]  ;;  %v1411_v54 = vld [vmem:[#allocation2 + $0x110] sm:$0xff]  ;;  %v1412_v63 = vld [vmem:[#allocation2 + $0x118] sm:$0xff]  ;;  %vm1797_vm9 = vcmp.gt.f32.partialorder %v1669_v1, 0.5 }
 0x2ef   : > { %v1534_v56 = vadd.f32 %v5681_v24, %v1404_v43  ;;  %v1532_v21 = vadd.f32 %v5681_v24, %v1402_v52  ;;  %v1535_v6 = vadd.f32 %v5681_v24, %v1405_v11  ;;  %v1533_v32 = vadd.f32 %v5681_v24, %v1403_v28  ;;  %v1670_v0 = vld [vmem:[%s5012_s16 + $0x50] sm:$0xff]  ;;  %v1671_v10 = vld [vmem:[%s5012_s16 + $0x58] sm:$0xff]  ;;  %v1672_v27 = vld [vmem:[%s5012_s16 + $0x60] sm:$0xff] }
 0x2f0   : > { %v1536_v37 = vadd.f32 %v5681_v24, %v1406_v3  ;;  %v1538_v34 = vadd.f32 %v5681_v24, %v1408_v18  ;;  %v1539_v33 = vadd.f32 %v5681_v24, %v1409_v42  ;;  %v1537_v50 = vadd.f32 %v5681_v24, %v1407_v29  ;;  %v1413_v22 = vld [vmem:[#allocation2 + $0x98] sm:$0xff]  ;;  %v1414_v35 = vld [vmem:[#allocation2 + $0x320] sm:$0xff]  ;;  %v1673_v52 = vld [vmem:[%s5012_s16 + $0x68] sm:$0xff] }
 0x2f1   : > { %v5689_v41 = vsel %vm1790_vm0, %v1534_v56, -100000.0  ;;  %v5691_v9 = vsel %vm1788_vm2, %v1532_v21, -100000.0  ;;  %v5693_v53 = vsel %vm1791_vm3, %v1535_v6, -100000.0  ;;  %2859 = vrot.lane.b32.xlu1 %v1405_v11, %s4815_s4  ;;  %v5696_v15 = vsel %vm1789_vm4, %v1533_v32, -100000.0  ;;  %2855 = vrot.lane.b32.xlu0 %v1403_v28, %s4815_s4  ;;  %v1415_v4 = vld [vmem:[#allocation2 + $0x150] sm:$0xff]  ;;  %v1676_v11 = vld [vmem:[%s5012_s16 + $0x80] sm:$0xff] }
 0x2f2   : > { %v2048_v5 = vsel %vm2044_vm1, %v5689_v41, -inf  ;;  %v2045_v25 = vsel %vm2044_vm1, %v5691_v9, -inf  ;;  %v2046_v7 = vsel %vm2044_vm1, %v5696_v15, -inf  ;;  %v5709_v23 = vsel %vm1792_vm5, %v1536_v37, -100000.0  ;;  %v5763_v21 = vld [vmem:[#allocation2 + $0x2e0] sm:$0xff]  ;;  %v1674_v6 = vld [vmem:[%s5012_s16 + $0x70] sm:$0xff] }
 0x2f3   : > { %v2047_v26 = vmax.f32 %v2045_v25, %v2046_v7  ;;  %v2050_v16 = vsel %vm2044_vm1, %v5693_v53, -inf  ;;  %2863 = vrot.lane.b32.xlu2 %v1407_v29, %s4815_s4  ;;  %v2052_v12 = vsel %vm2044_vm1, %v5709_v23, -inf  ;;  %v5719_v44 = vsel %vm1794_vm6, %v1538_v34, -100000.0  ;;  %v1416_v25 = vld [vmem:[#allocation2 + $0x108] sm:$0xff]  ;;  %v5774_v29 = vld [vmem:[#allocation2 + $0x338] sm:$0xff]  ;;  %v5780_v57 = vld [vmem:[#allocation2 + $0x340] sm:$0xff] }
 0x2f4   : > { %v5723_v39 = vsel %vm1793_vm8, %v1537_v50, -100000.0  ;;  %v1540_v62 = vadd.f32 %v5681_v24, %v1410_v14  ;;  %v5726_v38 = vsel %vm1795_vm7, %v1539_v33, -100000.0  ;;  %v1541_v46 = vadd.f32 %v5681_v24, %v1411_v54  ;;  %v1417_v50 = vld [vmem:[#allocation2 + $0x60] sm:$0xff] }
 0x2f5   : > { %v2049_v8 = vmax.f32 %v2047_v26, %v2048_v5  ;;  %v2054_v2 = vsel %vm2044_vm1, %v5723_v39, -inf  ;;  %v2056_v30 = vsel %vm2044_vm1, %v5719_v44, -inf  ;;  %vm1796_vm10 = vcmp.gt.f32.partialorder %v1668_v58, 0.5  ;;  %v1678_v5 = vld [vmem:[%s5012_s16 + $0x90] sm:$0xff] }
 0x2f6   : > { %v1542_v49 = vadd.f32 %v5681_v24, %v1412_v63  ;;  %v5737_v48 = vsel %vm1796_vm10, %v1540_v62, -100000.0  ;;  %v2058_v40 = vsel %vm2044_vm1, %v5726_v38, -inf  ;;  %vm1798_vm11 = vcmp.gt.f32.partialorder %v1670_v0, 0.5  ;;  %v1681_v0 = vld [vmem:[%s5012_s16 + $0xa8] sm:$0xff] }
 0x2f7   : > { %v2051_v61 = vmax.f32 %v2049_v8, %v2050_v16  ;;  %v5742_v19 = vsel %vm1797_vm9, %v1541_v46, -100000.0  ;;  %v1543_v31 = vadd.f32 %v5681_v24, %v1413_v22  ;;  %v2060_v36 = vsel %vm2044_vm1, %v5737_v48, -inf  ;;  %v1675_v8 = vld [vmem:[%s5012_s16 + $0x78] sm:$0xff] }
 0x2f8   : > { %vm1799_vm12 = vcmp.gt.f32.partialorder %v1671_v10, 0.5  ;;  %v5749_v43 = vsel %vm1798_vm11, %v1542_v49, -100000.0  ;;  %v1544_v51 = vadd.f32 %v5681_v24, %v1414_v35  ;;  %v2062_v59 = vsel %vm2044_vm1, %v5742_v19, -inf  ;;  %v5807_v49 = vld [vmem:[#allocation2 + $0x1a8] sm:$0xff] }
 0x2f9   : > { %2867 = vrot.lane.b32.xlu1 %v1409_v42, %s4815_s4  ;;  %v2053_v17 = vmax.f32 %v2051_v61, %v2052_v12  ;;  %2865 = vrot.lane.b32.xlu0 %v1408_v18, %s4815_s4  ;;  %vm1800_vm13 = vcmp.gt.f32.partialorder %v1672_v27, 0.5  ;;  %v1545_v3 = vadd.f32 %v5681_v24, %v1415_v4  ;;  %v5758_v28 = vsel %vm1799_vm12, %v1543_v31, -100000.0  ;;  %v1679_v18 = vld [vmem:[%s5012_s16 + $0x98] sm:$0xff]  ;;  %v1680_v27 = vld [vmem:[%s5012_s16 + $0xa0] sm:$0xff] }
 0x2fa   : > { %v2064_v56 = vsel %vm2044_vm1, %v5749_v43, -inf  ;;  %vm1801_vm14 = vcmp.gt.f32.partialorder %v1673_v52, 0.5  ;;  %v5766_v32 = vsel %vm1800_vm13, %v1544_v51, -100000.0  ;;  %v1548_v13 = vadd.f32 %v5681_v24, %v5763_v21  ;;  %v1422_v51 = vld [vmem:[#allocation2 + $0x80] sm:$0xff] }
 0x2fb   : > { %v2055_v55 = vmax.f32 %v2053_v17, %v2054_v2  ;;  %2869 = vrot.lane.b32.xlu2 %v1410_v14, %s4815_s4  ;;  %vm1804_vm15 = vcmp.gt.f32.partialorder %v1676_v11, 0.5  ;;  %v2066_v7 = vsel %vm2044_vm1, %v5758_v28, -inf  ;;  %v1546_v26 = vadd.f32 %v5681_v24, %v1416_v25  ;;  %v1677_v2 = vld [vmem:[%s5012_s16 + $0x88] sm:$0xff] }
 0x2fc   : > { %v5777_v47 = vsel %vm1801_vm14, %v1545_v3, -100000.0  ;;  %v1550_v16 = vadd.f32 %v5681_v24, %v5774_v29  ;;  %vm1802_vm0 = vcmp.gt.f32.partialorder %v1674_v6, 0.5  ;;  %v2068_v42 = vsel %vm2044_vm1, %v5766_v32, -inf }
 0x2fd   : > { %v2057_v20 = vmax.f32 %v2055_v55, %v2056_v30  ;;  %v1551_v33 = vadd.f32 %v5681_v24, %v5780_v57  ;;  %vm1806_vm2 = vcmp.gt.f32.partialorder %v1678_v5, 0.5  ;;  %v5789_v12 = vsel %vm1804_vm15, %v1548_v13, -100000.0  ;;  %v5839_v5 = vld [vmem:[#allocation2 + $0x3e8] sm:$0xff] }
 0x2fe   : > { %vm1807_vm3 = vcmp.gt.f32.partialorder %v1679_v18, 0.5  ;;  %v2070_v1 = vsel %vm2044_vm1, %v5777_v47, -inf  ;;  %v1547_v14 = vadd.f32 %v5681_v24, %v1417_v50  ;;  %v5794_v58 = vsel %vm1802_vm0, %v1546_v26, -100000.0  ;;  %v1685_v18 = vld [vmem:[%s5012_s16 + $0xc8] sm:$0xff] }
 0x2ff   : > { %v2059_v45 = vmax.f32 %v2057_v20, %v2058_v40  ;;  %vm1803_vm4 = vcmp.gt.f32.partialorder %v1675_v8, 0.5  ;;  %v5797_v17 = vsel %vm1806_vm2, %v1550_v16, -100000.0  ;;  %v2082_v30 = vsel %vm2044_vm1, %v5789_v12, -inf  ;;  %v1682_v40 = vld [vmem:[%s5012_s16 + $0xb0] sm:$0xff]  ;;  %v5853_v8 = vld [vmem:[#allocation2 + $0x2f8] sm:$0xff] }
 0x300   : > { %vm1805_vm5 = vcmp.gt.f32.partialorder %v1677_v2, 0.5  ;;  %v2072_v55 = vsel %vm2044_vm1, %v5794_v58, -inf  ;;  %v5818_v31 = vsel %vm1803_vm4, %v1547_v14, -100000.0  ;;  %vm1809_vm6 = vcmp.gt.f32.partialorder %v1681_v0, 0.5 }
 0x301   : > { %2873 = vrot.lane.b32.xlu1 %v1412_v63, %s4815_s4  ;;  %v2061_v60 = vmax.f32 %v2059_v45, %v2060_v36  ;;  %2871 = vrot.lane.b32.xlu0 %v1411_v54, %s4815_s4  ;;  %v1419_v54 = vld [vmem:[#allocation2 + $0x388] sm:$0xff]  ;;  %v5805_v63 = vsel %vm1807_vm3, %v1551_v33, -100000.0  ;;  %v5822_v36 = vld [vmem:[#allocation2 + $0x1b8] sm:$0xff]  ;;  %vm1810_vm7 = vcmp.gt.f32.partialorder %v1682_v40, 0.5  ;;  %vm1808_vm8 = vcmp.gt.f32.partialorder %v1680_v27, 0.5 }
 0x302   : > { %v1549_v46 = vadd.f32 %v5681_v24, %v1419_v54  ;;  %v1554_v45 = vadd.f32 %v5681_v24, %v5822_v36  ;;  %v2087_v3 = vsel %vm2044_vm1, %v5805_v63, -inf  ;;  %v2074_v11 = vsel %vm2044_vm1, %v5818_v31, -inf  ;;  %v5855_v33 = vld [vmem:[#allocation2 + $0x168] sm:$0xff] }
 0x303   : > { %v2063_v37 = vmax.f32 %v2061_v60, %v2062_v59  ;;  %2875 = vrot.lane.b32.xlu2 %v1413_v22, %s4815_s4  ;;  %v1553_v22 = vadd.f32 %v5681_v24, %v5807_v49  ;;  %v1556_v26 = vadd.f32 %v5681_v24, %v5839_v5  ;;  %v1555_v14 = vadd.f32 %v5681_v24, %v5855_v33 }
 0x304   : > { %v5814_v20 = vsel %vm1805_vm5, %v1549_v46, -100000.0  ;;  %vm1813_vm11 = vcmp.gt.f32.partialorder %v1685_v18, 0.5  ;;  %v1687_v46 = vld [vmem:[%s5012_s16 + $0xd8] sm:$0xff]  ;;  %v1690_v18 = vld [vmem:[%s5012_s16 + $0xf0] sm:$0xff] }
 0x305   : > { %v2065_v34 = vmax.f32 %v2063_v37, %v2064_v56  ;;  %v2083_v52 = vsel %vm2044_vm1, %v5814_v20, -inf  ;;  %v5834_v56 = vsel %vm1809_vm6, %v1553_v22, -100000.0  ;;  %v1684_v37 = vld [vmem:[%s5012_s16 + $0xc0] sm:$0xff]  ;;  %vm1815_vm12 = vcmp.gt.f32.partialorder %v1687_v46, 0.5 }
 0x306   : > { %v2084_v59 = vmax.f32 %v2082_v30, %v2083_v52  ;;  %vm1812_vm9 = vcmp.gt.f32.partialorder %v1684_v37, 0.5  ;;  %v1688_v22 = vld [vmem:[%s5012_s16 + $0xe0] sm:$0xff]  ;;  %v5881_v52 = vld [vmem:[#allocation2 + $0x138] sm:$0xff]  ;;  %vm1818_vm15 = vcmp.gt.f32.partialorder %v1690_v18, 0.5 }
 0x307   : > { %v2067_v61 = vmax.f32 %v2065_v34, %v2066_v7  ;;  %v5845_v7 = vsel %vm1810_vm7, %v1554_v45, -100000.0  ;;  %v1560_v45 = vadd.f32 %v5681_v24, %v5881_v52  ;;  %vm1816_vm13 = vcmp.gt.f32.partialorder %v1688_v22, 0.5  ;;  %v1689_v22 = vld [vmem:[%s5012_s16 + $0xe8] sm:$0xff] }
 0x308   : > { %vm1817_vm2 = vcmp.gt.f32.partialorder %v1689_v22, 0.5  ;;  %v1696_v22 = vld [vmem:[%s5012_s16 + $0x120] sm:$0xff] }
 0x309   : > { %2879 = vrot.lane.b32.xlu1 %v1415_v4, %s4815_s4  ;;  %v2069_v62 = vmax.f32 %v2067_v61, %v2068_v42  ;;  %2877 = vrot.lane.b32.xlu0 %v1414_v35, %s4815_s4  ;;  %v2085_v35 = vsel %vm2044_vm1, %v5797_v17, -inf  ;;  %v1552_v4 = vadd.f32 %v5681_v24, %v1422_v51  ;;  %v2091_v42 = vsel %vm2044_vm1, %v5834_v56, -inf }
 0x30a   : > { %v2086_v6 = vmax.f32 %v2084_v59, %v2085_v35  ;;  %v1557_v61 = vadd.f32 %v5681_v24, %v5853_v8  ;;  %vm1824_vm6 = vcmp.gt.f32.partialorder %v1696_v22, 0.5 }
 0x30b   : > { %v2071_v10 = vmax.f32 %v2069_v62, %v2070_v1  ;;  %2881 = vrot.lane.b32.xlu2 %v1416_v25, %s4815_s4  ;;  %v5837_v13 = vsel %vm1808_vm8, %v1552_v4, -100000.0  ;;  %v5865_v62 = vsel %vm1812_vm9, %v1556_v26, -100000.0 }
 0x30c   : > { %v2089_v25 = vsel %vm2044_vm1, %v5837_v13, -inf  ;;  %v2088_v34 = vmax.f32 %v2086_v6, %v2087_v3  ;;  %v5874_v40 = vsel %vm1813_vm11, %v1557_v61, -100000.0  ;;  %v2097_v35 = vsel %vm2044_vm1, %v5865_v62, -inf  ;;  %v1691_v61 = vld [vmem:[%s5012_s16 + $0xf8] sm:$0xff] }
 0x30d   : > { %v2073_v60 = vmax.f32 %v2071_v10, %v2072_v55  ;;  %v5870_v55 = vld [vmem:[#allocation2 + $0x28] sm:$0xff]  ;;  %v2099_v3 = vsel %vm2044_vm1, %v5874_v40, -inf  ;;  %vm1819_vm0 = vcmp.gt.f32.partialorder %v1691_v61, 0.5 }
 0x30e   : > { %v2090_v1 = vmax.f32 %v2088_v34, %v2089_v25  ;;  %v1559_v27 = vadd.f32 %v5681_v24, %v5870_v55  ;;  %v5896_v25 = vsel %vm1816_vm13, %v1560_v45, -100000.0  ;;  %v5928_v45 = vld [vmem:[#allocation2 + $0x3c0] sm:$0xff] }
 0x30f   : > { %v2075_v16 = vmax.f32 %v2073_v60, %v2074_v11  ;;  %v1428_v60 = vld [vmem:[#allocation2 + $0x290] sm:$0xff] }
 0x310   : > { %v2092_v0 = vmax.f32 %v2090_v1, %v2091_v42  ;;  %v1686_v11 = vld [vmem:[%s5012_s16 + $0xd0] sm:$0xff]  ;;  %v5892_v6 = vsel %vm1815_vm12, %v1559_v27, -100000.0  ;;  %v5903_v42 = vld [vmem:[#allocation2 + $0x1c0] sm:$0xff] }
 0x311   : > { %2885 = vrot.lane.b32.xlu1 %v5763_v21, %s4815_s4  ;;  %2883 = vrot.lane.b32.xlu0 %v1417_v50, %s4815_s4  ;;  %v1683_v21 = vld [vmem:[%s5012_s16 + $0xb8] sm:$0xff]  ;;  %v2093_v50 = vsel %vm2044_vm1, %v5845_v7, -inf  ;;  %v2076_v30 = vrot.slane %v2075_v16, 4  ;;  %8507 = vst [vmem:[#allocation94_spill] sm:$0xff] %v5892_v6  ;;  %vm1814_vm14 = vcmp.gt.f32.partialorder %v1686_v11, 0.5 }
 0x312   : > { %vm1811_vm10 = vcmp.gt.f32.partialorder %v1683_v21, 0.5 }
 0x313   : > { %2887 = vrot.lane.b32.xlu2 %v1419_v54, %s4815_s4  ;;  %v5868_v2 = vsel %vm1811_vm10, %v1555_v14, -100000.0  ;;  %v2094_v54 = vmax.f32 %v2092_v0, %v2093_v50  ;;  %v2077_v4 = vmax.f32 %v2075_v16, %v2076_v30  ;;  %v2103_v16 = vsel %vm2044_vm1, %v5892_v6, -inf  ;;  %v5912_v50 = vld [vmem:[#allocation2 + $0x280] sm:$0xff] }
 0x314   : > { %v2095_v10 = vsel %vm2044_vm1, %v5868_v2, -inf  ;;  %v2105_v14 = vsel %vm2044_vm1, %v5896_v25, -inf  ;;  %v1563_v0 = vadd.f32 %v5681_v24, %v5912_v50 }
 0x315   : > { %v2096_v59 = vmax.f32 %v2094_v54, %v2095_v10  ;;  %v2078_v34 = vrot.slane %v2077_v4, 2  ;;  %v5920_v10 = vld [vmem:[#allocation2 + $0xc0] sm:$0xff]  ;;  %v1693_v54 = vld [vmem:[%s5012_s16 + $0x108] sm:$0xff] }
 0x316   : > { %vm1821_vm3 = vcmp.gt.f32.partialorder %v1693_v54, 0.5 }
 0x317   : > { %v2098_v37 = vmax.f32 %v2096_v59, %v2097_v35  ;;  %v2079_v30 = vmax.f32 %v2077_v4, %v2078_v34  ;;  %v1561_v35 = vadd.f32 %v5681_v24, %v5920_v10  ;;  %v5932_v59 = vsel %vm1819_vm0, %v1563_v0, -100000.0 }
 0x318   : > { %8509 = vst [vmem:[#allocation96_spill] sm:$0xff] %v5932_v59  ;;  %v1565_v4 = vadd.f32 %v5681_v24, %v5928_v45  ;;  %v2111_v34 = vsel %vm2044_vm1, %v5932_v59, -inf }
 0x319   : > { %2891 = vrot.lane.b32.xlu1 %v5780_v57, %s4815_s4  ;;  %2889 = vrot.lane.b32.xlu0 %v5774_v29, %s4815_s4  ;;  %v1558_v57 = vadd.f32 %v5681_v24, %v1428_v60  ;;  %v2100_v26 = vmax.f32 %v2098_v37, %v2099_v3  ;;  %v5937_v3 = vsel %vm1817_vm2, %v1561_v35, -100000.0  ;;  %v2080_v11 = vrot.slane %v2079_v30, 1  ;;  %v5972_v35 = vld [vmem:[#allocation2 + $0x218] sm:$0xff] }
 0x31a   : > { %v2107_v18 = vsel %vm2044_vm1, %v5937_v3, -inf }
 0x31b   : > { %2893 = vrot.lane.b32.xlu2 %v1422_v51, %s4815_s4  ;;  %v5899_v29 = vsel %vm1814_vm14, %v1558_v57, -100000.0  ;;  %v1562_v51 = vadd.f32 %v5681_v24, %v5903_v42  ;;  %v5941_v57 = vld [vmem:[#allocation2 + $0x158] sm:$0xff]  ;;  %v5953_v61 = vmax.f32 %v2079_v30, %v2080_v11 }
 0x31c   : > { %v2101_v21 = vsel %vm2044_vm1, %v5899_v29, -inf }
 0x31d   : > { %v2102_v1 = vmax.f32 %v2100_v26, %v2101_v21  ;;  %v5923_v27 = vsel %vm1818_vm15, %v1562_v51, -100000.0  ;;  %v5957_v51 = vld [vmem:[#allocation2 + $0x100] sm:$0xff] }
 0x31e   : > { %8508 = vst [vmem:[#allocation95_spill] sm:$0xff] %v5923_v27  ;;  %v2109_v37 = vsel %vm2044_vm1, %v5923_v27, -inf }
 0x31f   : > { %v2104_v46 = vmax.f32 %v2102_v1, %v2103_v16  ;;  %v5951_v16 = vsel %vm1821_vm3, %v1565_v4, -100000.0  ;;  %v1692_v1 = vld [vmem:[%s5012_s16 + $0x100] sm:$0xff]  ;;  %v1568_v4 = vadd.f32 %v5681_v24, %v5972_v35 }
 0x320   : > { %8510 = vst [vmem:[#allocation97_spill] sm:$0xff] %v5951_v16  ;;  %vm1820_vm5 = vcmp.gt.f32.partialorder %v1692_v1, 0.5 }
 0x321   : > { %2897 = vrot.lane.b32.xlu1 %v5822_v36, %s4815_s4  ;;  %2895 = vrot.lane.b32.xlu0 %v5807_v49, %s4815_s4  ;;  %v2106_v36 = vmax.f32 %v2104_v46, %v2105_v14  ;;  %v1694_v49 = vld [vmem:[%s5012_s16 + $0x110] sm:$0xff]  ;;  %v1564_v46 = vadd.f32 %v5681_v24, %v5957_v51 }
 0x322   : > { %vm1822_vm4 = vcmp.gt.f32.partialorder %v1694_v49, 0.5 }
 0x323   : > { %2899 = vrot.lane.b32.xlu2 %v5855_v33, %s4815_s4  ;;  %v1566_v33 = vadd.f32 %v5681_v24, %v5941_v57  ;;  %v2108_v26 = vmax.f32 %v2106_v36, %v2107_v18  ;;  %v5968_v54 = vsel %vm1820_vm5, %v1564_v46, -100000.0  ;;  %v2355_v18 = vsub.f32 %v5794_v58, %v5953_v61  ;;  %v5998_v46 = vld [vmem:[#allocation2 + $0x3f8] sm:$0xff] }
 0x324   : > { %8512 = vst [vmem:[#allocation99_spill] sm:$0xff] %v5968_v54  ;;  %v2119_v36 = vsel %vm2044_vm1, %v5968_v54, -inf }
 0x325   : > { %v2110_v21 = vmax.f32 %v2108_v26, %v2109_v37  ;;  %v5960_v14 = vsel %vm1822_vm4, %v1566_v33, -100000.0  ;;  %v2342_v37 = vsub.f32 %v5696_v15, %v5953_v61  ;;  %v2343_v26 = vsub.f32 %v5689_v41, %v5953_v61  ;;  %v1697_v15 = vld [vmem:[%s5012_s16 + $0x128] sm:$0xff] }
 0x326   : > { %8511 = vst [vmem:[#allocation98_spill] sm:$0xff] %v5960_v14  ;;  %vm1825_vm8 = vcmp.gt.f32.partialorder %v1697_v15, 0.5  ;;  %v6038_v15 = vld [vmem:[%s5012_s16 + $0x158] sm:$0xff] }
 0x327   : > { %v2112_v0 = vmax.f32 %v2110_v21, %v2111_v34  ;;  %v5990_v21 = vld [vmem:[#allocation2 + $0x3e0] sm:$0xff]  ;;  %v2473_v41 = vmul.f32 1.442695, %v2343_v26  ;;  %v1699_v26 = vld [vmem:[%s5012_s16 + $0x138] sm:$0xff]  ;;  %vm1831_vm11 = vcmp.gt.f32.partialorder %v6038_v15, 0.5 }
 0x328   : > { %v1567_v58 = vadd.f32 %v5681_v24, %v5990_v21  ;;  %vm1827_vm10 = vcmp.gt.f32.partialorder %v1699_v26, 0.5 }
 0x329   : > { %2903 = vrot.lane.b32.xlu1 %v5853_v8, %s4815_s4  ;;  %2901 = vrot.lane.b32.xlu0 %v5839_v5, %s4815_s4  ;;  %v2120_v8 = vsel %vm2044_vm1, %v5951_v16, -inf  ;;  %v2113_v30 = vrot.slane %v2112_v0, 4  ;;  %v2122_v5 = vsel %vm2044_vm1, %v5960_v14, -inf }
 0x32a   : > { %v2121_v11 = vmax.f32 %v2119_v36, %v2120_v8  ;;  %v2471_v8 = vmul.f32 1.442695, %v2342_v37  ;;  %v1700_v36 = vld [vmem:[%s5012_s16 + $0x140] sm:$0xff]  ;;  %v2344_v37 = vsub.f32 %v5693_v53, %v5953_v61 }
 0x32b   : > { %2905 = vrot.lane.b32.xlu2 %v1428_v60, %s4815_s4  ;;  %v2114_v49 = vmax.f32 %v2112_v0, %v2113_v30  ;;  %v2341_v60 = vsub.f32 %v5691_v9, %v5953_v61  ;;  %v1695_v9 = vld [vmem:[%s5012_s16 + $0x118] sm:$0xff]  ;;  %v5994_v0 = vsel %vm1824_vm6, %v1568_v4, -100000.0  ;;  %v2497_v30 = vmul.f32 1.442695, %v2355_v18 }
 0x32c   : > { %v2123_v1 = vmax.f32 %v2121_v11, %v2122_v5  ;;  %8513 = vst [vmem:[#allocation100_spill] sm:$0xff] %v5994_v0  ;;  %vm1823_vm7 = vcmp.gt.f32.partialorder %v1695_v9, 0.5  ;;  %v2126_v5 = vsel %vm2044_vm1, %v5994_v0, -inf  ;;  %v2345_v4 = vsub.f32 %v5709_v23, %v5953_v61  ;;  %v6013_v11 = vld [vmem:[#allocation2 + $0x2a0] sm:$0xff]  ;;  %v6027_v9 = vld [vmem:[#allocation2 + $0x128] sm:$0xff] }
 0x32d   : > { %v2115_v33 = vrot.slane %v2114_v49, 2  ;;  %v2469_v34 = vmul.f32 1.442695, %v2341_v60  ;;  %v6004_v22 = vsel %vm1823_vm7, %v1567_v58, -100000.0  ;;  %vm1828_vm9 = vcmp.gt.f32.partialorder %v1700_v36, 0.5 }
 0x32e   : > { %8514 = vst [vmem:[#allocation101_spill] sm:$0xff] %v6004_v22  ;;  %v1571_v58 = vadd.f32 %v5681_v24, %v6027_v9  ;;  %v2348_v36 = vsub.f32 %v5726_v38, %v5953_v61  ;;  %v1698_v38 = vld [vmem:[%s5012_s16 + $0x130] sm:$0xff] }
 0x32f   : > { %4385 = vpow2.f32 %v2469_v34  ;;  %v2477_v34 = vmul.f32 1.442695, %v2345_v4  ;;  %vm1826_vm12 = vcmp.gt.f32.partialorder %v1698_v38, 0.5  ;;  %v2351_v38 = vsub.f32 %v5749_v43, %v5953_v61 }
 0x330   : > { %4387 = vpow2.f32 %v2473_v41 }
 0x331   : > { %2909 = vrot.lane.b32.xlu1 %v5881_v52, %s4815_s4  ;;  %2907 = vrot.lane.b32.xlu0 %v5870_v55, %s4815_s4  ;;  %v2116_v52 = vmax.f32 %v2114_v49, %v2115_v33  ;;  %v1569_v55 = vadd.f32 %v5681_v24, %v5998_v46  ;;  %v2124_v49 = vsel %vm2044_vm1, %v6004_v22, -inf  ;;  %v1572_v33 = vadd.f32 %v5681_v24, %v6013_v11 }
 0x332   : > { %v2125_v60 = vmax.f32 %v2123_v1, %v2124_v49  ;;  %4389 = vpow2.f32 %v2471_v8  ;;  %v2475_v1 = vmul.f32 1.442695, %v2344_v37 }
 0x333   : > { %2911 = vrot.lane.b32.xlu2 %v5920_v10, %s4815_s4  ;;  %v2346_v10 = vsub.f32 %v5723_v39, %v5953_v61  ;;  %v2117_v18 = vrot.slane %v2116_v52, 1  ;;  %v6025_v23 = vsel %vm1825_vm8, %v1569_v55, -100000.0  ;;  %4391 = vpow2.f32 %v2497_v30 }
 0x334   : > { %8515 = vst [vmem:[#allocation102_spill] sm:$0xff] %v6025_v23  ;;  %v2127_v39 = vmax.f32 %v2125_v60, %v2126_v5  ;;  %4393 = vpow2.f32 %v2477_v34  ;;  %v2128_v30 = vsel %vm2044_vm1, %v6025_v23, -inf  ;;  %v6044_v55 = vsel %vm1828_vm9, %v1572_v33, -100000.0  ;;  %v6102_v23 = vld [vmem:[#allocation2 + $0x1f0] sm:$0xff] }
 0x335   : > { %v6029_v53 = vpop.eup %4385  ;;  %v2479_v41 = vmul.f32 1.442695, %v2346_v10  ;;  %v6040_v8 = vmax.f32 %v2116_v52, %v2117_v18  ;;  %8516 = vst [vmem:[#allocation103_spill] sm:$0xff] %v6044_v55  ;;  %4395 = vpow2.f32 %v2475_v1  ;;  %v2349_v52 = vsub.f32 %v5737_v48, %v5953_v61  ;;  %v6068_v18 = vld [vmem:[#allocation2 + $0xa0] sm:$0xff]  ;;  %v6070_v48 = vld [vmem:[#allocation2 + $0x8] sm:$0xff] }
 0x336   : > { %v3661_v5 = vsel %vm2044_vm1, %v6029_v53, 0.0  ;;  %v6060_v60 = vsel %vm1827_vm10, %v1571_v58, -100000.0  ;;  %v2129_v33 = vmax.f32 %v2127_v39, %v2128_v30  ;;  %v1574_v58 = vadd.f32 %v5681_v24, %v6068_v18 }
 0x337   : > { %8517 = vst [vmem:[#allocation104_spill] sm:$0xff] %v6060_v60  ;;  %4397 = vpow2.f32 %v2479_v41  ;;  %v2370_v37 = vsub.f32 %v5937_v3, %v6040_v8  ;;  %v2485_v34 = vmul.f32 1.442695, %v2349_v52  ;;  %v1570_v41 = vadd.f32 %v5681_v24, %v6070_v48 }
 0x338   : > { %v2483_v30 = vmul.f32 1.442695, %v2348_v36  ;;  %v2132_v36 = vsel %vm2044_vm1, %v6060_v60, -inf  ;;  %v1705_v60 = vld [vmem:[%s5012_s16 + $0x168] sm:$0xff] }
 0x339   : > { %2915 = vrot.lane.b32.xlu1 %v5912_v50, %s4815_s4  ;;  %2913 = vrot.lane.b32.xlu0 %v5903_v42, %s4815_s4  ;;  %v2347_v50 = vsub.f32 %v5719_v44, %v5953_v61  ;;  %v6046_v42 = vpop.eup %4387  ;;  %v6050_v44 = vld [vmem:[#allocation2 + $0x2c0] sm:$0xff]  ;;  %v6091_v0 = vsel %vm1826_vm12, %v1570_v41, -100000.0  ;;  %vm1833_vm15 = vcmp.gt.f32.partialorder %v1705_v60, 0.5 }
 0x33a   : > { %v6058_v4 = vpop.eup %4389  ;;  %v1575_v10 = vadd.f32 %v5681_v24, %v6050_v44  ;;  %v3664_v39 = vsel %vm2044_vm1, %v6046_v42, 0.0  ;;  %8518 = vst [vmem:[#allocation105_spill] sm:$0xff] %v6091_v0 }
 0x33b   : > { %2917 = vrot.lane.b32.xlu2 %v5957_v51, %s4815_s4  ;;  %v2481_v49 = vmul.f32 1.442695, %v2347_v50  ;;  %v1702_v51 = vld [vmem:[%s5012_s16 + $0x150] sm:$0xff]  ;;  %v3662_v26 = vsel %vm2044_vm1, %v6058_v4, 0.0  ;;  %v6075_v1 = vpop.eup %4391 }
 0x33c   : > { %v3663_v3 = vadd.f32 %v3662_v26, %v3661_v5  ;;  %v6081_v50 = vpop.eup %4393  ;;  %vm1830_vm13 = vcmp.gt.f32.partialorder %v1702_v51, 0.5  ;;  %v1706_v5 = vld [vmem:[%s5012_s16 + $0x170] sm:$0xff]  ;;  %v2527_v26 = vmul.f32 1.442695, %v2370_v37  ;;  %v6113_v37 = vld [vmem:[#allocation2 + $0x1e0] sm:$0xff]  ;;  %v6142_v60 = vsel %vm1831_vm11, %v1575_v10, -100000.0 }
 0x33d   : > { %4399 = vpow2.f32 %v2481_v49  ;;  %v6087_v52 = vpop.eup %4395  ;;  %v2130_v49 = vsel %vm2044_vm1, %v6091_v0, -inf  ;;  %v3668_v0 = vsel %vm2044_vm1, %v6081_v50, 0.0  ;;  %vm1834_vm14 = vcmp.gt.f32.partialorder %v1706_v5, 0.5  ;;  %8520 = vst [vmem:[#allocation107_spill] sm:$0xff] %v6142_v60  ;;  %v1443_v10 = vld [vmem:[#allocation2 + $0x3f0] sm:$0xff]  ;;  %v6157_v5 = vld [vmem:[#allocation2 + $0x240] sm:$0xff] }
 0x33e   : > { %4401 = vpow2.f32 %v2485_v34  ;;  %v6106_v41 = vpop.eup %4397  ;;  %v6109_v34 = vsel %vm1830_vm13, %v1574_v58, -100000.0  ;;  %v2131_v43 = vmax.f32 %v2129_v33, %v2130_v49  ;;  %v3665_v16 = vadd.f32 %v3664_v39, %v3663_v3 }
 0x33f   : > { %8519 = vst [vmem:[#allocation106_spill] sm:$0xff] %v6109_v34  ;;  %v1577_v51 = vadd.f32 %v5681_v24, %v6113_v37  ;;  %4403 = vpow2.f32 %v2483_v30  ;;  %v2489_v49 = vmul.f32 1.442695, %v2351_v38  ;;  %v2352_v3 = vsub.f32 %v5758_v28, %v5953_v61 }
 0x340   : > { %v2133_v58 = vmax.f32 %v2131_v43, %v2132_v36  ;;  %v6134_v30 = vsel %vm2044_vm1, %v6075_v1, 0.0  ;;  %4405 = vpow2.f32 %v2527_v26  ;;  %v2138_v28 = vsel %vm2044_vm1, %v6109_v34, -inf  ;;  %v6159_v36 = vld [vmem:[#allocation2 + $0x230] sm:$0xff]  ;;  %v1708_v34 = vld [vmem:[%s5012_s16 + $0x180] sm:$0xff] }
 0x341   : > { %2921 = vrot.lane.b32.xlu1 %v5941_v57, %s4815_s4  ;;  %2919 = vrot.lane.b32.xlu0 %v5928_v45, %s4815_s4  ;;  %v2350_v57 = vsub.f32 %v5742_v19, %v5953_v61  ;;  %v3666_v45 = vsel %vm2044_vm1, %v6087_v52, 0.0  ;;  %v1578_v19 = vadd.f32 %v5681_v24, %v6102_v23  ;;  %4407 = vpow2.f32 %v2489_v49 }
 0x342   : > { %v3667_v33 = vadd.f32 %v3666_v45, %v3665_v16  ;;  %v2134_v16 = vsel %vm2044_vm1, %v6044_v55, -inf  ;;  %v6151_v26 = vsel %vm1833_vm15, %v1577_v51, -100000.0  ;;  %v2354_v43 = vsub.f32 %v5777_v47, %v5953_v61 }
 0x343   : > { %2923 = vrot.lane.b32.xlu2 %v5990_v21, %s4815_s4  ;;  %v2487_v14 = vmul.f32 1.442695, %v2350_v57  ;;  %v6122_v22 = vpop.eup %4399  ;;  %v3670_v21 = vsel %vm2044_vm1, %v6106_v41, 0.0  ;;  %v6147_v57 = vsel %vm1834_vm14, %v1578_v19, -100000.0  ;;  %8522 = vst [vmem:[#allocation109_spill] sm:$0xff] %v6151_v26  ;;  %v2353_v19 = vsub.f32 %v5766_v32, %v5953_v61 }
 0x344   : > { %v6130_v39 = vpop.eup %4401  ;;  %v3669_v38 = vadd.f32 %v3668_v0, %v3667_v33  ;;  %8521 = vst [vmem:[#allocation108_spill] sm:$0xff] %v6147_v57  ;;  %v1573_v51 = vadd.f32 %v5681_v24, %v1443_v10  ;;  %v2135_v33 = vmax.f32 %v2133_v58, %v2134_v16  ;;  %v1581_v49 = vadd.f32 %v5681_v24, %v6157_v5 }
 0x345   : > { %v6124_v27 = vpop.permute.xlu2 %2861  ;;  %4409 = vpow2.f32 %v2487_v14  ;;  %v6155_v15 = vpop.eup %4403  ;;  %v3676_v45 = vsel %vm2044_vm1, %v6130_v39, 0.0  ;;  %v1701_v14 = vld [vmem:[%s5012_s16 + $0x148] sm:$0xff]  ;;  %vm1836_vm3 = vcmp.gt.f32.partialorder %v1708_v34, 0.5 }
 0x346   : > { %v3671_v0 = vadd.f32 %v3670_v21, %v3669_v38  ;;  %v1709_v21 = vld [vmem:[%s5012_s16 + $0x188] sm:$0xff]  ;;  %v1580_v38 = vadd.f32 %v5681_v24, %v6159_v36  ;;  %vm1829_vm0 = vcmp.gt.f32.partialorder %v1701_v14, 0.5  ;;  %v3674_v32 = vsel %vm2044_vm1, %v6155_v15, 0.0  ;;  %v6179_v47 = vpop.eup %4405 }
 0x347   : > { %vm1837_vm2 = vcmp.gt.f32.partialorder %v1709_v21, 0.5  ;;  %v6181_v58 = vsel %vm1829_vm0, %v1573_v51, -100000.0  ;;  %v6187_v59 = vpop.eup %4407  ;;  %v2493_v21 = vmul.f32 1.442695, %v2353_v19  ;;  %v6207_v19 = vsel %vm2044_vm1, %v6147_v57, -inf }
 0x348   : > { %v6185_v16 = vsel %vm1836_vm3, %v1580_v38, -100000.0 }
 0x349   : > { %2927 = vrot.lane.b32.xlu1 %v5998_v46, %s4815_s4  ;;  %2925 = vrot.lane.b32.xlu0 %v5972_v35, %s4815_s4  ;;  %v3672_v46 = vsel %vm2044_vm1, %v6122_v22, 0.0  ;;  %v2491_v35 = vmul.f32 1.442695, %v2352_v3  ;;  %v6183_v3 = vsel %vm1837_vm2, %v1581_v49, -100000.0  ;;  %8524 = vst [vmem:[#allocation111_spill] sm:$0xff] %v6185_v16  ;;  %v2156_v14 = vsel %vm2044_vm1, %v6185_v16, -inf }
 0x34a   : > { %8523 = vst [vmem:[#allocation110_spill] sm:$0xff] %v6183_v3  ;;  %v3673_v55 = vadd.f32 %v3672_v46, %v3671_v0  ;;  %v2157_v34 = vsel %vm2044_vm1, %v6183_v3, -inf  ;;  %v6199_v0 = vsel %vm2044_vm1, %v6179_v47, 0.0  ;;  %v2140_v46 = vsel %vm2044_vm1, %v6142_v60, -inf  ;;  %v6221_v16 = vld [vmem:[#allocation2 + $0x3a0] sm:$0xff] }
 0x34b   : > { %2929 = vrot.lane.b32.xlu2 %v6070_v48, %s4815_s4  ;;  %v2136_v48 = vsel %vm2044_vm1, %v6181_v58, -inf  ;;  %v6195_v51 = vpop.eup %4409  ;;  %v2158_v6 = vmax.f32 %v2156_v14, %v2157_v34  ;;  %4411 = vpow2.f32 %v2491_v35  ;;  %v1446_v34 = vld [vmem:[#allocation2 + $0xb0] sm:$0xff]  ;;  %v6219_v14 = vld [vmem:[#allocation2 + $0x208] sm:$0xff]  ;;  %v3680_v3 = vsel %vm2044_vm1, %v6187_v59, 0.0 }
 0x34c   : > { %v2137_v49 = vmax.f32 %v2135_v33, %v2136_v48  ;;  %v3675_v38 = vadd.f32 %v3674_v32, %v3673_v55  ;;  %v6211_v33 = vsel %vm2044_vm1, %v6151_v26, -inf  ;;  %v2495_v32 = vmul.f32 1.442695, %v2354_v43 }
 0x34d   : > { %v2864_v54 = vpop.permute.xlu2 %2863  ;;  %v3241_v48 = vmul.f32 %v6081_v50, %v6124_v27  ;;  %4413 = vpow2.f32 %v2493_v21  ;;  %v1584_v43 = vadd.f32 %v5681_v24, %v6219_v14  ;;  %v1712_v27 = vld [vmem:[%s5012_s16 + $0x1a0] sm:$0xff]  ;;  %v1583_v50 = vadd.f32 %v5681_v24, %v6221_v16 }
 0x34e   : > { %v2139_v55 = vmax.f32 %v2137_v49, %v2138_v28  ;;  %v3677_v35 = vadd.f32 %v3676_v45, %v3675_v38  ;;  %v1576_v28 = vadd.f32 %v5681_v24, %v1446_v34  ;;  %v1704_v45 = vld [vmem:[%s5012_s16 + $0x160] sm:$0xff]  ;;  %v1711_v38 = vld [vmem:[%s5012_s16 + $0x198] sm:$0xff]  ;;  %vm1840_vm5 = vcmp.gt.f32.partialorder %v1712_v27, 0.5 }
 0x34f   : > { %vm1832_vm4 = vcmp.gt.f32.partialorder %v1704_v45, 0.5  ;;  %vm1839_vm6 = vcmp.gt.f32.partialorder %v1711_v38, 0.5  ;;  %4415 = vpow2.f32 %v2495_v32  ;;  %v6262_v38 = vld [vmem:[#allocation2 + $0x2f0] sm:$0xff] }
 0x350   : > { %v2141_v49 = vmax.f32 %v2139_v55, %v2140_v46  ;;  %v6242_v46 = vsel %vm1839_vm6, %v1583_v50, -100000.0  ;;  %v6245_v55 = vsel %vm2044_vm1, %v3241_v48, 0.0  ;;  %v6260_v50 = vld [vmem:[#allocation2 + $0x10] sm:$0xff] }
 0x351   : > { %2933 = vrot.lane.b32.xlu1 %v6013_v11, %s4815_s4  ;;  %2931 = vrot.lane.b32.xlu0 %v6027_v9, %s4815_s4  ;;  %v3678_v11 = vsel %vm2044_vm1, %v6195_v51, 0.0  ;;  %v2356_v9 = vsub.f32 %v5818_v31, %v5953_v61  ;;  %v6236_v26 = vpop.eup %4411  ;;  %v6238_v31 = vsel %vm1832_vm4, %v1576_v28, -100000.0  ;;  %v6240_v61 = vsel %vm1840_vm5, %v1584_v43, -100000.0  ;;  %8527 = vst [vmem:[#allocation114_spill] sm:$0xff] %v6242_v46 }
 0x352   : > { %v3679_v21 = vadd.f32 %v3678_v11, %v3677_v35  ;;  %8525 = vst [vmem:[#allocation112_spill] sm:$0xff] %v6238_v31  ;;  %v2163_v45 = vsel %vm2044_vm1, %v6240_v61, -inf  ;;  %v2161_v35 = vsel %vm2044_vm1, %v6242_v46, -inf  ;;  %v3242_v11 = vmul.f32 %v6106_v41, %v2864_v54  ;;  %v6264_v46 = vld [vmem:[#allocation2 + $0x88] sm:$0xff] }
 0x353   : > { %2935 = vrot.lane.b32.xlu2 %v1443_v10, %s4815_s4  ;;  %8526 = vst [vmem:[#allocation113_spill] sm:$0xff] %v6240_v61  ;;  %v2142_v10 = vsel %vm2044_vm1, %v6238_v31, -inf  ;;  %v2160_v43 = vmax.f32 %v2158_v6, %v2163_v45  ;;  %v6254_v32 = vpop.eup %4413  ;;  %v3682_v48 = vsel %vm2044_vm1, %v6236_v26, 0.0  ;;  %v2358_v6 = vsub.f32 %v5814_v20, %v6040_v8  ;;  %v1715_v45 = vld [vmem:[%s5012_s16 + $0x1b8] sm:$0xff]  ;;  %v1714_v61 = vld [vmem:[%s5012_s16 + $0x1b0] sm:$0xff] }
 0x354   : > { %v2143_v28 = vmax.f32 %v2141_v49, %v2142_v10  ;;  %v3681_v27 = vadd.f32 %v3680_v3, %v3679_v21  ;;  %v2357_v54 = vsub.f32 %v5789_v12, %v6040_v8  ;;  %v2499_v41 = vmul.f32 1.442695, %v2356_v9  ;;  %v1707_v10 = vld [vmem:[%s5012_s16 + $0x178] sm:$0xff] }
 0x355   : > { %v2870_v57 = vpop.permute.xlu2 %2869  ;;  %v2162_v49 = vmax.f32 %v2160_v43, %v2161_v35  ;;  %v1579_v21 = vadd.f32 %v5681_v24, %v6260_v50  ;;  %vm1835_vm7 = vcmp.gt.f32.partialorder %v1707_v10, 0.5  ;;  %v1587_v12 = vadd.f32 %v5681_v24, %v6262_v38 }
 0x356   : > { %v2145_v3 = vmax.f32 %v2143_v28, %v6211_v33  ;;  %vm1843_vm8 = vcmp.gt.f32.partialorder %v1715_v45, 0.5  ;;  %v1586_v20 = vadd.f32 %v5681_v24, %v6264_v46  ;;  %vm1842_vm9 = vcmp.gt.f32.partialorder %v1714_v61, 0.5 }
 0x357   : > { %v3683_v9 = vadd.f32 %v3682_v48, %v3681_v27  ;;  %v6291_v28 = vsel %vm1843_vm8, %v1587_v12, -100000.0  ;;  %v3684_v10 = vsel %vm2044_vm1, %v6254_v32, 0.0  ;;  %v6298_v45 = vsel %vm2044_vm1, %v3242_v11, 0.0 }
 0x358   : > { %v2147_v33 = vmax.f32 %v2145_v3, %v6207_v19  ;;  %8528 = vst [vmem:[#allocation115_spill] sm:$0xff] %v6291_v28  ;;  %v6293_v43 = vsel %vm1842_vm9, %v1586_v20, -100000.0  ;;  %v2169_v19 = vsel %vm2044_vm1, %v6291_v28, -inf  ;;  %v2503_v3 = vmul.f32 1.442695, %v2358_v6  ;;  %v6315_v6 = vld [vmem:[#allocation2 + $0x350] sm:$0xff] }
 0x359   : > { %2939 = vrot.lane.b32.xlu1 %v6050_v44, %s4815_s4  ;;  %2937 = vrot.lane.b32.xlu0 %v6068_v18, %s4815_s4  ;;  %v3245_v44 = vmul.f32 %v6130_v39, %v2870_v57  ;;  %v6283_v18 = vpop.eup %4415  ;;  %v6285_v57 = vsel %vm1835_vm7, %v1579_v21, -100000.0  ;;  %8529 = vst [vmem:[#allocation116_spill] sm:$0xff] %v6293_v43  ;;  %v2164_v27 = vmax.f32 %v2162_v49, %v2169_v19  ;;  %4417 = vpow2.f32 %v2499_v41  ;;  %v6313_v19 = vld [vmem:[#allocation2 + $0x90] sm:$0xff]  ;;  %v6317_v41 = vld [vmem:[#allocation2 + $0x268] sm:$0xff] }
 0x35a   : > { %v2148_v35 = vsel %vm2044_vm1, %v6285_v57, -inf  ;;  %v3686_v48 = vsel %vm2044_vm1, %v6283_v18, 0.0  ;;  %4419 = vpow2.f32 %v2503_v3 }
 0x35b   : > { %v2858_v60 = vpop.permute.xlu1 %2857  ;;  %v2854_v39 = vpop.permute.xlu0 %2853  ;;  %2941 = vrot.lane.b32.xlu2 %v1446_v34, %s4815_s4  ;;  %v2149_v21 = vmax.f32 %v2147_v33, %v2148_v35  ;;  %v2167_v34 = vsel %vm2044_vm1, %v6293_v43, -inf  ;;  %v6308_v11 = vsel %vm2044_vm1, %v3245_v44, 0.0  ;;  %v3685_v33 = vadd.f32 %v3684_v10, %v3683_v9  ;;  %v1718_v9 = vld [vmem:[%s5012_s16 + $0x1d0] sm:$0xff]  ;;  %v1717_v10 = vld [vmem:[%s5012_s16 + $0x1c8] sm:$0xff] }
 0x35c   : > { %v3239_v12 = vmul.f32 %v6046_v42, %v2858_v60  ;;  %v3237_v35 = vmul.f32 %v6029_v53, %v2854_v39  ;;  %v2166_v49 = vmax.f32 %v2164_v27, %v2167_v34  ;;  %v2501_v42 = vmul.f32 1.442695, %v2357_v54  ;;  %v1710_v39 = vld [vmem:[%s5012_s16 + $0x190] sm:$0xff] }
 0x35d   : > { %v2876_v61 = vpop.permute.xlu2 %2875  ;;  %v2150_v20 = vrot.slane %v2149_v21, 4  ;;  %v2361_v60 = vsub.f32 %v5837_v13, %v6040_v8  ;;  %v1582_v53 = vadd.f32 %v5681_v24, %v6313_v19  ;;  %vm1838_vm10 = vcmp.gt.f32.partialorder %v1710_v39, 0.5 }
 0x35e   : > { %vm1846_vm11 = vcmp.gt.f32.partialorder %v1718_v9, 0.5  ;;  %v1589_v13 = vadd.f32 %v5681_v24, %v6317_v41  ;;  %vm1845_vm12 = vcmp.gt.f32.partialorder %v1717_v10, 0.5  ;;  %v3365_v10 = vsel %vm2044_vm1, %v3237_v35, 0.0 }
 0x35f   : > { %v2151_v44 = vmax.f32 %v2149_v21, %v2150_v20  ;;  %v3687_v21 = vadd.f32 %v3686_v48, %v3685_v33  ;;  %v6332_v27 = vsel %vm1838_vm10, %v1582_v53, -100000.0  ;;  %v6336_v43 = vpop.eup %4417  ;;  %v3368_v48 = vsel %vm2044_vm1, %v3239_v12, 0.0 }
 0x360   : > { %8530 = vst [vmem:[#allocation117_spill] sm:$0xff] %v6332_v27  ;;  %v2159_v3 = vsel %vm2044_vm1, %v6332_v27, -inf  ;;  %v6345_v9 = vsel %vm1845_vm12, %v1589_v13, -100000.0  ;;  %4421 = vpow2.f32 %v2501_v42  ;;  %v4420_v27 = vpop.eup %4419  ;;  %v3690_v12 = vsel %vm2044_vm1, %v6336_v43, 0.0 }
 0x361   : > { %2945 = vrot.lane.b32.xlu1 %v6102_v23, %s4815_s4  ;;  %2943 = vrot.lane.b32.xlu0 %v6113_v37, %s4815_s4  ;;  %v1590_v23 = vadd.f32 %v5681_v24, %v6315_v6  ;;  %v2152_v37 = vrot.slane %v2151_v44, 2  ;;  %v3689_v35 = vadd.f32 %v6134_v30, %v3687_v21 }
 0x363   : > { %v2860_v34 = vpop.permute.xlu1 %2859  ;;  %v2856_v54 = vpop.permute.xlu0 %2855  ;;  %v6334_v20 = vsel %vm1846_vm11, %v1590_v23, -100000.0  ;;  %2947 = vrot.lane.b32.xlu2 %v6260_v50, %s4815_s4  ;;  %v2153_v53 = vmax.f32 %v2151_v44, %v2152_v37  ;;  %v2168_v23 = vmax.f32 %v2166_v49, %v2159_v3  ;;  %v2173_v50 = vsel %vm2044_vm1, %v6345_v9, -inf }
 0x364   : > { %8531 = vst [vmem:[#allocation118_spill] sm:$0xff] %v6334_v20  ;;  %v3238_v28 = vmul.f32 %v6058_v4, %v2856_v54  ;;  %v2175_v39 = vsel %vm2044_vm1, %v6334_v20, -inf  ;;  %v3240_v33 = vmul.f32 %v6087_v52, %v2860_v34  ;;  %v3248_v52 = vmul.f32 %v6236_v26, %v2876_v61 }
 0x365   : > { %v2882_v54 = vpop.permute.xlu2 %2881  ;;  %v2154_v20 = vrot.slane %v2153_v53, 1  ;;  %v2170_v13 = vmax.f32 %v2168_v23, %v2175_v39  ;;  %v2360_v49 = vsub.f32 %v5805_v63, %v6040_v8  ;;  %v3691_v30 = vadd.f32 %v3690_v12, %v3689_v35  ;;  %v1455_v35 = vld [vmem:[#allocation2 + $0xd0] sm:$0xff] }
 0x366   : > { %v3366_v4 = vsel %vm2044_vm1, %v3238_v28, 0.0  ;;  %v2509_v28 = vmul.f32 1.442695, %v2361_v60  ;;  %v3370_v42 = vsel %vm2044_vm1, %v3240_v33, 0.0  ;;  %v3251_v26 = vmul.f32 %v6075_v1, %v2882_v54  ;;  %v6378_v3 = vpop.eup %4421 }
 0x367   : > { %v3367_v31 = vadd.f32 %v3366_v4, %v3365_v10  ;;  %v6364_v34 = vmax.f32 %v2153_v53, %v2154_v20  ;;  %v6366_v37 = vmax.f32 %v2170_v13, %v2173_v50  ;;  %v2507_v61 = vmul.f32 1.442695, %v2360_v49 }
 0x368   : > { %v2359_v63 = vsub.f32 %v5797_v17, %v6040_v8  ;;  %v2364_v20 = vsub.f32 %v5868_v2, %v6040_v8  ;;  %v3692_v1 = vrot.slane %v3691_v30, 4  ;;  %4423 = vpow2.f32 %v2509_v28 }
 0x369   : > { %2951 = vrot.lane.b32.xlu1 %v6157_v5, %s4815_s4  ;;  %v3369_v44 = vadd.f32 %v3368_v48, %v3367_v31  ;;  %2949 = vrot.lane.b32.xlu0 %v6159_v36, %s4815_s4  ;;  %v2388_v31 = vsub.f32 %v6285_v57, %v6364_v34  ;;  %v3699_v36 = vsel %vm2044_vm1, %v4420_v27, 0.0  ;;  %v3698_v53 = vsel %vm2044_vm1, %v6378_v3, 0.0 }
 0x36a   : > { %v2505_v17 = vmul.f32 1.442695, %v2359_v63  ;;  %4425 = vpow2.f32 %v2507_v61  ;;  %v6388_v2 = vsel %vm2044_vm1, %v3248_v52, 0.0  ;;  %v3700_v10 = vadd.f32 %v3699_v36, %v3698_v53 }
 0x36b   : > { %v2868_v5 = vpop.permute.xlu1 %2867  ;;  %v3371_v60 = vadd.f32 %v3370_v42, %v3369_v44  ;;  %v2866_v21 = vpop.permute.xlu0 %2865  ;;  %2953 = vrot.lane.b32.xlu2 %v6313_v19, %s4815_s4  ;;  %v2363_v50 = vsub.f32 %v5845_v7, %v6040_v8  ;;  %v2362_v13 = vsub.f32 %v5834_v56, %v6040_v8  ;;  %v2367_v12 = vsub.f32 %v5899_v29, %v6040_v8 }
 0x36c   : > { %v3243_v39 = vmul.f32 %v6122_v22, %v2866_v21  ;;  %v3244_v48 = vmul.f32 %v6155_v15, %v2868_v5  ;;  %v3693_v22 = vadd.f32 %v3692_v1, %v3691_v30  ;;  %4427 = vpow2.f32 %v2505_v17 }
 0x36d   : > { %v3373_v33 = vadd.f32 %v6245_v55, %v3371_v60  ;;  %v2888_v23 = vpop.permute.xlu2 %2887  ;;  %v2515_v15 = vmul.f32 1.442695, %v2364_v20  ;;  %v2513_v42 = vmul.f32 1.442695, %v2363_v50  ;;  %v2511_v29 = vmul.f32 1.442695, %v2362_v13 }
 0x36e   : > { %v3376_v4 = vsel %vm2044_vm1, %v3243_v39, 0.0  ;;  %v3254_v54 = vmul.f32 %v4420_v27, %v2888_v23  ;;  %v3694_v55 = vrot.slane %v3693_v22, 2  ;;  %v3378_v52 = vsel %vm2044_vm1, %v3244_v48, 0.0  ;;  %v4424_v28 = vpop.eup %4423  ;;  %v6439_v23 = vld [vmem:[#allocation2 + $0x30] sm:$0xff]  ;;  %v1721_v50 = vld [vmem:[%s5012_s16 + $0x1e8] sm:$0xff] }
 0x36f   : > { %v3375_v19 = vadd.f32 %v6298_v45, %v3373_v33  ;;  %v6404_v27 = vsel %vm2044_vm1, %v3251_v26, 0.0  ;;  %v2521_v61 = vmul.f32 1.442695, %v2367_v12  ;;  %v2366_v26 = vsub.f32 %v5874_v40, %v6040_v8  ;;  %v1720_v12 = vld [vmem:[%s5012_s16 + $0x1e0] sm:$0xff] }
 0x370   : > { %v6410_v49 = vsel %vm2044_vm1, %v3254_v54, 0.0  ;;  %v3695_v56 = vadd.f32 %v3694_v55, %v3693_v22  ;;  %v6412_v44 = vpop.eup %4425  ;;  %4429 = vpow2.f32 %v2515_v15  ;;  %v2365_v36 = vsub.f32 %v5865_v62, %v6040_v8  ;;  %v1713_v55 = vld [vmem:[%s5012_s16 + $0x1a8] sm:$0xff] }
 0x371   : > { %2957 = vrot.lane.b32.xlu1 %v6219_v14, %s4815_s4  ;;  %v3377_v45 = vadd.f32 %v3376_v4, %v3375_v19  ;;  %2955 = vrot.lane.b32.xlu0 %v6221_v16, %s4815_s4  ;;  %v6407_v14 = vstv %s6368_s3  ;;  %4431 = vpow2.f32 %v2513_v42  ;;  %v1458_v19 = vld [vmem:[#allocation2 + $0x358] sm:$0xff]  ;;  %v6443_v4 = vmul.f32 1.442695, %v2366_v26 }
 0x372   : > { %v6417_v63 = vpop.eup %4427  ;;  %v3696_v21 = vrot.slane %v3695_v56, 1  ;;  %4433 = vpow2.f32 %v2511_v29  ;;  %v1585_v15 = vadd.f32 %v5681_v24, %v1455_v35  ;;  %vm1841_vm14 = vcmp.gt.f32.partialorder %v1713_v55, 0.5  ;;  %v6498_v55 = vld [vmem:[#allocation2 + $0x130] sm:$0xff] }
 0x373   : > { %v2874_v7 = vpop.permute.xlu1 %2873  ;;  %v3379_v5 = vadd.f32 %v3378_v52, %v3377_v45  ;;  %v2872_v16 = vpop.permute.xlu0 %2871  ;;  %2959 = vrot.lane.b32.xlu2 %v1455_v35, %s4815_s4  ;;  %v3701_v39 = vsel %vm2044_vm1, %v6417_v63, 0.0  ;;  %4435 = vpow2.f32 %v2521_v61  ;;  %vm1849_vm15 = vcmp.gt.f32.partialorder %v1721_v50, 0.5  ;;  %v1723_v50 = vld [vmem:[%s5012_s16 + $0x1f8] sm:$0xff] }
 0x374   : > { %v3247_v30 = vmul.f32 %v6187_v59, %v2874_v7  ;;  %v3246_v60 = vmul.f32 %v6195_v51, %v2872_v16  ;;  %v6425_v59 = vsel %vm2044_vm1, %v4424_v28, 0.0  ;;  %v6430_v1 = vadd.f32 %v3696_v21, %v3695_v56 }
 0x375   : > { %v3381_v20 = vadd.f32 %v6308_v11, %v3379_v5  ;;  %v2894_v51 = vpop.permute.xlu2 %2893  ;;  %v3702_v17 = vadd.f32 %v3701_v39, %v3700_v10  ;;  %v3703_v11 = vsel %vm2044_vm1, %v6412_v44, 0.0  ;;  %v6441_v10 = vld [vmem:[#allocation2 + $0x1d8] sm:$0xff]  ;;  %v6464_v42 = vsel %vm1841_vm14, %v1585_v15, -100000.0  ;;  %v1724_v39 = vld [vmem:[%s5012_s16 + $0x200] sm:$0xff] }
 0x376   : > { %v3382_v40 = vsel %vm2044_vm1, %v3246_v60, 0.0  ;;  %v3384_v48 = vsel %vm2044_vm1, %v3247_v30, 0.0  ;;  %4437 = vrcp.f32 %v6430_v1  ;;  %v3968_v53 = vand.u32 2147483648, %v6430_v1  ;;  %v6455_v52 = vpop.eup %4429 }
 0x377   : > { %v3383_v33 = vadd.f32 %v3382_v40, %v3381_v20  ;;  %v3257_v22 = vmul.f32 %v4424_v28, %v2894_v51  ;;  %v1592_v13 = vadd.f32 %v5681_v24, %v6441_v10  ;;  %vm3962_vm13 = vweird.f32 %v6430_v1 }
 0x378   : > { %v3966_v28 = vand.u32 2147483647, %v6430_v1  ;;  %v6462_v56 = vor.u32 1.1754944e-38, %v3968_v53  ;;  %v2165_v16 = vsel %vm2044_vm1, %v6464_v42, -inf  ;;  %vm1848_vm0 = vcmp.gt.f32.partialorder %v1720_v12, 0.5 }
 0x379   : > { %2963 = vrot.lane.b32.xlu1 %v6262_v38, %s4815_s4  ;;  %v3385_v54 = vadd.f32 %v3384_v48, %v3383_v33  ;;  %2961 = vrot.lane.b32.xlu0 %v6264_v46, %s4815_s4  ;;  %v1593_v38 = vadd.f32 %v5681_v24, %v6439_v23  ;;  %v6459_v46 = vpop.eup %4431  ;;  %v2174_v21 = vmax.f32 %v6366_v37, %v2165_v16  ;;  %v6481_v20 = vsel %vm1848_vm0, %v1592_v13, -100000.0 }
 0x37a   : > { %v6468_v5 = vpop.eup %4433  ;;  %v2179_v48 = vsel %vm2044_vm1, %v6481_v20, -inf  ;;  %v3704_v33 = vadd.f32 %v3703_v11, %v3702_v17  ;;  %v1588_v53 = vadd.f32 %v5681_v24, %v1458_v19  ;;  %vm6494_vm3 = vcmp.eq.f32.partialorder %v3966_v28, 8.507059e+37 }
 0x37b   : > { %v2880_v45 = vpop.permute.xlu1 %2879  ;;  %v2878_v7 = vpop.permute.xlu0 %2877  ;;  %v6466_v29 = vsel %vm1849_vm15, %v1593_v38, -100000.0  ;;  %2965 = vrot.lane.b32.xlu2 %v1458_v19, %s4815_s4  ;;  %v3387_v60 = vadd.f32 %v6388_v2, %v3385_v54  ;;  %v6500_v38 = vld [vmem:[#allocation2 + $0x2a8] sm:$0xff]  ;;  %v1596_v17 = vadd.f32 %v5681_v24, %v6498_v55  ;;  %vm1852_vm5 = vcmp.gt.f32.partialorder %v1724_v39, 0.5 }
 0x37c   : > { %v3250_v35 = vmul.f32 %v6283_v18, %v2880_v45  ;;  %v3249_v30 = vmul.f32 %v6254_v32, %v2878_v7  ;;  %v2181_v61 = vsel %vm2044_vm1, %v6466_v29, -inf  ;;  %v6476_v18 = vpop.eup %4435  ;;  %v1716_v32 = vld [vmem:[%s5012_s16 + $0x1c0] sm:$0xff]  ;;  %v1595_v11 = vadd.f32 %v5681_v24, %v6500_v38 }
 0x37d   : > { %v6485_v40 = vpop.eup %4437  ;;  %v2176_v54 = vmax.f32 %v2174_v21, %v2181_v61  ;;  %vm1844_vm4 = vcmp.gt.f32.partialorder %v1716_v32, 0.5  ;;  %v2900_v19 = vpop.permute.xlu2 %2899  ;;  %v6518_v16 = vsel %vm1852_vm5, %v1596_v17, -100000.0  ;;  %vm1851_vm6 = vcmp.gt.f32.partialorder %v1723_v50, 0.5  ;;  %v1727_v50 = vld [vmem:[%s5012_s16 + $0x218] sm:$0xff] }
 0x37e   : > { %v3390_v26 = vsel %vm2044_vm1, %v3250_v35, 0.0  ;;  %v3388_v51 = vsel %vm2044_vm1, %v3249_v30, 0.0  ;;  %v3958_v2 = vmul.f32 %v6485_v40, %v6430_v1  ;;  %vm3963_vm2 = vweird.f32 %v6485_v40  ;;  %v1461_v35 = vld [vmem:[#allocation2 + $0x188] sm:$0xff] }
 0x37f   : > { %v3389_v15 = vadd.f32 %v3388_v51, %v3387_v60  ;;  %v2178_v45 = vmax.f32 %v2176_v54, %v2179_v48  ;;  %v6511_v28 = vsel %vm1844_vm4, %v1588_v53, -100000.0  ;;  %v6524_v21 = vsel %vm2044_vm1, %v6455_v52, 0.0  ;;  %vm6532_vm7 = vmor %vm3962_vm13, %vm3963_vm2  ;;  %v1719_v53 = vld [vmem:[%s5012_s16 + $0x1d8] sm:$0xff] }
 0x380   : > { %v3959_v12 = vsub.f32 1.0, %v3958_v2  ;;  %v2171_v30 = vsel %vm2044_vm1, %v6511_v28, -inf  ;;  %v3260_v51 = vmul.f32 %v6455_v52, %v2900_v19  ;;  %v3709_v52 = vsel %vm2044_vm1, %v6459_v46, 0.0 }
 0x381   : > { %2969 = vrot.lane.b32.xlu1 %v6315_v6, %s4815_s4  ;;  %v3391_v13 = vadd.f32 %v3390_v26, %v3389_v15  ;;  %2967 = vrot.lane.b32.xlu0 %v6317_v41, %s4815_s4  ;;  %v6514_v6 = vsel %vm2044_vm1, %v3257_v22, 0.0  ;;  %v2180_v60 = vmax.f32 %v2178_v45, %v2171_v30  ;;  %v3706_v19 = vadd.f32 %v6425_v59, %v3704_v33  ;;  %v6569_v30 = vld [vmem:[#allocation2 + $0x318] sm:$0xff] }
 0x382   : > { %v3960_v41 = vmul.f32 %v6485_v40, %v3959_v12  ;;  %v6558_v12 = vld [vmem:[#allocation2 + $0x220] sm:$0xff]  ;;  %v6564_v45 = vsel %vm2044_vm1, %v3260_v51, 0.0  ;;  %vm1847_vm8 = vcmp.gt.f32.partialorder %v1719_v53, 0.5  ;;  %vm1855_vm9 = vcmp.gt.f32.partialorder %v1727_v50, 0.5  ;;  %v1722_v50 = vld [vmem:[%s5012_s16 + $0x1f0] sm:$0xff] }
 0x383   : > { %v2886_v7 = vpop.permute.xlu1 %2885  ;;  %v2884_v26 = vpop.permute.xlu0 %2883  ;;  %v3393_v32 = vadd.f32 %v6404_v27, %v3391_v13  ;;  %2971 = vrot.lane.b32.xlu2 %v1461_v35, %s4815_s4  ;;  %v2193_v27 = vsel %vm2044_vm1, %v6518_v16, -inf  ;;  %v3707_v13 = vsel %vm2044_vm1, %v6468_v5, 0.0  ;;  %vm4087_vm11 = vcmask 0  }
 0x384   : > { %v3253_v61 = vmul.f32 %v6378_v3, %v2886_v7  ;;  %v3252_v22 = vmul.f32 %v6336_v43, %v2884_v26  ;;  %v6536_v3 = vsel %vm1851_vm6, %v1595_v11, -100000.0  ;;  %v3961_v43 = vadd.f32 %v6485_v40, %v3960_v41 }
 0x385   : > { %v2185_v1 = vsel %vm2044_vm1, %v6536_v3, -inf  ;;  %v1591_v7 = vadd.f32 %v5681_v24, %v1461_v35  ;;  %v3708_v33 = vadd.f32 %v3707_v13, %v3706_v19  ;;  %4439 = vpow2.f32 %v6443_v4  ;;  %v6611_v4 = vld [vmem:[#allocation2 + $0xe0] sm:$0xff] }
 0x386   : > { %v3402_v48 = vsel %vm2044_vm1, %v3253_v61, 0.0  ;;  %v3394_v2 = vsel %vm2044_vm1, %v3252_v22, 0.0  ;;  %v2182_v54 = vmax.f32 %v2180_v60, %v2185_v1  ;;  %v3965_v11 = vsel %vm6532_vm7, %v6485_v40, %v3961_v43  ;;  %v1464_v61 = vld [vmem:[#allocation2 + $0x140] sm:$0xff]  ;;  %v2906_v22 = vpop.permute.xlu2 %2905 }
 0x387   : > { %v3404_v15 = vadd.f32 %v6410_v49, %v3402_v48  ;;  %v3395_v17 = vadd.f32 %v3394_v2, %v3393_v32  ;;  %v1726_v49 = vld [vmem:[%s5012_s16 + $0x210] sm:$0xff]  ;;  %v1599_v40 = vadd.f32 %v5681_v24, %v6558_v12  ;;  %v3970_v35 = vsel %vm6494_vm3, %v6462_v56, %v3965_v11 }
 0x388   : > { %v6578_v41 = vsel %vm1847_vm8, %v1591_v7, -100000.0  ;;  %vm1854_vm10 = vcmp.gt.f32.partialorder %v1726_v49, 0.5  ;;  %v3710_v51 = vadd.f32 %v3709_v52, %v3708_v33  ;;  %v6595_v52 = vsel %vm2044_vm1, %v6476_v18, 0.0  ;;  %v1729_v7 = vld [vmem:[%s5012_s16 + $0x228] sm:$0xff] }
 0x389   : > { %2975 = vrot.lane.b32.xlu1 %v6439_v23, %s4815_s4  ;;  %v3396_v59 = vrot.slane %v3395_v17, 4  ;;  %2973 = vrot.lane.b32.xlu0 %v6441_v10, %s4815_s4  ;;  %v1598_v23 = vadd.f32 %v5681_v24, %v6569_v30  ;;  %v6580_v60 = vsel %vm1855_vm9, %v1599_v40, -100000.0  ;;  %v2177_v48 = vsel %vm2044_vm1, %v6578_v41, -inf }
 0x38a   : > { %v2184_v56 = vmax.f32 %v2182_v54, %v2177_v48  ;;  %v2198_v43 = vsel %vm2044_vm1, %v6580_v60, -inf  ;;  %v3263_v54 = vmul.f32 %v6476_v18, %v2906_v22  ;;  %v3712_v49 = vadd.f32 %v6524_v21, %v3710_v51 }
 0x38b   : > { %v2892_v26 = vpop.permute.xlu1 %2891  ;;  %v3397_v32 = vadd.f32 %v3396_v59, %v3395_v17  ;;  %v2890_v39 = vpop.permute.xlu0 %2889  ;;  %v6588_v1 = vsel %vm1854_vm10, %v1598_v23, -100000.0  ;;  %2977 = vrot.lane.b32.xlu2 %v1464_v61, %s4815_s4  ;;  %v2195_v2 = vmax.f32 %v2193_v27, %v2198_v43  ;;  %v2517_v17 = vmul.f32 1.442695, %v2365_v36  ;;  %v1730_v27 = vld [vmem:[%s5012_s16 + $0x230] sm:$0xff]  ;;  %v1467_v59 = vld [vmem:[#allocation2 + $0x200] sm:$0xff] }
 0x38c   : > { %v3256_v10 = vmul.f32 %v6412_v44, %v2892_v26  ;;  %v3255_v37 = vmul.f32 %v6417_v63, %v2890_v39  ;;  %v2196_v44 = vsel %vm2044_vm1, %v6588_v1, -inf  ;;  %v1594_v18 = vadd.f32 %v5681_v24, %v1464_v61  ;;  %v4440_v39 = vpop.eup %4439 }
 0x38d   : > { %v3398_v53 = vrot.slane %v3397_v32, 2  ;;  %v2197_v13 = vmax.f32 %v2195_v2, %v2196_v44  ;;  %4441 = vpow2.f32 %v2517_v17  ;;  %vm1850_vm12 = vcmp.gt.f32.partialorder %v1722_v50, 0.5  ;;  %v1725_v17 = vld [vmem:[%s5012_s16 + $0x208] sm:$0xff] }
 0x38e   : > { %v3405_v63 = vsel %vm2044_vm1, %v3255_v37, 0.0  ;;  %v3407_v40 = vsel %vm2044_vm1, %v3256_v10, 0.0  ;;  %v1602_v21 = vadd.f32 %v5681_v24, %v6611_v4  ;;  %vm1858_vm13 = vcmp.gt.f32.partialorder %v1730_v27, 0.5 }
 0x38f   : > { %v3399_v11 = vadd.f32 %v3398_v53, %v3397_v32  ;;  %v3406_v19 = vadd.f32 %v3405_v63, %v3404_v15  ;;  %v6617_v15 = vld [vmem:[#allocation2 + $0x300] sm:$0xff]  ;;  %v6622_v23 = vsel %vm1850_vm12, %v1594_v18, -100000.0  ;;  %vm1857_vm14 = vcmp.gt.f32.partialorder %v1729_v7, 0.5  ;;  %v2912_v53 = vpop.permute.xlu2 %2911 }
 0x390   : > { %v1601_v61 = vadd.f32 %v5681_v24, %v6617_v15  ;;  %v2183_v10 = vsel %vm2044_vm1, %v6622_v23, -inf  ;;  %v6632_v37 = vsel %vm1858_vm13, %v1602_v21, -100000.0  ;;  %v6641_v44 = vmul.f32 %v6179_v47, %v2912_v53 }
 0x391   : > { %2981 = vrot.lane.b32.xlu1 %v6498_v55, %s4815_s4  ;;  %v3400_v62 = vrot.slane %v3399_v11, 1  ;;  %v3408_v36 = vadd.f32 %v3407_v40, %v3406_v19  ;;  %2979 = vrot.lane.b32.xlu0 %v6500_v38, %s4815_s4  ;;  %v6620_v55 = vsel %vm2044_vm1, %v3263_v54, 0.0  ;;  %v2186_v48 = vmax.f32 %v2184_v56, %v2183_v10 }
 0x392   : > { %v6634_v43 = vsel %vm1857_vm14, %v1601_v61, -100000.0  ;;  %v2204_v2 = vsel %vm2044_vm1, %v6632_v37, -inf  ;;  %v1597_v21 = vadd.f32 %v5681_v24, %v1467_v59  ;;  %vm1853_vm15 = vcmp.gt.f32.partialorder %v1725_v17, 0.5 }
 0x393   : > { %v2898_v33 = vpop.permute.xlu1 %2897  ;;  %v3401_v26 = vadd.f32 %v3400_v62, %v3399_v11  ;;  %v3410_v22 = vadd.f32 %v6514_v6, %v3408_v36  ;;  %v2896_v32 = vpop.permute.xlu0 %2895  ;;  %2983 = vrot.lane.b32.xlu2 %v1467_v59, %s4815_s4  ;;  %v2187_v50 = vrot.slane %v2186_v48, 4  ;;  %v2199_v63 = vmax.f32 %v2197_v13, %v2204_v2  ;;  %v8536_v62 = vld [vmem:[#allocation94_spill] sm:$0xff] }
 0x394   : > { %v3259_v38 = vmul.f32 %v6459_v46, %v2898_v33  ;;  %v3258_v51 = vmul.f32 %v6468_v5, %v2896_v32  ;;  %v4442_v5 = vpop.eup %4441  ;;  %v2202_v54 = vsel %vm2044_vm1, %v6634_v43, -inf  ;;  %v3715_v11 = vsel %vm2044_vm1, %v4440_v39, 0.0 }
 0x395   : > { %v3971_v46 = vmul.f32 %v3970_v35, %v3401_v26  ;;  %v3713_v19 = vsel %vm2044_vm1, %v4442_v5, 0.0  ;;  %v2188_v7 = vmax.f32 %v2186_v48, %v2187_v50  ;;  %v2201_v40 = vmax.f32 %v2199_v63, %v2202_v54  ;;  %v1474_v63 = vld [vmem:[#allocation2 + $0x328] sm:$0xff] }
 0x396   : > { %v3413_v6 = vsel %vm2044_vm1, %v3259_v38, 0.0  ;;  %v3411_v56 = vsel %vm2044_vm1, %v3258_v51, 0.0  ;;  %v3714_v47 = vadd.f32 %v3713_v19, %v3712_v49  ;;  %v2369_v13 = vsub.f32 %v5896_v25, %v6040_v8  ;;  %v1733_v38 = vld [vmem:[%s5012_s16 + $0x248] sm:$0xff] }
 0x397   : > { %v4079_v35 = vadd.f32 %v6407_v14, %v3971_v46  ;;  %v3412_v27 = vadd.f32 %v3411_v56, %v3410_v22  ;;  %v2368_v36 = vsub.f32 %v8536_v62, %v6040_v8  ;;  %v2189_v61 = vrot.slane %v2188_v7, 2  ;;  %v1732_v46 = vld [vmem:[%s5012_s16 + $0x240] sm:$0xff]  ;;  %v8538_v19 = vld [vmem:[#allocation96_spill] sm:$0xff]  ;;  %v8540_v62 = vld [vmem:[#allocation101_spill] sm:$0xff] }
 0x398   : > { %v3716_v33 = vadd.f32 %v3715_v11, %v3714_v47  ;;  %v2525_v26 = vmul.f32 1.442695, %v2369_v13  ;;  %v6667_v51 = vsel %vm1853_vm15, %v1597_v21, -100000.0  ;;  %vm1861_vm0 = vcmp.gt.f32.partialorder %v1733_v38, 0.5  ;;  %v8539_v13 = vld [vmem:[#allocation95_spill] sm:$0xff] }
 0x399   : > { %2987 = vrot.lane.b32.xlu1 %v6558_v12, %s4815_s4  ;;  %4088 = vst.msk [vmem:[%s5007_s11] sm:$0x1] %vm4087_vm11, %v4079_v35  ;;  %v3414_v18 = vadd.f32 %v3413_v6, %v3412_v27  ;;  %2985 = vrot.lane.b32.xlu0 %v6569_v30, %s4815_s4  ;;  %v6661_v12 = vld [vmem:[#allocation2 + $0x260] sm:$0xff]  ;;  %v2523_v10 = vmul.f32 1.442695, %v2368_v36  ;;  %v2190_v48 = vmax.f32 %v2188_v7, %v2189_v61  ;;  %v2194_v2 = vsel %vm2044_vm1, %v6667_v51, -inf }
 0x39a   : > { %v1605_v25 = vadd.f32 %v5681_v24, %v6661_v12  ;;  %4443 = vpow2.f32 %v2525_v26  ;;  %v3718_v53 = vadd.f32 %v6595_v52, %v3716_v33  ;;  %v2203_v56 = vmax.f32 %v2201_v40, %v2194_v2  ;;  %v8537_v27 = vld [vmem:[#allocation99_spill] sm:$0xff] }
 0x39b   : > { %v2904_v49 = vpop.permute.xlu1 %2903  ;;  %v3416_v30 = vadd.f32 %v6564_v45, %v3414_v18  ;;  %v2902_v32 = vpop.permute.xlu0 %2901  ;;  %4445 = vpow2.f32 %v2523_v10  ;;  %v2191_v45 = vrot.slane %v2190_v48, 1  ;;  %v1604_v52 = vadd.f32 %v5681_v24, %v1474_v63 }
 0x39c   : > { %v3262_v22 = vmul.f32 %v4440_v39, %v2904_v49  ;;  %v3261_v59 = vmul.f32 %v4442_v5, %v2902_v32  ;;  %v6675_v50 = vsel %vm1861_vm0, %v1605_v25, -100000.0  ;;  %vm1860_vm2 = vcmp.gt.f32.partialorder %v1732_v46, 0.5 }
 0x39d   : > { %v2210_v54 = vsel %vm2044_vm1, %v6675_v50, -inf  ;;  %v6680_v17 = vmax.f32 %v2190_v48, %v2191_v45  ;;  %v2373_v11 = vsub.f32 %v8537_v27, %v6364_v34  ;;  %v2372_v47 = vsub.f32 %v8538_v19, %v6040_v8 }
 0x39e   : > { %v3419_v6 = vsel %vm2044_vm1, %v3262_v22, 0.0  ;;  %v3417_v39 = vsel %vm2044_vm1, %v3261_v59, 0.0  ;;  %v6684_v35 = vmax.f32 %v2203_v56, %v2210_v54  ;;  %v6692_v40 = vsel %vm1860_vm2, %v1604_v52, -100000.0  ;;  %v8542_v54 = vld [vmem:[#allocation97_spill] sm:$0xff] }
 0x39f   : > { %v3418_v5 = vadd.f32 %v3417_v39, %v3416_v30  ;;  %v2371_v18 = vsub.f32 %v8539_v13, %v6040_v8  ;;  %v2403_v21 = vsub.f32 %v6622_v23, %v6680_v17  ;;  %v6702_v33 = vsel %vm2044_vm1, %v6692_v40, -inf  ;;  %v6710_v23 = vld [vmem:[#allocation2 + $0x70] sm:$0xff]  ;;  %v8541_v39 = vld [vmem:[#allocation98_spill] sm:$0xff] }
 0x3a0   : > { %v4444_v36 = vpop.eup %4443  ;;  %v2533_v61 = vmul.f32 1.442695, %v2373_v11  ;;  %v2531_v26 = vmul.f32 1.442695, %v2372_v47  ;;  %v2563_v25 = vmul.f32 1.442695, %v2388_v31  ;;  %v2207_v30 = vmax.f32 %v6684_v35, %v6702_v33  ;;  %2989 = vrot.lane.b32.xlu2 %v6710_v23, %s4815_s4 }
 0x3a1   : > { %2993 = vrot.lane.b32.xlu1 %v6611_v4, %s4815_s4  ;;  %v3420_v7 = vadd.f32 %v3419_v6, %v3418_v5  ;;  %2991 = vrot.lane.b32.xlu0 %v6617_v15, %s4815_s4  ;;  %v2376_v4 = vsub.f32 %v8540_v62, %v6364_v34  ;;  %v4446_v15 = vpop.eup %4445  ;;  %v3721_v32 = vsel %vm2044_vm1, %v4444_v36, 0.0  ;;  %v3427_v57 = vsel %vm2044_vm1, %v6641_v44, 0.0  ;;  %v2918_v6 = vpop.permute.xlu2 %2917  ;;  %v8544_v11 = vld [vmem:[#allocation102_spill] sm:$0xff]  ;;  %v6810_v35 = vld [vmem:[#allocation2 + $0x40] sm:$0xff] }
 0x3a2   : > { %v3719_v10 = vsel %vm2044_vm1, %v4446_v15, 0.0  ;;  %4447 = vpow2.f32 %v2533_v61  ;;  %v2375_v45 = vsub.f32 %v8541_v39, %v6364_v34  ;;  %v2374_v52 = vsub.f32 %v8542_v54, %v6364_v34 }
 0x3a3   : > { %v2910_v49 = vpop.permute.xlu1 %2909  ;;  %v3422_v38 = vadd.f32 %v6620_v55, %v3420_v7  ;;  %v2908_v22 = vpop.permute.xlu0 %2907  ;;  %v3720_v31 = vadd.f32 %v3719_v10, %v3718_v53  ;;  %4449 = vpow2.f32 %v2531_v26  ;;  %v2529_v55 = vmul.f32 1.442695, %v2371_v18  ;;  %v8543_v53 = vld [vmem:[#allocation105_spill] sm:$0xff]  ;;  %v8545_v18 = vld [vmem:[#allocation100_spill] sm:$0xff] }
 0x3a4   : > { %v3265_v8 = vmul.f32 %v4444_v36, %v2910_v49  ;;  %v3264_v59 = vmul.f32 %v4446_v15, %v2908_v22  ;;  %v2539_v2 = vmul.f32 1.442695, %v2376_v4  ;;  %v2537_v44 = vmul.f32 1.442695, %v2375_v45 }
 0x3a5   : > { %v3722_v56 = vadd.f32 %v3721_v32, %v3720_v31  ;;  %4451 = vpow2.f32 %v2529_v55  ;;  %v2379_v27 = vsub.f32 %v8543_v53, %v6364_v34  ;;  %v2378_v19 = vsub.f32 %v8544_v11, %v6364_v34  ;;  %v1478_v31 = vld [vmem:[#allocation2 + $0x248] sm:$0xff] }
 0x3a6   : > { %v3425_v48 = vsel %vm2044_vm1, %v3265_v8, 0.0  ;;  %v3423_v46 = vsel %vm2044_vm1, %v3264_v59, 0.0  ;;  %4453 = vpow2.f32 %v2539_v2  ;;  %v2535_v13 = vmul.f32 1.442695, %v2374_v52  ;;  %v8547_v52 = vld [vmem:[#allocation104_spill] sm:$0xff] }
 0x3a7   : > { %v3424_v5 = vadd.f32 %v3423_v46, %v3422_v38  ;;  %v3724_v7 = vadd.f32 %v6199_v0, %v3722_v56  ;;  %v2377_v62 = vsub.f32 %v8545_v18, %v6364_v34  ;;  %4455 = vpow2.f32 %v2537_v44  ;;  %v1477_v46 = vld [vmem:[#allocation2 + $0x2b8] sm:$0xff]  ;;  %v8548_v53 = vld [vmem:[#allocation112_spill] sm:$0xff] }
 0x3a8   : > { %v4448_v4 = vpop.eup %4447  ;;  %v2543_v49 = vmul.f32 1.442695, %v2378_v19  ;;  %v2382_v61 = vsub.f32 %v6181_v58, %v6364_v34  ;;  %4457 = vpow2.f32 %v2535_v13  ;;  %v6740_v10 = vmul.f32 1.442695, %v2403_v21 }
 0x3a9   : > { %2999 = vrot.lane.b32.xlu1 %v6661_v12, %s4815_s4  ;;  %v3426_v47 = vadd.f32 %v3425_v48, %v3424_v5  ;;  %2997 = vrot.lane.b32.xlu0 %v1474_v63, %s4815_s4  ;;  %v2545_v12 = vmul.f32 1.442695, %v2379_v27  ;;  %v4450_v26 = vpop.eup %4449  ;;  %v3269_v15 = vmul.f32 %v4448_v4, %v2918_v6  ;;  %v6736_v63 = vld [vmem:[#allocation2 + $0x178] sm:$0xff]  ;;  %4459 = vpow2.f32 %v2563_v25  ;;  %v2924_v56 = vpop.permute.xlu2 %2923  ;;  %v8546_v5 = vld [vmem:[#allocation103_spill] sm:$0xff] }
 0x3aa   : > { %2995 = vrot.lane.b32.xlu2 %v6736_v63, %s4815_s4  ;;  %v2541_v22 = vmul.f32 1.442695, %v2377_v62  ;;  %v3735_v59 = vsel %vm2044_vm1, %v4448_v4, 0.0  ;;  %v3727_v58 = vsel %vm2044_vm1, %v4450_v26, 0.0  ;;  %v2551_v25 = vmul.f32 1.442695, %v2382_v61 }
 0x3ab   : > { %v2916_v36 = vpop.permute.xlu1 %2915  ;;  %v3428_v8 = vadd.f32 %v3427_v57, %v3426_v47  ;;  %v2914_v38 = vpop.permute.xlu0 %2913  ;;  %4461 = vpow2.f32 %v2545_v12  ;;  %v6746_v6 = vsel %vm2044_vm1, %v3269_v15, 0.0  ;;  %v2381_v54 = vsub.f32 %v8546_v5, %v6364_v34  ;;  %v8549_v12 = vld [vmem:[#allocation107_spill] sm:$0xff] }
 0x3ac   : > { %v3268_v0 = vmul.f32 %v4450_v26, %v2916_v36  ;;  %v4452_v32 = vpop.eup %4451  ;;  %4463 = vpow2.f32 %v2543_v49  ;;  %v2380_v44 = vsub.f32 %v8547_v52, %v6364_v34 }
 0x3ad   : > { %v4454_v57 = vpop.eup %4453  ;;  %v3725_v55 = vsel %vm2044_vm1, %v4452_v32, 0.0  ;;  %v3267_v48 = vmul.f32 %v4452_v32, %v2914_v38  ;;  %4465 = vpow2.f32 %v2541_v22  ;;  %v6771_v22 = vld [vmem:[#allocation2 + $0x3b8] sm:$0xff] }
 0x3ae   : > { %v3431_v2 = vsel %vm2044_vm1, %v3268_v0, 0.0  ;;  %v3726_v21 = vadd.f32 %v3725_v55, %v3724_v7  ;;  %v4456_v39 = vpop.eup %4455  ;;  %v6759_v7 = vsel %vm2044_vm1, %v4454_v57, 0.0  ;;  %v6761_v13 = vmul.f32 %v4454_v57, %v2924_v56  ;;  %v1736_v57 = vld [vmem:[%s5012_s16 + $0x260] sm:$0xff] }
 0x3af   : > { %v3429_v45 = vsel %vm2044_vm1, %v3267_v48, 0.0  ;;  %v4458_v11 = vpop.eup %4457  ;;  %v3738_v62 = vsel %vm2044_vm1, %v4456_v39, 0.0  ;;  %4467 = vpow2.f32 %v2551_v25  ;;  %v1607_v55 = vadd.f32 %v5681_v24, %v1477_v46  ;;  %v1735_v48 = vld [vmem:[%s5012_s16 + $0x258] sm:$0xff] }
 0x3b0   : > { %v3728_v19 = vadd.f32 %v3727_v58, %v3726_v21  ;;  %v3430_v47 = vadd.f32 %v3429_v45, %v3428_v8  ;;  %v6763_v18 = vpop.eup %4459  ;;  %v3736_v36 = vsel %vm2044_vm1, %v4458_v11, 0.0  ;;  %v1608_v58 = vadd.f32 %v5681_v24, %v1478_v31  ;;  %v1728_v21 = vld [vmem:[%s5012_s16 + $0x220] sm:$0xff] }
 0x3b1   : > { %3005 = vrot.lane.b32.xlu1 %v1478_v31, %s4815_s4  ;;  %3003 = vrot.lane.b32.xlu0 %v1477_v46, %s4815_s4  ;;  %v6769_v61 = vpop.eup %4461  ;;  %v3737_v38 = vadd.f32 %v3736_v36, %v3735_v59  ;;  %v1600_v25 = vadd.f32 %v5681_v24, %v6710_v23  ;;  %vm1864_vm3 = vcmp.gt.f32.partialorder %v1736_v57, 0.5  ;;  %vm1863_vm4 = vcmp.gt.f32.partialorder %v1735_v48, 0.5  ;;  %v1481_v31 = vld [vmem:[#allocation2 + $0xe8] sm:$0xff] }
 0x3b2   : > { %v3729_v26 = vrot.slane %v3728_v19, 4  ;;  %v3432_v15 = vadd.f32 %v3431_v2, %v3430_v47  ;;  %v6773_v32 = vpop.eup %4463  ;;  %3001 = vrot.lane.b32.xlu2 %v6771_v22, %s4815_s4  ;;  %v6786_v56 = vsel %vm1864_vm3, %v1608_v58, -100000.0  ;;  %v6788_v46 = vsel %vm1863_vm4, %v1607_v55, -100000.0 }
 0x3b3   : > { %v2922_v4 = vpop.permute.xlu1 %2921  ;;  %v2920_v0 = vpop.permute.xlu0 %2919  ;;  %vm1856_vm5 = vcmp.gt.f32.partialorder %v1728_v21, 0.5  ;;  %v2216_v36 = vsel %vm2044_vm1, %v6786_v56, -inf  ;;  %v3739_v55 = vadd.f32 %v3738_v62, %v3737_v38 }
 0x3b4   : > { %v3271_v8 = vmul.f32 %v4456_v39, %v2922_v4  ;;  %v3270_v45 = vmul.f32 %v4458_v11, %v2920_v0  ;;  %v6784_v59 = vpop.eup %4465  ;;  %v3730_v2 = vadd.f32 %v3729_v26, %v3728_v19  ;;  %v3433_v39 = vrot.slane %v3432_v15, 4  ;;  %v1480_v11 = vld [vmem:[#allocation2 + $0x20] sm:$0xff]  ;;  %v1739_v26 = vld [vmem:[%s5012_s16 + $0x278] sm:$0xff] }
 0x3b5   : > { %v2214_v19 = vsel %vm2044_vm1, %v6788_v46, -inf  ;;  %v6796_v0 = vpop.eup %4467  ;;  %v2209_v58 = vmax.f32 %v2207_v30, %v2216_v36  ;;  %v6801_v57 = vsel %vm1856_vm5, %v1600_v25, -100000.0  ;;  %v1611_v30 = vadd.f32 %v5681_v24, %v1481_v31 }
 0x3b6   : > { %v3442_v23 = vsel %vm2044_vm1, %v3271_v8, 0.0  ;;  %v3731_v47 = vrot.slane %v3730_v2, 2  ;;  %v3434_v4 = vadd.f32 %v3433_v39, %v3432_v15  ;;  %v3440_v8 = vsel %vm2044_vm1, %v3270_v45, 0.0  ;;  %v1738_v15 = vld [vmem:[%s5012_s16 + $0x270] sm:$0xff] }
 0x3b7   : > { %v2200_v39 = vsel %vm2044_vm1, %v6801_v57, -inf  ;;  %v3441_v49 = vadd.f32 %v3440_v8, %v6746_v6  ;;  %v2211_v33 = vmax.f32 %v2209_v58, %v2214_v19  ;;  %vm1867_vm6 = vcmp.gt.f32.partialorder %v1739_v26, 0.5  ;;  %v1483_v58 = vld [vmem:[#allocation2 + $0x3a8] sm:$0xff] }
 0x3b8   : > { %v3732_v48 = vadd.f32 %v3731_v47, %v3730_v2  ;;  %v3435_v21 = vrot.slane %v3434_v4, 2  ;;  %v1610_v62 = vadd.f32 %v5681_v24, %v1480_v11  ;;  %vm1866_vm7 = vcmp.gt.f32.partialorder %v1738_v15, 0.5  ;;  %v1731_v2 = vld [vmem:[%s5012_s16 + $0x238] sm:$0xff]  ;;  %v2930_v47 = vpop.permute.xlu2 %2929 }
 0x3b9   : > { %3011 = vrot.lane.b32.xlu1 %v1481_v31, %s4815_s4  ;;  %3009 = vrot.lane.b32.xlu0 %v1480_v11, %s4815_s4  ;;  %v3443_v45 = vadd.f32 %v3442_v23, %v3441_v49  ;;  %v2213_v36 = vmax.f32 %v2211_v33, %v2200_v39  ;;  %v6815_v27 = vsel %vm1867_vm6, %v1611_v30, -100000.0  ;;  %v1603_v8 = vadd.f32 %v5681_v24, %v6736_v63 }
 0x3ba   : > { %v3733_v38 = vrot.slane %v3732_v48, 1  ;;  %v3436_v25 = vadd.f32 %v3435_v21, %v3434_v4  ;;  %v6817_v6 = vsel %vm1866_vm7, %v1610_v62, -100000.0  ;;  %3007 = vrot.lane.b32.xlu2 %v6810_v35, %s4815_s4  ;;  %v2222_v49 = vsel %vm2044_vm1, %v6815_v27, -inf  ;;  %v1484_v4 = vld [vmem:[#allocation2 + $0x3c8] sm:$0xff] }
 0x3bb   : > { %8550 = vst [vmem:[#allocation94_spill] sm:$0xff] %v6817_v6  ;;  %v2220_v23 = vsel %vm2044_vm1, %v6817_v6, -inf  ;;  %v3444_v19 = vsel %vm2044_vm1, %v6761_v13, 0.0  ;;  %v2215_v26 = vmax.f32 %v2213_v36, %v2222_v49  ;;  %vm1859_vm8 = vcmp.gt.f32.partialorder %v1731_v2, 0.5  ;;  %v2926_v62 = vpop.permute.xlu0 %2925  ;;  %v1741_v2 = vld [vmem:[%s5012_s16 + $0x288] sm:$0xff] }
 0x3bc   : > { %v6823_v31 = vadd.f32 %v3733_v38, %v3732_v48  ;;  %v3437_v11 = vrot.slane %v3436_v25, 1  ;;  %v3275_v63 = vmul.f32 %v6769_v61, %v2930_v47  ;;  %v6835_v15 = vsel %vm2044_vm1, %v6769_v61, 0.0  ;;  %v2928_v48 = vpop.permute.xlu1 %2927  ;;  %v1742_v38 = vld [vmem:[%s5012_s16 + $0x290] sm:$0xff] }
 0x3bd   : > { %v2549_v21 = vmul.f32 1.442695, %v2381_v54  ;;  %v2547_v13 = vmul.f32 1.442695, %v2380_v44  ;;  %v2217_v30 = vmax.f32 %v2215_v26, %v2220_v23  ;;  %v6846_v61 = vsel %vm1859_vm8, %v1603_v8, -100000.0  ;;  %v1734_v23 = vld [vmem:[%s5012_s16 + $0x250] sm:$0xff] }
 0x3be   : > { %4469 = vrcp.f32 %v6823_v31  ;;  %vm3977_vm9 = vweird.f32 %v6823_v31  ;;  %v3981_v39 = vand.u32 2147483647, %v6823_v31  ;;  %v3983_v33 = vand.u32 2147483648, %v6823_v31 }
 0x3bf   : > { %v6850_v5 = vadd.f32 %v3437_v11, %v3436_v25  ;;  %v2206_v54 = vsel %vm2044_vm1, %v6846_v61, -inf  ;;  %v3450_v52 = vsel %vm2044_vm1, %v3275_v63, 0.0  ;;  %v3744_v44 = vsel %vm2044_vm1, %v6773_v32, 0.0 }
 0x3c0   : > { %v2219_v47 = vmax.f32 %v2217_v30, %v2206_v54  ;;  %v3274_v36 = vmul.f32 %v6773_v32, %v2928_v48  ;;  %v3445_v8 = vadd.f32 %v3444_v19, %v3443_v45  ;;  %v3741_v49 = vadd.f32 %v6759_v7, %v3739_v55  ;;  %v1487_v19 = vld [vmem:[#allocation2 + $0x210] sm:$0xff] }
 0x3c1   : > { %3017 = vrot.lane.b32.xlu1 %v1484_v4, %s4815_s4  ;;  %3015 = vrot.lane.b32.xlu0 %v1483_v58, %s4815_s4  ;;  %v3742_v25 = vsel %vm2044_vm1, %v6784_v59, 0.0  ;;  %v3273_v11 = vmul.f32 %v6784_v59, %v2926_v62  ;;  %v1614_v26 = vadd.f32 %v5681_v24, %v1484_v4  ;;  %vm1870_vm10 = vcmp.gt.f32.partialorder %v1742_v38, 0.5  ;;  %v2936_v4 = vpop.permute.xlu2 %2935 }
 0x3c2   : > { %vm6866_vm12 = vcmp.eq.f32.partialorder %v3981_v39, 8.507059e+37  ;;  %v3984_v6 = vor.u32 1.1754944e-38, %v3983_v33  ;;  %v3743_v30 = vadd.f32 %v3742_v25, %v3741_v49  ;;  %v1613_v32 = vadd.f32 %v5681_v24, %v1483_v58  ;;  %v1486_v58 = vld [vmem:[#allocation2 + $0x2c8] sm:$0xff] }
 0x3c3   : > { %vm1869_vm13 = vcmp.gt.f32.partialorder %v1741_v2, 0.5  ;;  %v3446_v7 = vsel %vm2044_vm1, %v3273_v11, 0.0  ;;  %v6872_v55 = vsel %vm1870_vm10, %v1614_v26, -100000.0  ;;  %v1606_v59 = vadd.f32 %v5681_v24, %v6771_v22 }
 0x3c4   : > { %v4470_v45 = vpop.eup %4469  ;;  %8553 = vst [vmem:[#allocation99_spill] sm:$0xff] %v6872_v55  ;;  %vm1862_vm14 = vcmp.gt.f32.partialorder %v1734_v23, 0.5  ;;  %v3448_v39 = vsel %vm2044_vm1, %v3274_v36, 0.0  ;;  %v3745_v33 = vadd.f32 %v3744_v44, %v3743_v30  ;;  %v3447_v62 = vadd.f32 %v3446_v7, %v3445_v8  ;;  %v1745_v36 = vld [vmem:[%s5012_s16 + $0x2a8] sm:$0xff]  ;;  %v2934_v26 = vpop.permute.xlu1 %2933  ;;  %v1744_v30 = vld [vmem:[%s5012_s16 + $0x2a0] sm:$0xff] }
 0x3c5   : > { %v3973_v48 = vmul.f32 %v4470_v45, %v6823_v31  ;;  %vm3978_vm15 = vweird.f32 %v4470_v45  ;;  %v2233_v38 = vsel %vm2044_vm1, %v6872_v55, -inf  ;;  %v6880_v54 = vsel %vm1869_vm13, %v1613_v32, -100000.0  ;;  %v1737_v32 = vld [vmem:[%s5012_s16 + $0x268] sm:$0xff]  ;;  %v1490_v31 = vld [vmem:[#allocation2 + $0x1b0] sm:$0xff] }
 0x3c6   : > { %8554 = vst [vmem:[#allocation96_spill] sm:$0xff] %v6880_v54  ;;  %v6882_v22 = vsel %vm1862_vm14, %v1606_v59, -100000.0  ;;  %v3449_v49 = vadd.f32 %v3448_v39, %v3447_v62  ;;  %v2231_v23 = vsel %vm2044_vm1, %v6880_v54, -inf  ;;  %v6892_v11 = vsel %vm2044_vm1, %v6796_v0, 0.0  ;;  %v2932_v39 = vpop.permute.xlu0 %2931  ;;  %v6898_v62 = vld [vmem:[#allocation2 + $0x288] sm:$0xff]  ;;  %vm6903_vm0 = vmor %vm3977_vm9, %vm3978_vm15 }
 0x3c7   : > { %v3974_v2 = vsub.f32 1.0, %v3973_v48  ;;  %v2212_v44 = vsel %vm2044_vm1, %v6882_v22, -inf  ;;  %v2232_v8 = vmax.f32 %v2233_v38, %v2231_v23  ;;  %4471 = vpow2.f32 %v2549_v21  ;;  %3013 = vrot.lane.b32.xlu2 %v6898_v62, %s4815_s4 }
 0x3c8   : > { %v2221_v25 = vmax.f32 %v2219_v47, %v2212_v44  ;;  %4473 = vpow2.f32 %v2547_v13  ;;  %v3451_v59 = vadd.f32 %v3450_v52, %v3449_v49  ;;  %v3747_v48 = vadd.f32 %v6835_v15, %v3745_v33 }
 0x3c9   : > { %3023 = vrot.lane.b32.xlu1 %v1487_v19, %s4815_s4  ;;  %3021 = vrot.lane.b32.xlu0 %v1486_v58, %s4815_s4  ;;  %v3975_v7 = vmul.f32 %v4470_v45, %v3974_v2  ;;  %v3278_v21 = vmul.f32 %v6796_v0, %v2936_v4  ;;  %v1617_v38 = vadd.f32 %v5681_v24, %v1487_v19  ;;  %vm1873_vm2 = vcmp.gt.f32.partialorder %v1745_v36, 0.5  ;;  %v1489_v36 = vld [vmem:[#allocation2 + $0x1e8] sm:$0xff] }
 0x3ca   : > { %v1616_v13 = vadd.f32 %v5681_v24, %v1486_v58  ;;  %vm1872_vm3 = vcmp.gt.f32.partialorder %v1744_v30, 0.5  ;;  %v1609_v52 = vadd.f32 %v5681_v24, %v6810_v35  ;;  %vm1865_vm4 = vcmp.gt.f32.partialorder %v1737_v32, 0.5 }
 0x3cb   : > { %v3976_v15 = vadd.f32 %v4470_v45, %v3975_v7  ;;  %v6914_v33 = vsel %vm1873_vm2, %v1617_v38, -100000.0  ;;  %v8559_v0 = vsub.f32 %v8548_v53, %v6364_v34  ;;  %v8560_v19 = vsub.f32 %v8549_v12, %v6364_v34 }
 0x3cc   : > { %8557 = vst [vmem:[#allocation95_spill] sm:$0xff] %v6914_v33  ;;  %v6916_v2 = vsel %vm1872_vm3, %v1616_v13, -100000.0  ;;  %v2239_v35 = vsel %vm2044_vm1, %v6914_v33, -inf  ;;  %v6930_v44 = vsel %vm1865_vm4, %v1609_v52, -100000.0  ;;  %v1748_v52 = vld [vmem:[%s5012_s16 + $0x2c0] sm:$0xff]  ;;  %v8569_v33 = vld [vmem:[#allocation113_spill] sm:$0xff] }
 0x3cd   : > { %8558 = vst [vmem:[#allocation101_spill] sm:$0xff] %v6916_v2  ;;  %v2557_v4 = vmul.f32 1.442695, %v8559_v0  ;;  %v2555_v58 = vmul.f32 1.442695, %v8560_v19  ;;  %v3980_v49 = vsel %vm6903_vm0, %v4470_v45, %v3976_v15  ;;  %v2237_v23 = vsel %vm2044_vm1, %v6916_v2, -inf  ;;  %v4472_v30 = vpop.eup %4471  ;;  %v2942_v45 = vpop.permute.xlu2 %2941 }
 0x3ce   : > { %v3985_v53 = vsel %vm6866_vm12, %v3984_v6, %v3980_v49  ;;  %v2234_v32 = vmax.f32 %v2232_v8, %v2239_v35  ;;  %v2218_v12 = vsel %vm2044_vm1, %v6930_v44, -inf  ;;  %v4474_v7 = vpop.eup %4473  ;;  %v3750_v38 = vsel %vm2044_vm1, %v4472_v30, 0.0  ;;  %v1747_v49 = vld [vmem:[%s5012_s16 + $0x2b8] sm:$0xff] }
 0x3cf   : > { %4475 = vpow2.f32 %v2557_v4  ;;  %v3986_v47 = vmul.f32 %v3985_v53, %v6850_v5  ;;  %v3277_v13 = vmul.f32 %v4472_v30, %v2934_v26  ;;  %v2223_v15 = vmax.f32 %v2221_v25, %v2218_v12  ;;  %v2940_v26 = vpop.permute.xlu1 %2939  ;;  %v8561_v35 = vld [vmem:[#allocation106_spill] sm:$0xff] }
 0x3d0   : > { %v3748_v6 = vsel %vm2044_vm1, %v4474_v7, 0.0  ;;  %v3276_v63 = vmul.f32 %v4474_v7, %v2932_v39  ;;  %v2236_v8 = vmax.f32 %v2234_v32, %v2237_v23  ;;  %4477 = vpow2.f32 %v2555_v58  ;;  %v2938_v32 = vpop.permute.xlu0 %2937 }
 0x3d1   : > { %3029 = vrot.lane.b32.xlu1 %v1490_v31, %s4815_s4  ;;  %3027 = vrot.lane.b32.xlu0 %v1489_v36, %s4815_s4  ;;  %v4080_v0 = vadd.f32 %v6407_v14, %v3986_v47  ;;  %v3456_v4 = vsel %vm2044_vm1, %v3278_v21, 0.0  ;;  %v3749_v5 = vadd.f32 %v3748_v6, %v3747_v48  ;;  %v2224_v19 = vrot.slane %v2223_v15, 4 }
 0x3d2   : > { %v3452_v25 = vsel %vm2044_vm1, %v3276_v63, 0.0  ;;  %v2383_v30 = vsub.f32 %v8561_v35, %v6364_v34  ;;  %v1620_v53 = vadd.f32 %v5681_v24, %v1490_v31  ;;  %vm1876_vm5 = vcmp.gt.f32.partialorder %v1748_v52, 0.5 }
 0x3d3   : > { %4089 = vst.msk [vmem:[%s5007_s11 + $0x1] sm:$0x1] %vm4087_vm11, %v4080_v0  ;;  %v3751_v39 = vadd.f32 %v3750_v38, %v3749_v5  ;;  %v3453_v58 = vadd.f32 %v3452_v25, %v3451_v59  ;;  %v2225_v23 = vmax.f32 %v2223_v15, %v2224_v19  ;;  %v1619_v48 = vadd.f32 %v5681_v24, %v1489_v36  ;;  %v1740_v0 = vld [vmem:[%s5012_s16 + $0x280] sm:$0xff] }
 0x3d4   : > { %v3454_v12 = vsel %vm2044_vm1, %v3277_v13, 0.0  ;;  %v2553_v7 = vmul.f32 1.442695, %v2383_v30  ;;  %v6953_v47 = vsel %vm1876_vm5, %v1620_v53, -100000.0  ;;  %vm1875_vm6 = vcmp.gt.f32.partialorder %v1747_v49, 0.5 }
 0x3d5   : > { %v4476_v21 = vpop.eup %4475  ;;  %8562 = vst [vmem:[#allocation98_spill] sm:$0xff] %v6953_v47  ;;  %v3455_v6 = vadd.f32 %v3454_v12, %v3453_v58  ;;  %v2226_v63 = vrot.slane %v2225_v23, 2  ;;  %v1612_v52 = vadd.f32 %v5681_v24, %v6898_v62  ;;  %v3753_v59 = vadd.f32 %v6892_v11, %v3751_v39  ;;  %v2948_v25 = vpop.permute.xlu2 %2947  ;;  %v6971_v39 = vld [vmem:[#allocation2 + $0x1d0] sm:$0xff] }
 0x3d6   : > { %v3281_v31 = vmul.f32 %v4476_v21, %v2942_v45  ;;  %v4478_v38 = vpop.eup %4477  ;;  %4479 = vpow2.f32 %v2553_v7  ;;  %v2245_v36 = vsel %vm2044_vm1, %v6953_v47, -inf  ;;  %v6961_v15 = vsel %vm1875_vm6, %v1619_v48, -100000.0  ;;  %v6988_v7 = vld [vmem:[#allocation2 + $0x160] sm:$0xff] }
 0x3d7   : > { %8563 = vst [vmem:[#allocation97_spill] sm:$0xff] %v6961_v15  ;;  %4481 = vpow2.f32 %v6740_v10  ;;  %v2227_v13 = vmax.f32 %v2225_v23, %v2226_v63  ;;  %v3758_v5 = vsel %vm2044_vm1, %v4476_v21, 0.0  ;;  %v3280_v19 = vmul.f32 %v4478_v38, %v2940_v26  ;;  %v6973_v10 = vld [vmem:[#allocation2 + $0x2d0] sm:$0xff]  ;;  %3019 = vrot.lane.b32.xlu2 %v6988_v7, %s4815_s4 }
 0x3d8   : > { %v3457_v45 = vadd.f32 %v3456_v4, %v3455_v6  ;;  %v2238_v49 = vmax.f32 %v2236_v8, %v2245_v36  ;;  %v2243_v62 = vsel %vm2044_vm1, %v6961_v15, -inf  ;;  %vm1868_vm7 = vcmp.gt.f32.partialorder %v1740_v0, 0.5  ;;  %v8564_v4 = vld [vmem:[#allocation108_spill] sm:$0xff]  ;;  %v8565_v23 = vld [vmem:[#allocation109_spill] sm:$0xff]  ;;  %v2946_v36 = vpop.permute.xlu1 %2945 }
 0x3d9   : > { %v2228_v35 = vrot.slane %v2227_v13, 1  ;;  %v3462_v11 = vsel %vm2044_vm1, %v3281_v31, 0.0  ;;  %v3756_v30 = vsel %vm2044_vm1, %v4478_v38, 0.0  ;;  %v6969_v53 = vsel %vm1868_vm7, %v1612_v52, -100000.0  ;;  %3035 = vrot.lane.b32.xlu1 %v6971_v39, %s4815_s4  ;;  %3033 = vrot.lane.b32.xlu0 %v6973_v10, %s4815_s4  ;;  %v8566_v6 = vld [vmem:[#allocation117_spill] sm:$0xff]  ;;  %v8567_v31 = vld [vmem:[#allocation110_spill] sm:$0xff] }
 0x3da   : > { %v2240_v58 = vmax.f32 %v2238_v49, %v2243_v62  ;;  %v2230_v8 = vsel %vm2044_vm1, %v6969_v53, -inf  ;;  %v2387_v26 = vsub.f32 %v8564_v4, %v6364_v34  ;;  %v2386_v48 = vsub.f32 %v8565_v23, %v6364_v34 }
 0x3db   : > { %v6985_v21 = vmax.f32 %v2227_v13, %v2228_v35  ;;  %v3460_v12 = vsel %vm2044_vm1, %v3280_v19, 0.0  ;;  %v2391_v63 = vsub.f32 %v8566_v6, %v6680_v17  ;;  %v2390_v52 = vsub.f32 %v8567_v31, %v6680_v17  ;;  %v8568_v13 = vld [vmem:[#allocation111_spill] sm:$0xff]  ;;  %v2944_v6 = vpop.permute.xlu0 %2943 }
 0x3dc   : > { %v4480_v0 = vpop.eup %4479  ;;  %v6994_v34 = vmax.f32 %v2240_v58, %v2230_v8  ;;  %v2561_v38 = vmul.f32 1.442695, %v2387_v26  ;;  %v2559_v49 = vmul.f32 1.442695, %v2386_v48  ;;  %v2389_v19 = vsub.f32 %v8568_v13, %v6680_v17 }
 0x3dd   : > { %v7000_v62 = vpop.eup %4481  ;;  %v2418_v35 = vsub.f32 %v6930_v44, %v6985_v21  ;;  %v3754_v4 = vsel %vm2044_vm1, %v4480_v0, 0.0  ;;  %v3279_v23 = vmul.f32 %v4480_v0, %v2938_v32  ;;  %v2569_v58 = vmul.f32 1.442695, %v2391_v63  ;;  %v7011_v63 = vld [vmem:[#allocation2 + $0x198] sm:$0xff] }
 0x3de   : > { %v3755_v8 = vadd.f32 %v3754_v4, %v3753_v59  ;;  %v3284_v26 = vmul.f32 %v6763_v18, %v2948_v25  ;;  %4483 = vpow2.f32 %v2561_v38  ;;  %v2567_v48 = vmul.f32 1.442695, %v2390_v52  ;;  %v7013_v59 = vld [vmem:[#allocation2 + $0x120] sm:$0xff]  ;;  %v8570_v52 = vld [vmem:[#allocation114_spill] sm:$0xff] }
 0x3df   : > { %v3458_v31 = vsel %vm2044_vm1, %v3279_v23, 0.0  ;;  %4485 = vpow2.f32 %v2559_v49  ;;  %v2565_v15 = vmul.f32 1.442695, %v2389_v19  ;;  %v2394_v13 = vsub.f32 %v6464_v42, %v6680_v17  ;;  %v2954_v19 = vpop.permute.xlu2 %2953 }
 0x3e0   : > { %v2623_v47 = vmul.f32 1.442695, %v2418_v35  ;;  %v3757_v2 = vadd.f32 %v3756_v30, %v3755_v8  ;;  %v3459_v44 = vadd.f32 %v3458_v31, %v3457_v45  ;;  %v2393_v32 = vsub.f32 %v8569_v33, %v6680_v17  ;;  %v7023_v45 = vld [vmem:[#allocation2 + $0x3d8] sm:$0xff]  ;;  %v8571_v35 = vld [vmem:[#allocation115_spill] sm:$0xff] }
 0x3e1   : > { %4487 = vpow2.f32 %v2569_v58  ;;  %v2575_v25 = vmul.f32 1.442695, %v2394_v13  ;;  %v2392_v0 = vsub.f32 %v8570_v52, %v6680_v17  ;;  %v2397_v38 = vsub.f32 %v6511_v28, %v6680_v17  ;;  %3041 = vrot.lane.b32.xlu1 %v7011_v63, %s4815_s4  ;;  %3039 = vrot.lane.b32.xlu0 %v7013_v59, %s4815_s4  ;;  %v2952_v13 = vpop.permute.xlu1 %2951 }
 0x3e2   : > { %v3461_v49 = vadd.f32 %v3460_v12, %v3459_v44  ;;  %v3759_v42 = vadd.f32 %v3758_v5, %v3757_v2  ;;  %4489 = vpow2.f32 %v2567_v48  ;;  %v2573_v33 = vmul.f32 1.442695, %v2393_v32  ;;  %3025 = vrot.lane.b32.xlu2 %v7023_v45, %s4815_s4  ;;  %v8572_v2 = vld [vmem:[#allocation116_spill] sm:$0xff] }
 0x3e3   : > { %4491 = vpow2.f32 %v2565_v15  ;;  %v2571_v30 = vmul.f32 1.442695, %v2392_v0  ;;  %v2396_v4 = vsub.f32 %v8571_v35, %v6680_v17  ;;  %v2395_v5 = vsub.f32 %v8572_v2, %v6680_v17  ;;  %v2950_v52 = vpop.permute.xlu0 %2949 }
 0x3e4   : > { %v4484_v23 = vpop.eup %4483  ;;  %4493 = vpow2.f32 %v2623_v47  ;;  %v3463_v28 = vadd.f32 %v3462_v11, %v3461_v49  ;;  %v3764_v15 = vsel %vm2044_vm1, %v6763_v18, 0.0  ;;  %v3468_v8 = vsel %vm2044_vm1, %v3284_v26, 0.0 }
 0x3e5   : > { %v4486_v58 = vpop.eup %4485  ;;  %v3283_v48 = vmul.f32 %v4484_v23, %v2946_v36  ;;  %4495 = vpow2.f32 %v2575_v25  ;;  %v3762_v47 = vsel %vm2044_vm1, %v4484_v23, 0.0  ;;  %v2581_v0 = vmul.f32 1.442695, %v2397_v38  ;;  %v7047_v38 = vld [vmem:[#allocation2 + $0x1f8] sm:$0xff] }
 0x3e6   : > { %v3760_v11 = vsel %vm2044_vm1, %v4486_v58, 0.0  ;;  %v3282_v31 = vmul.f32 %v4486_v58, %v2944_v6  ;;  %4497 = vpow2.f32 %v2573_v33  ;;  %v2579_v49 = vmul.f32 1.442695, %v2396_v4  ;;  %v7045_v58 = vld [vmem:[#allocation2 + $0x238] sm:$0xff] }
 0x3e7   : > { %v4488_v44 = vpop.eup %4487  ;;  %v3761_v32 = vadd.f32 %v3760_v11, %v3759_v42  ;;  %4499 = vpow2.f32 %v2571_v30  ;;  %v7039_v26 = vmul.f32 1.442695, %v2395_v5  ;;  %v3466_v6 = vsel %vm2044_vm1, %v3283_v48, 0.0  ;;  %v7114_v36 = vld [vmem:[#allocation2 + $0x78] sm:$0xff] }
 0x3e8   : > { %v4490_v35 = vpop.eup %4489  ;;  %v3464_v18 = vsel %vm2044_vm1, %v3282_v31, 0.0  ;;  %v3287_v2 = vmul.f32 %v4488_v44, %v2954_v19  ;;  %v7052_v19 = vsel %vm2044_vm1, %v4488_v44, 0.0  ;;  %4501 = vpow2.f32 %v2581_v0 }
 0x3e9   : > { %v4492_v25 = vpop.eup %4491  ;;  %v3763_v23 = vadd.f32 %v3762_v47, %v3761_v32  ;;  %v3465_v33 = vadd.f32 %v3464_v18, %v3463_v28  ;;  %v3773_v42 = vsel %vm2044_vm1, %v4490_v35, 0.0  ;;  %v3286_v4 = vmul.f32 %v4490_v35, %v2952_v13  ;;  %3047 = vrot.lane.b32.xlu1 %v7045_v58, %s4815_s4  ;;  %3045 = vrot.lane.b32.xlu0 %v7047_v38, %s4815_s4  ;;  %v7063_v32 = vld [vmem:[#allocation2 + $0x1c8] sm:$0xff]  ;;  %v2960_v18 = vpop.permute.xlu2 %2959 }
 0x3ea   : > { %v7049_v30 = vpop.eup %4493  ;;  %v3772_v5 = vsel %vm2044_vm1, %v4492_v25, 0.0  ;;  %v3285_v11 = vmul.f32 %v4492_v25, %v2950_v52  ;;  %v7068_v44 = vsel %vm2044_vm1, %v3287_v2, 0.0  ;;  %3031 = vrot.lane.b32.xlu2 %v7063_v32, %s4815_s4  ;;  %4503 = vpow2.f32 %v2579_v49  ;;  %v1743_v49 = vld [vmem:[%s5012_s16 + $0x298] sm:$0xff] }
 0x3eb   : > { %v7059_v28 = vpop.eup %4495  ;;  %v3765_v48 = vadd.f32 %v3764_v15, %v3763_v23  ;;  %v3467_v47 = vadd.f32 %v3466_v6, %v3465_v33  ;;  %v7061_v31 = vadd.f32 %v3773_v42, %v3772_v5  ;;  %v3477_v52 = vsel %vm2044_vm1, %v3286_v4, 0.0  ;;  %v1751_v33 = vld [vmem:[%s5012_s16 + $0x2d8] sm:$0xff]  ;;  %v1750_v4 = vld [vmem:[%s5012_s16 + $0x2d0] sm:$0xff] }
 0x3ec   : > { %v7065_v13 = vpop.eup %4497  ;;  %v3476_v35 = vsel %vm2044_vm1, %v3285_v11, 0.0  ;;  %v3290_v23 = vmul.f32 %v7059_v28, %v2960_v18  ;;  %v1623_v2 = vadd.f32 %v5681_v24, %v6971_v39  ;;  %v1622_v42 = vadd.f32 %v5681_v24, %v6973_v10  ;;  %v2958_v10 = vpop.permute.xlu1 %2957 }
 0x3ed   : > { %v7074_v15 = vpop.eup %4499  ;;  %v3766_v0 = vrot.slane %v3765_v48, 4  ;;  %v3469_v25 = vadd.f32 %v3468_v8, %v3467_v47  ;;  %v3478_v6 = vadd.f32 %v3477_v52, %v3476_v35  ;;  %v1615_v5 = vadd.f32 %v5681_v24, %v6988_v7  ;;  %v1754_v52 = vld [vmem:[%s5012_s16 + $0x2f0] sm:$0xff] }
 0x3ee   : > { %v1626_v11 = vadd.f32 %v5681_v24, %v7011_v63  ;;  %vm1879_vm8 = vcmp.gt.f32.partialorder %v1751_v33, 0.5  ;;  %vm1878_vm9 = vcmp.gt.f32.partialorder %v1750_v4, 0.5  ;;  %vm1871_vm10 = vcmp.gt.f32.partialorder %v1743_v49, 0.5  ;;  %v7093_v18 = vpop.eup %4501  ;;  %v1746_v33 = vld [vmem:[%s5012_s16 + $0x2b0] sm:$0xff]  ;;  %v7101_v4 = vld [vmem:[#allocation2 + $0x308] sm:$0xff] }
 0x3ef   : > { %v3767_v8 = vadd.f32 %v3766_v0, %v3765_v48  ;;  %v3470_v47 = vrot.slane %v3469_v25, 4  ;;  %v7089_v39 = vsel %vm1879_vm8, %v1623_v2, -100000.0  ;;  %v7091_v35 = vsel %vm1878_vm9, %v1622_v42, -100000.0  ;;  %v1753_v0 = vld [vmem:[%s5012_s16 + $0x2e8] sm:$0xff] }
 0x3f0   : > { %8573 = vst [vmem:[#allocation105_spill] sm:$0xff] %v7089_v39  ;;  %vm1882_vm12 = vcmp.gt.f32.partialorder %v1754_v52, 0.5  ;;  %v2251_v63 = vsel %vm2044_vm1, %v7089_v39, -inf  ;;  %v2249_v48 = vsel %vm2044_vm1, %v7091_v35, -inf  ;;  %v7103_v2 = vpop.eup %4503  ;;  %v7106_v49 = vsel %vm1871_vm10, %v1615_v5, -100000.0 }
 0x3f1   : > { %8574 = vst [vmem:[#allocation102_spill] sm:$0xff] %v7091_v35  ;;  %v3768_v7 = vrot.slane %v3767_v8, 2  ;;  %v3471_v12 = vadd.f32 %v3470_v47, %v3469_v25  ;;  %v2244_v42 = vmax.f32 %v6994_v34, %v2251_v63  ;;  %v7108_v52 = vsel %vm1882_vm12, %v1626_v11, -100000.0  ;;  %v2956_v47 = vpop.permute.xlu0 %2955  ;;  %3079 = vrot.lane.b32.xlu1 %v7101_v4, %s4815_s4  ;;  %v7116_v35 = vld [vmem:[#allocation2 + $0x58] sm:$0xff]  ;;  %3077 = vrot.lane.b32.xlu0 %v7114_v36, %s4815_s4 }
 0x3f2   : > { %8575 = vst [vmem:[#allocation100_spill] sm:$0xff] %v7106_v49  ;;  %v1625_v25 = vadd.f32 %v5681_v24, %v7013_v59  ;;  %v2235_v34 = vsel %vm2044_vm1, %v7106_v49, -inf  ;;  %v3289_v5 = vmul.f32 %v7065_v13, %v2958_v10  ;;  %vm1881_vm13 = vcmp.gt.f32.partialorder %v1753_v0, 0.5  ;;  %3037 = vrot.lane.b32.xlu2 %v7116_v35, %s4815_s4 }
 0x3f3   : > { %8576 = vst [vmem:[#allocation103_spill] sm:$0xff] %v7108_v52  ;;  %v3769_v39 = vadd.f32 %v3768_v7, %v3767_v8  ;;  %v3472_v54 = vrot.slane %v3471_v12, 2  ;;  %v2246_v11 = vmax.f32 %v2244_v42, %v2249_v48  ;;  %v1618_v59 = vadd.f32 %v5681_v24, %v7023_v45  ;;  %v7145_v42 = vld [vmem:[#allocation2 + $0xc8] sm:$0xff] }
 0x3f4   : > { %vm1874_vm14 = vcmp.gt.f32.partialorder %v1746_v33, 0.5  ;;  %v2257_v7 = vsel %vm2044_vm1, %v7108_v52, -inf  ;;  %v7129_v49 = vsel %vm1881_vm13, %v1625_v25, -100000.0  ;;  %v7135_v48 = vsel %vm2044_vm1, %v7059_v28, 0.0  ;;  %v2964_v52 = vpop.permute.xlu1 %2963 }
 0x3f5   : > { %v3770_v63 = vrot.slane %v3769_v39, 1  ;;  %v3473_v8 = vadd.f32 %v3472_v54, %v3471_v12  ;;  %8577 = vst [vmem:[#allocation104_spill] sm:$0xff] %v7129_v49  ;;  %v2248_v10 = vmax.f32 %v2246_v11, %v2235_v34  ;;  %v7131_v55 = vsel %vm1874_vm14, %v1618_v59, -100000.0  ;;  %v1757_v11 = vld [vmem:[%s5012_s16 + $0x308] sm:$0xff] }
 0x3f6   : > { %v3779_v45 = vsel %vm2044_vm1, %v7065_v13, 0.0  ;;  %v2255_v54 = vsel %vm2044_vm1, %v7129_v49, -inf  ;;  %v3485_v12 = vsel %vm2044_vm1, %v3290_v23, 0.0  ;;  %v3480_v33 = vadd.f32 %v7068_v44, %v3478_v6  ;;  %v7159_v59 = vld [vmem:[#allocation2 + $0x2e8] sm:$0xff] }
 0x3f7   : > { %v7139_v0 = vadd.f32 %v3770_v63, %v3769_v39  ;;  %v2250_v25 = vmax.f32 %v2248_v10, %v2257_v7  ;;  %v3776_v28 = vadd.f32 %v7052_v19, %v7061_v31  ;;  %v3777_v34 = vsel %vm2044_vm1, %v7074_v15, 0.0  ;;  %v7152_v39 = vld [vmem:[#allocation2 + $0x390] sm:$0xff]  ;;  %v1749_v49 = vld [vmem:[%s5012_s16 + $0x2c8] sm:$0xff] }
 0x3f8   : > { %v3288_v13 = vmul.f32 %v7074_v15, %v2956_v47  ;;  %v3474_v23 = vrot.slane %v3473_v8, 1  ;;  %v2241_v44 = vsel %vm2044_vm1, %v7131_v55, -inf  ;;  %v3483_v6 = vsel %vm2044_vm1, %v3289_v5, 0.0  ;;  %v1756_v47 = vld [vmem:[%s5012_s16 + $0x300] sm:$0xff] }
 0x3f9   : > { %4505 = vrcp.f32 %v7139_v0  ;;  %vm3992_vm15 = vweird.f32 %v7139_v0  ;;  %v2252_v19 = vmax.f32 %v2250_v25, %v2255_v54  ;;  %v3778_v31 = vadd.f32 %v3777_v34, %v3776_v28  ;;  %3083 = vrot.lane.b32.xlu1 %v7145_v42, %s4815_s4  ;;  %3051 = vrot.lane.b32.xlu0 %v7152_v39, %s4815_s4  ;;  %v2962_v34 = vpop.permute.xlu0 %2961 }
 0x3fa   : > { %v3481_v15 = vsel %vm2044_vm1, %v3288_v13, 0.0  ;;  %v3996_v63 = vand.u32 2147483647, %v7139_v0  ;;  %v3998_v7 = vand.u32 2147483648, %v7139_v0  ;;  %v1629_v5 = vadd.f32 %v5681_v24, %v7045_v58  ;;  %3043 = vrot.lane.b32.xlu2 %v7159_v59, %s4815_s4 }
 0x3fb   : > { %v3482_v10 = vadd.f32 %v3481_v15, %v3480_v33  ;;  %v7173_v54 = vmax.f32 %v2252_v19, %v2241_v44  ;;  %v3780_v25 = vadd.f32 %v3779_v45, %v3778_v31  ;;  %vm1885_vm0 = vcmp.gt.f32.partialorder %v1757_v11, 0.5 }
 0x3fc   : > { %v1628_v28 = vadd.f32 %v5681_v24, %v7047_v38  ;;  %v7179_v13 = vsel %vm1885_vm0, %v1629_v5, -100000.0  ;;  %vm1884_vm2 = vcmp.gt.f32.partialorder %v1756_v47, 0.5  ;;  %v1621_v58 = vadd.f32 %v5681_v24, %v7063_v32 }
 0x3fd   : > { %v3484_v33 = vadd.f32 %v3483_v6, %v3482_v10  ;;  %8578 = vst [vmem:[#allocation112_spill] sm:$0xff] %v7179_v13  ;;  %v3475_v44 = vadd.f32 %v3474_v23, %v3473_v8  ;;  %v7185_v45 = vsel %vm2044_vm1, %v7179_v13, -inf  ;;  %vm1877_vm3 = vcmp.gt.f32.partialorder %v1749_v49, 0.5  ;;  %v2966_v8 = vpop.permute.xlu2 %2965  ;;  %v1772_v10 = vld [vmem:[%s5012_s16 + $0x380] sm:$0xff]  ;;  %v1755_v6 = vld [vmem:[%s5012_s16 + $0x2f8] sm:$0xff] }
 0x3fe   : > { %v7187_v11 = vsel %vm1884_vm2, %v1628_v28, -100000.0  ;;  %vm7189_vm4 = vcmp.eq.f32.partialorder %v3996_v63, 8.507059e+37  ;;  %v3999_v19 = vor.u32 1.1754944e-38, %v3998_v7  ;;  %v7197_v32 = vsel %vm1877_vm3, %v1621_v58, -100000.0  ;;  %v1773_v63 = vld [vmem:[%s5012_s16 + $0x388] sm:$0xff]  ;;  %v1752_v28 = vld [vmem:[%s5012_s16 + $0x2e0] sm:$0xff] }
 0x3ff   : > { %8579 = vst [vmem:[#allocation107_spill] sm:$0xff] %v7187_v11  ;;  %v4506_v38 = vpop.eup %4505  ;;  %v7195_v31 = vsel %vm2044_vm1, %v7187_v11, -inf  ;;  %v2247_v49 = vsel %vm2044_vm1, %v7197_v32, -inf  ;;  %v3293_v47 = vmul.f32 %v7093_v18, %v2966_v8  ;;  %v3785_v5 = vsel %vm2044_vm1, %v7103_v2, 0.0 }
 0x400   : > { %8582 = vst [vmem:[#allocation106_spill] sm:$0xff] %v7197_v32  ;;  %v3988_v23 = vmul.f32 %v4506_v38, %v7139_v0  ;;  %vm3993_vm5 = vweird.f32 %v4506_v38  ;;  %v2256_v7 = vmax.f32 %v7173_v54, %v2247_v49  ;;  %4507 = vpow2.f32 %v7039_v26 }
 0x401   : > { %v3486_v11 = vadd.f32 %v3485_v12, %v3484_v33  ;;  %v3782_v15 = vadd.f32 %v7135_v48, %v3780_v25  ;;  %v1645_v13 = vadd.f32 %v5681_v24, %v7101_v4  ;;  %v3292_v8 = vmul.f32 %v7103_v2, %v2964_v52  ;;  %vm7225_vm9 = vmor %vm3992_vm15, %vm3993_vm5  ;;  %v2970_v25 = vpop.permute.xlu1 %2969 }
 0x402   : > { %v3989_v58 = vsub.f32 1.0, %v3988_v23  ;;  %vm1901_vm6 = vcmp.gt.f32.partialorder %v1773_v63, 0.5  ;;  %v1644_v32 = vadd.f32 %v5681_v24, %v7114_v36  ;;  %vm1900_vm7 = vcmp.gt.f32.partialorder %v1772_v10, 0.5  ;;  %v2968_v63 = vpop.permute.xlu0 %2967 }
 0x403   : > { %v7218_v49 = vsel %vm1901_vm6, %v1645_v13, -100000.0  ;;  %v1624_v26 = vadd.f32 %v5681_v24, %v7116_v35  ;;  %vm1880_vm8 = vcmp.gt.f32.partialorder %v1752_v28, 0.5  ;;  %v8586_v2 = vsub.f32 %v6578_v41, %v6680_v17  ;;  %v8587_v35 = vld [vmem:[#allocation118_spill] sm:$0xff] }
 0x404   : > { %v3990_v54 = vmul.f32 %v4506_v38, %v3989_v58  ;;  %v7231_v4 = vsel %vm2044_vm1, %v7218_v49, -inf  ;;  %v7233_v36 = vsel %vm1900_vm7, %v1644_v32, -100000.0  ;;  %v2399_v12 = vsub.f32 %v8587_v35, %v6680_v17 }
 0x405   : > { %8585 = vst [vmem:[#allocation108_spill] sm:$0xff] %v7233_v36  ;;  %v2587_v52 = vmul.f32 1.442695, %v8586_v2  ;;  %v7242_v0 = vsel %vm2044_vm1, %v7233_v36, -inf  ;;  %v7244_v13 = vsel %vm1880_vm8, %v1624_v26, -100000.0  ;;  %v8588_v23 = vsub.f32 %v6345_v9, %v6680_v17  ;;  %v1775_v36 = vld [vmem:[%s5012_s16 + $0x398] sm:$0xff] }
 0x406   : > { %v3991_v33 = vadd.f32 %v4506_v38, %v3990_v54  ;;  %v4508_v10 = vpop.eup %4507  ;;  %v2253_v28 = vsel %vm2044_vm1, %v7244_v13, -inf  ;;  %v2585_v58 = vmul.f32 1.442695, %v2399_v12  ;;  %v7263_v12 = vld [vmem:[#allocation2 + $0x278] sm:$0xff]  ;;  %v3491_v48 = vsel %vm2044_vm1, %v3293_v47, 0.0 }
 0x407   : > { %v2583_v32 = vmul.f32 1.442695, %v8588_v23  ;;  %4509 = vpow2.f32 %v2587_v52  ;;  %v3783_v26 = vsel %vm2044_vm1, %v4508_v10, 0.0  ;;  %v3291_v9 = vmul.f32 %v4508_v10, %v2962_v34  ;;  %v7261_v52 = vld [vmem:[#allocation2 + $0xa8] sm:$0xff]  ;;  %v2972_v34 = vpop.permute.xlu2 %2971  ;;  %3085 = vrot.lane.b32.xlu0 %v7263_v12, %s4815_s4 }
 0x408   : > { %v3995_v54 = vsel %vm7225_vm9, %v4506_v38, %v3991_v33  ;;  %v2258_v2 = vmax.f32 %v2256_v7, %v2253_v28  ;;  %v3787_v23 = vsel %vm2044_vm1, %v7093_v18, 0.0  ;;  %v3784_v41 = vadd.f32 %v3783_v26, %v3782_v15  ;;  %v1759_v7 = vld [vmem:[%s5012_s16 + $0x318] sm:$0xff]  ;;  %3055 = vrot.lane.b32.xlu1 %v7261_v52, %s4815_s4 }
 0x409   : > { %v4000_v35 = vsel %vm7189_vm4, %v3999_v19, %v3995_v54  ;;  %4511 = vpow2.f32 %v2585_v58  ;;  %v3487_v33 = vsel %vm2044_vm1, %v3291_v9, 0.0  ;;  %v1500_v18 = vld [vmem:[#allocation2 + $0x398] sm:$0xff]  ;;  %v3489_v19 = vsel %vm2044_vm1, %v3292_v8, 0.0  ;;  %v7300_v9 = vpop.permute.xlu1 %2975 }
 0x40a   : > { %v4001_v38 = vmul.f32 %v4000_v35, %v3475_v44  ;;  %4513 = vpow2.f32 %v2583_v32  ;;  %v3786_v15 = vadd.f32 %v3785_v5, %v3784_v41  ;;  %v3488_v44 = vadd.f32 %v3487_v33, %v3486_v11  ;;  %3049 = vrot.lane.b32.xlu2 %v1500_v18, %s4815_s4 }
 0x40b   : > { %v1647_v47 = vadd.f32 %v5681_v24, %v7145_v42  ;;  %vm1903_vm10 = vcmp.gt.f32.partialorder %v1775_v36, 0.5  ;;  %v1631_v10 = vadd.f32 %v5681_v24, %v7152_v39  ;;  %v1627_v28 = vadd.f32 %v5681_v24, %v7159_v59 }
 0x40c   : > { %v4081_v32 = vadd.f32 %v6407_v14, %v4001_v38  ;;  %v3490_v54 = vadd.f32 %v3489_v19, %v3488_v44  ;;  %v3788_v8 = vadd.f32 %v3787_v23, %v3786_v15  ;;  %vm1887_vm12 = vcmp.gt.f32.partialorder %v1759_v7, 0.5 }
 0x40d   : > { %v4510_v58 = vpop.eup %4509  ;;  %vm1883_vm13 = vcmp.gt.f32.partialorder %v1755_v6, 0.5  ;;  %v7284_v11 = vsel %vm2044_vm1, %v7000_v62, 0.0  ;;  %v7288_v42 = vsel %vm2044_vm1, %v7049_v30, 0.0  ;;  %v7294_v59 = vsel %vm1903_vm10, %v1647_v47, -100000.0  ;;  %v7305_v6 = vpop.permute.xlu0 %2973 }
 0x40e   : > { %4090 = vst.msk [vmem:[%s5007_s11 + $0x2] sm:$0x1] %vm4087_vm11, %v4081_v32  ;;  %v7292_v5 = vsel %vm1883_vm13, %v1627_v28, -100000.0  ;;  %v3492_v36 = vadd.f32 %v3491_v48, %v3490_v54  ;;  %v2402_v26 = vsub.f32 %v6466_v29, %v6680_v17  ;;  %v3296_v23 = vmul.f32 %v4510_v58, %v2972_v34 }
 0x40f   : > { %v4512_v39 = vpop.eup %4511  ;;  %v2259_v41 = vsel %vm2044_vm1, %v7292_v5, -inf  ;;  %v7303_v33 = vsel %vm1887_vm12, %v1631_v10, -100000.0  ;;  %v7310_v29 = vsel %vm2044_vm1, %v7294_v59, -inf  ;;  %v2401_v32 = vsub.f32 %v6481_v20, %v6680_v17 }
 0x410   : > { %v4514_v35 = vpop.eup %4513  ;;  %v3791_v38 = vsel %vm2044_vm1, %v4512_v39, 0.0  ;;  %8589 = vst [vmem:[#allocation109_spill] sm:$0xff] %v7303_v33  ;;  %v2260_v7 = vmax.f32 %v2258_v2, %v2259_v41  ;;  %v3295_v48 = vmul.f32 %v4512_v39, %v2970_v25  ;;  %v2591_v44 = vmul.f32 1.442695, %v2402_v26  ;;  %v1761_v41 = vld [vmem:[%s5012_s16 + $0x328] sm:$0xff]  ;;  %v1758_v26 = vld [vmem:[%s5012_s16 + $0x310] sm:$0xff] }
 0x411   : > { %v3789_v19 = vsel %vm2044_vm1, %v4514_v35, 0.0  ;;  %v3294_v15 = vmul.f32 %v4514_v35, %v2968_v63  ;;  %v3793_v2 = vsel %vm2044_vm1, %v4510_v58, 0.0  ;;  %v7318_v25 = vsel %vm2044_vm1, %v7303_v33, -inf }
 0x412   : > { %v3790_v47 = vadd.f32 %v3789_v19, %v3788_v8  ;;  %v2261_v34 = vrot.slane %v2260_v7, 4  ;;  %4515 = vpow2.f32 %v2591_v44  ;;  %v2978_v8 = vpop.permute.xlu2 %2977  ;;  %v2589_v39 = vmul.f32 1.442695, %v2401_v32 }
 0x413   : > { %v3493_v10 = vsel %vm2044_vm1, %v3294_v15, 0.0  ;;  %v3497_v35 = vsel %vm2044_vm1, %v3296_v23, 0.0  ;;  %v3495_v20 = vsel %vm2044_vm1, %v3295_v48, 0.0  ;;  %v3299_v58 = vmul.f32 %v7000_v62, %v2978_v8  ;;  %v7355_v8 = vld [vmem:[#allocation2 + $0x370] sm:$0xff] }
 0x414   : > { %v3792_v63 = vadd.f32 %v3791_v38, %v3790_v47  ;;  %v3494_v28 = vadd.f32 %v3493_v10, %v3492_v36  ;;  %v2262_v54 = vmax.f32 %v2260_v7, %v2261_v34  ;;  %v1630_v19 = vadd.f32 %v5681_v24, %v1500_v18  ;;  %v1776_v38 = vld [vmem:[%s5012_s16 + $0x3a0] sm:$0xff]  ;;  %v7335_v18 = vld [vmem:[#allocation2 + $0x228] sm:$0xff]  ;;  %v7337_v34 = vld [vmem:[#allocation2 + $0x258] sm:$0xff]  ;;  %3081 = vrot.lane.b32.xlu2 %v7355_v8, %s4815_s4 }
 0x415   : > { %4517 = vpow2.f32 %v2589_v39  ;;  %v1633_v36 = vadd.f32 %v5681_v24, %v7261_v52  ;;  %vm1889_vm14 = vcmp.gt.f32.partialorder %v1761_v41, 0.5  ;;  %vm1886_vm15 = vcmp.gt.f32.partialorder %v1758_v26, 0.5  ;;  %3089 = vrot.lane.b32.xlu1 %v7335_v18, %s4815_s4  ;;  %3057 = vrot.lane.b32.xlu0 %v7337_v34, %s4815_s4  ;;  %v7459_v41 = vld [vmem:[#allocation2 + $0x3d0] sm:$0xff] }
 0x416   : > { %v3496_v15 = vadd.f32 %v3495_v20, %v3494_v28  ;;  %v2263_v33 = vrot.slane %v2262_v54, 2  ;;  %v3794_v44 = vadd.f32 %v3793_v2, %v3792_v63  ;;  %v2406_v7 = vsub.f32 %v6667_v51, %v6985_v21  ;;  %v2982_v51 = vpop.permute.xlu1 %2981 }
 0x417   : > { %v1648_v62 = vadd.f32 %v5681_v24, %v7263_v12  ;;  %v7333_v48 = vsel %vm1886_vm15, %v1630_v19, -100000.0  ;;  %v2405_v10 = vsub.f32 %v6518_v16, %v6985_v21  ;;  %vm1904_vm0 = vcmp.gt.f32.partialorder %v1776_v38, 0.5  ;;  %v2980_v16 = vpop.permute.xlu0 %2979 }
 0x418   : > { %v2264_v23 = vmax.f32 %v2262_v54, %v2263_v33  ;;  %v3498_v47 = vadd.f32 %v3497_v35, %v3496_v15  ;;  %v4516_v32 = vpop.eup %4515  ;;  %v2270_v52 = vsel %vm2044_vm1, %v7333_v48, -inf  ;;  %v2599_v2 = vmul.f32 1.442695, %v2406_v7 }
 0x419   : > { %v2404_v33 = vsub.f32 %v6536_v3, %v6680_v17  ;;  %v3797_v63 = vsel %vm2044_vm1, %v4516_v32, 0.0  ;;  %v8590_v28 = vmax.f32 %v7195_v31, %v7185_v45  ;;  %v2597_v3 = vmul.f32 1.442695, %v2405_v10 }
 0x41a   : > { %v2265_v12 = vrot.slane %v2264_v23, 1  ;;  %4519 = vpow2.f32 %v2599_v2  ;;  %v2408_v39 = vsub.f32 %v6580_v60, %v6985_v21  ;;  %v3298_v20 = vmul.f32 %v4516_v32, %v7300_v9  ;;  %v2984_v32 = vpop.permute.xlu2 %2983 }
 0x41b   : > { %v7353_v54 = vmax.f32 %v8590_v28, %v2270_v52  ;;  %v2595_v17 = vmul.f32 1.442695, %v2404_v33  ;;  %v4518_v26 = vpop.eup %4517  ;;  %v2407_v45 = vsub.f32 %v6588_v1, %v6985_v21  ;;  %v2409_v31 = vsub.f32 %v6801_v57, %v6985_v21  ;;  %v7378_v33 = vld [vmem:[#allocation2 + $0xf0] sm:$0xff] }
 0x41c   : > { %v7361_v35 = vmax.f32 %v2264_v23, %v2265_v12  ;;  %v3795_v19 = vsel %vm2044_vm1, %v4518_v26, 0.0  ;;  %v3297_v15 = vmul.f32 %v4518_v26, %v7305_v6  ;;  %4521 = vpow2.f32 %v2597_v3  ;;  %v7380_v12 = vld [vmem:[#allocation2 + $0x348] sm:$0xff] }
 0x41d   : > { %v2603_v7 = vmul.f32 1.442695, %v2408_v39  ;;  %v3796_v52 = vadd.f32 %v3795_v19, %v3794_v44  ;;  %4523 = vpow2.f32 %v2595_v17  ;;  %v2601_v23 = vmul.f32 1.442695, %v2407_v45  ;;  %3061 = vrot.lane.b32.xlu1 %v7378_v33, %s4815_s4  ;;  %3091 = vrot.lane.b32.xlu0 %v7380_v12, %s4815_s4  ;;  %v7396_v17 = vld [vmem:[#allocation2 + $0x1a0] sm:$0xff] }
 0x41e   : > { %v3499_v9 = vsel %vm2044_vm1, %v3297_v15, 0.0  ;;  %v2605_v1 = vmul.f32 1.442695, %v2409_v31  ;;  %v2411_v57 = vsub.f32 %v6632_v37, %v6985_v21  ;;  %v7376_v6 = vsel %vm1889_vm14, %v1633_v36, -100000.0  ;;  %3053 = vrot.lane.b32.xlu2 %v7396_v17, %s4815_s4 }
 0x41f   : > { %4525 = vpow2.f32 %v2603_v7  ;;  %v3798_v2 = vadd.f32 %v3797_v63, %v3796_v52  ;;  %v3500_v10 = vadd.f32 %v3499_v9, %v3498_v47  ;;  %v3503_v28 = vsel %vm2044_vm1, %v3299_v58, 0.0  ;;  %v2986_v7 = vpop.permute.xlu0 %2985 }
 0x420   : > { %4527 = vpow2.f32 %v2601_v23  ;;  %v4520_v44 = vpop.eup %4519  ;;  %v3501_v3 = vsel %vm2044_vm1, %v3298_v20, 0.0  ;;  %v2410_v37 = vsub.f32 %v6634_v43, %v6985_v21  ;;  %v7393_v47 = vsel %vm1904_vm0, %v1648_v62, -100000.0  ;;  %v2988_v43 = vpop.permute.xlu1 %2987 }
 0x421   : > { %v3502_v36 = vadd.f32 %v3501_v3, %v3500_v10  ;;  %v3810_v58 = vsel %vm2044_vm1, %v4520_v44, 0.0  ;;  %v3302_v63 = vmul.f32 %v4520_v44, %v2984_v32  ;;  %v7400_v26 = vsel %vm2044_vm1, %v7376_v6, -inf }
 0x422   : > { %v4522_v39 = vpop.eup %4521  ;;  %v3800_v20 = vadd.f32 %v7284_v11, %v3798_v2  ;;  %4529 = vpow2.f32 %v2605_v1  ;;  %v2609_v38 = vmul.f32 1.442695, %v2411_v57  ;;  %v7409_v23 = vsel %vm2044_vm1, %v7393_v47, -inf }
 0x423   : > { %v4524_v62 = vpop.eup %4523  ;;  %v3514_v45 = vsel %vm2044_vm1, %v3302_v63, 0.0  ;;  %v3809_v31 = vsel %vm2044_vm1, %v4522_v39, 0.0  ;;  %v3301_v19 = vmul.f32 %v4522_v39, %v2982_v51  ;;  %v3504_v15 = vadd.f32 %v3503_v28, %v3502_v36  ;;  %v2990_v63 = vpop.permute.xlu2 %2989 }
 0x424   : > { %v3811_v11 = vadd.f32 %v3810_v58, %v3809_v31  ;;  %v3801_v9 = vsel %vm2044_vm1, %v4524_v62, 0.0  ;;  %v3300_v32 = vmul.f32 %v4524_v62, %v2980_v16  ;;  %v2607_v44 = vmul.f32 1.442695, %v2410_v37  ;;  %v7415_v16 = vld [vmem:[#allocation2 + $0xf8] sm:$0xff]  ;;  %v7417_v62 = vld [vmem:[#allocation2 + $0x180] sm:$0xff] }
 0x425   : > { %v4526_v52 = vpop.eup %4525  ;;  %v3513_v57 = vsel %vm2044_vm1, %v3301_v19, 0.0  ;;  %v3802_v2 = vadd.f32 %v3801_v9, %v3800_v20  ;;  %4531 = vpow2.f32 %v2609_v38  ;;  %v1650_v37 = vadd.f32 %v5681_v24, %v7335_v18  ;;  %v1762_v19 = vld [vmem:[%s5012_s16 + $0x330] sm:$0xff]  ;;  %3095 = vrot.lane.b32.xlu1 %v7415_v16, %s4815_s4  ;;  %3063 = vrot.lane.b32.xlu0 %v7417_v62, %s4815_s4 }
 0x426   : > { %v4528_v1 = vpop.eup %4527  ;;  %v3304_v10 = vmul.f32 %v4526_v52, %v2988_v43  ;;  %v3515_v51 = vadd.f32 %v3514_v45, %v3513_v57  ;;  %v3505_v28 = vsel %vm2044_vm1, %v3300_v32, 0.0  ;;  %v1778_v43 = vld [vmem:[%s5012_s16 + $0x3b0] sm:$0xff]  ;;  %v1634_v45 = vadd.f32 %v5681_v24, %v7337_v34  ;;  %v7439_v57 = vld [vmem:[#allocation2 + $0x360] sm:$0xff] }
 0x427   : > { %v3812_v3 = vsel %vm2044_vm1, %v4528_v1, 0.0  ;;  %v3303_v36 = vmul.f32 %v4528_v1, %v2986_v7  ;;  %v3803_v58 = vrot.slane %v3802_v2, 4  ;;  %v3506_v39 = vadd.f32 %v3505_v28, %v3504_v15  ;;  %v1774_v9 = vld [vmem:[%s5012_s16 + $0x390] sm:$0xff]  ;;  %3087 = vrot.lane.b32.xlu2 %v7439_v57, %s4815_s4 }
 0x428   : > { %v3813_v31 = vadd.f32 %v3812_v3, %v3811_v11  ;;  %v4530_v20 = vpop.eup %4529  ;;  %v1646_v7 = vadd.f32 %v5681_v24, %v7355_v8  ;;  %v3814_v15 = vsel %vm2044_vm1, %v4526_v52, 0.0  ;;  %vm1906_vm2 = vcmp.gt.f32.partialorder %v1778_v43, 0.5  ;;  %v1764_v43 = vld [vmem:[%s5012_s16 + $0x340] sm:$0xff] }
 0x429   : > { %v3804_v38 = vadd.f32 %v3803_v58, %v3802_v2  ;;  %v3507_v11 = vrot.slane %v3506_v39, 4  ;;  %vm1890_vm3 = vcmp.gt.f32.partialorder %v1762_v19, 0.5  ;;  %vm1902_vm4 = vcmp.gt.f32.partialorder %v1774_v9, 0.5 }
 0x42a   : > { %v3518_v18 = vsel %vm2044_vm1, %v3304_v10, 0.0  ;;  %v3516_v34 = vsel %vm2044_vm1, %v3303_v36, 0.0  ;;  %4533 = vpow2.f32 %v2607_v44  ;;  %v7435_v52 = vsel %vm1906_vm2, %v1650_v37, -100000.0  ;;  %v2994_v10 = vpop.permute.xlu1 %2993 }
 0x42b   : > { %v3805_v8 = vrot.slane %v3804_v38, 2  ;;  %v3508_v32 = vadd.f32 %v3507_v11, %v3506_v39  ;;  %8591 = vst [vmem:[#allocation117_spill] sm:$0xff] %v7435_v52  ;;  %v7437_v1 = vsel %vm1890_vm3, %v1634_v45, -100000.0  ;;  %v7441_v2 = vsel %vm1902_vm4, %v1646_v7, -100000.0  ;;  %v4532_v44 = vpop.eup %4531  ;;  %v2992_v11 = vpop.permute.xlu0 %2991 }
 0x42c   : > { %8592 = vst [vmem:[#allocation110_spill] sm:$0xff] %v7437_v1  ;;  %v3517_v28 = vadd.f32 %v3516_v34, %v3515_v51  ;;  %v3815_v3 = vadd.f32 %v3814_v15, %v3813_v31  ;;  %v3816_v58 = vsel %vm2044_vm1, %v4530_v20, 0.0  ;;  %v2307_v37 = vsel %vm2044_vm1, %v7441_v2, -inf  ;;  %v1779_v15 = vld [vmem:[%s5012_s16 + $0x3b8] sm:$0xff] }
 0x42d   : > { %v3806_v36 = vadd.f32 %v3805_v8, %v3804_v38  ;;  %v3509_v39 = vrot.slane %v3508_v32, 2  ;;  %v3305_v45 = vmul.f32 %v4530_v20, %v2990_v63  ;;  %v8593_v19 = vmax.f32 %v7242_v0, %v7231_v4  ;;  %v1760_v8 = vld [vmem:[%s5012_s16 + $0x320] sm:$0xff]  ;;  %v7461_v63 = vld [vmem:[#allocation2 + $0x68] sm:$0xff]  ;;  %3067 = vrot.lane.b32.xlu1 %v7459_v41, %s4815_s4 }
 0x42e   : > { %v3817_v31 = vadd.f32 %v3816_v58, %v3815_v3  ;;  %v3519_v7 = vadd.f32 %v3518_v18, %v3517_v28  ;;  %v1636_v9 = vadd.f32 %v5681_v24, %v7378_v33  ;;  %vm1892_vm5 = vcmp.gt.f32.partialorder %v1764_v43, 0.5  ;;  %v7469_v28 = vpop.permute.xlu2 %2995  ;;  %3097 = vrot.lane.b32.xlu0 %v7461_v63, %s4815_s4 }
 0x42f   : > { %v7452_v51 = vmax.f32 %v8593_v19, %v2307_v37  ;;  %v3807_v34 = vrot.slane %v3806_v36, 1  ;;  %v3510_v60 = vadd.f32 %v3509_v39, %v3508_v32  ;;  %v3520_v38 = vsel %vm2044_vm1, %v3305_v45, 0.0  ;;  %v7480_v39 = vld [vmem:[#allocation2 + $0x2d8] sm:$0xff] }
 0x430   : > { %v4534_v4 = vpop.eup %4533  ;;  %v3521_v20 = vadd.f32 %v3520_v38, %v3519_v7  ;;  %v7465_v18 = vsel %vm1892_vm5, %v1636_v9, -100000.0  ;;  %v1651_v33 = vadd.f32 %v5681_v24, %v7380_v12  ;;  %vm1907_vm6 = vcmp.gt.f32.partialorder %v1779_v15, 0.5  ;;  %3059 = vrot.lane.b32.xlu2 %v7480_v39, %s4815_s4 }
 0x431   : > { %8594 = vst [vmem:[#allocation111_spill] sm:$0xff] %v7465_v18  ;;  %v7473_v32 = vadd.f32 %v3807_v34, %v3806_v36  ;;  %v3511_v3 = vrot.slane %v3510_v60, 1  ;;  %v8595_v58 = vsub.f32 %v6846_v61, %v6985_v21  ;;  %v7484_v12 = vsel %vm2044_vm1, %v7435_v52, -inf }
 0x432   : > { %v1632_v36 = vadd.f32 %v5681_v24, %v7396_v17  ;;  %vm1888_vm7 = vcmp.gt.f32.partialorder %v1760_v8, 0.5  ;;  %v2273_v37 = vmax.f32 %v7353_v54, %v7318_v25  ;;  %v7493_v61 = vsel %vm2044_vm1, %v7437_v1, -inf  ;;  %v1781_v25 = vld [vmem:[%s5012_s16 + $0x3c8] sm:$0xff]  ;;  %v7541_v1 = vld [vmem:[#allocation2 + $0x250] sm:$0xff] }
 0x433   : > { %v2611_v43 = vmul.f32 1.442695, %v8595_v58  ;;  %4535 = vrcp.f32 %v7473_v32  ;;  %v7497_v45 = vsel %vm2044_vm1, %v7465_v18, -inf  ;;  %v7499_v19 = vsel %vm1907_vm6, %v1651_v33, -100000.0  ;;  %v1765_v18 = vld [vmem:[%s5012_s16 + $0x348] sm:$0xff] }
 0x434   : > { %8596 = vst [vmem:[#allocation113_spill] sm:$0xff] %v7499_v19  ;;  %vm4007_vm8 = vweird.f32 %v7473_v32  ;;  %v4011_v17 = vand.u32 2147483647, %v7473_v32  ;;  %v4013_v7 = vand.u32 2147483648, %v7473_v32  ;;  %v7504_v9 = vsel %vm1888_vm7, %v1632_v36, -100000.0  ;;  %v7517_v36 = vpop.permute.xlu1 %2999 }
 0x435   : > { %v7509_v54 = vadd.f32 %v3511_v3, %v3510_v60  ;;  %v2274_v15 = vsel %vm2044_vm1, %v7504_v9, -inf  ;;  %v3820_v34 = vsel %vm2044_vm1, %v4532_v44, 0.0  ;;  %v3307_v38 = vmul.f32 %v4532_v44, %v2994_v10 }
 0x436   : > { %v7514_v8 = vmax.f32 %v2273_v37, %v2274_v15  ;;  %v3818_v33 = vsel %vm2044_vm1, %v4534_v4, 0.0  ;;  %v3306_v58 = vmul.f32 %v4534_v4, %v2992_v11  ;;  %4537 = vpow2.f32 %v2611_v43  ;;  %v1777_v43 = vld [vmem:[%s5012_s16 + $0x3a8] sm:$0xff]  ;;  %v7534_v37 = vpop.permute.xlu0 %2997  ;;  %v7549_v52 = vpop.permute.xlu2 %3001  ;;  %3069 = vrot.lane.b32.xlu0 %v7541_v1, %s4815_s4 }
 0x437   : > { %v7521_v0 = vsel %vm2044_vm1, %v7499_v19, -inf  ;;  %v3819_v60 = vadd.f32 %v3818_v33, %v3817_v31  ;;  %v1653_v3 = vadd.f32 %v5681_v24, %v7415_v16  ;;  %vm1909_vm9 = vcmp.gt.f32.partialorder %v1781_v25, 0.5  ;;  %v7539_v19 = vld [vmem:[#allocation2 + $0x298] sm:$0xff] }
 0x438   : > { %vm7526_vm10 = vcmp.eq.f32.partialorder %v4011_v17, 8.507059e+37  ;;  %v4014_v44 = vor.u32 1.1754944e-38, %v4013_v7  ;;  %v3522_v4 = vsel %vm2044_vm1, %v3306_v58, 0.0  ;;  %v3524_v31 = vsel %vm2044_vm1, %v3307_v38, 0.0  ;;  %3101 = vrot.lane.b32.xlu1 %v7539_v19, %s4815_s4 }
 0x439   : > { %v4536_v15 = vpop.eup %4535  ;;  %v3523_v33 = vadd.f32 %v3522_v4, %v3521_v20  ;;  %v3821_v16 = vadd.f32 %v3820_v34, %v3819_v60  ;;  %v1649_v17 = vadd.f32 %v5681_v24, %v7439_v57  ;;  %v7545_v11 = vsel %vm1909_vm9, %v1653_v3, -100000.0  ;;  %v7555_v57 = vld [vmem:[#allocation2 + $0x148] sm:$0xff] }
 0x43a   : > { %v4003_v7 = vmul.f32 %v4536_v15, %v7473_v32  ;;  %v1637_v58 = vadd.f32 %v5681_v24, %v7417_v62  ;;  %vm1893_vm12 = vcmp.gt.f32.partialorder %v1765_v18, 0.5  ;;  %vm4008_vm13 = vweird.f32 %v4536_v15  ;;  %3093 = vrot.lane.b32.xlu2 %v7555_v57, %s4815_s4 }
 0x43b   : > { %v3525_v20 = vadd.f32 %v3524_v31, %v3523_v33  ;;  %vm1905_vm14 = vcmp.gt.f32.partialorder %v1777_v43, 0.5  ;;  %v8599_v25 = vmax.f32 %v7452_v51, %v7310_v29  ;;  %v2414_v3 = vsub.f32 %v6675_v50, %v6985_v21  ;;  %vm7579_vm15 = vmor %vm4007_vm8, %vm4008_vm13 }
 0x43c   : > { %v4538_v34 = vpop.eup %4537  ;;  %v4004_v38 = vsub.f32 1.0, %v4003_v7  ;;  %v7561_v60 = vsel %vm1905_vm14, %v1649_v17, -100000.0  ;;  %v2413_v4 = vsub.f32 %v6692_v40, %v6985_v21  ;;  %v1767_v40 = vld [vmem:[%s5012_s16 + $0x358] sm:$0xff]  ;;  %v7591_v32 = vpop.permute.xlu1 %3005 }
 0x43d   : > { %v2312_v62 = vmax.f32 %v8599_v25, %v7409_v23  ;;  %8600 = vst [vmem:[#allocation114_spill] sm:$0xff] %v7561_v60  ;;  %v3822_v43 = vsel %vm2044_vm1, %v4538_v34, 0.0  ;;  %v3308_v31 = vmul.f32 %v4538_v34, %v7469_v28  ;;  %v2313_v29 = vsel %vm2044_vm1, %v7561_v60, -inf }
 0x43e   : > { %v2415_v23 = vsub.f32 %v6882_v22, %v6985_v21  ;;  %v4005_v51 = vmul.f32 %v4536_v15, %v4004_v38  ;;  %v3823_v50 = vadd.f32 %v3822_v43, %v3821_v16  ;;  %v2615_v17 = vmul.f32 1.442695, %v2414_v3  ;;  %v1763_v3 = vld [vmem:[%s5012_s16 + $0x338] sm:$0xff]  ;;  %v3008_v10 = vpop.permute.xlu2 %3007 }
 0x43f   : > { %v2314_v33 = vmax.f32 %v2312_v62, %v2313_v29  ;;  %v3526_v28 = vsel %vm2044_vm1, %v3308_v31, 0.0  ;;  %v2613_v25 = vmul.f32 1.442695, %v2413_v4  ;;  %v1639_v22 = vadd.f32 %v5681_v24, %v7459_v41  ;;  %v1782_v62 = vld [vmem:[%s5012_s16 + $0x3d0] sm:$0xff]  ;;  %v7606_v31 = vpop.permute.xlu0 %3003 }
 0x440   : > { %v2617_v34 = vmul.f32 1.442695, %v2415_v23  ;;  %v4006_v60 = vadd.f32 %v4536_v15, %v4005_v51  ;;  %v3527_v38 = vadd.f32 %v3526_v28, %v3525_v20  ;;  %4539 = vpow2.f32 %v2615_v17 }
 0x441   : > { %v7587_v16 = vmax.f32 %v2314_v33, %v7484_v12  ;;  %v7595_v43 = vsel %vm2044_vm1, %v7545_v11, -inf  ;;  %v7598_v4 = vsel %vm1893_vm12, %v1637_v58, -100000.0  ;;  %4541 = vpow2.f32 %v2613_v25 }
 0x442   : > { %vm1895_vm0 = vcmp.gt.f32.partialorder %v1767_v40, 0.5  ;;  %v4010_v41 = vsel %vm7579_vm15, %v4536_v15, %v4006_v60  ;;  %4543 = vpow2.f32 %v2617_v34  ;;  %v1654_v12 = vadd.f32 %v5681_v24, %v7461_v63  ;;  %v1784_v40 = vld [vmem:[%s5012_s16 + $0x3e0] sm:$0xff] }
 0x443   : > { %v1635_v20 = vadd.f32 %v5681_v24, %v7480_v39  ;;  %v4015_v29 = vsel %vm7526_vm10, %v4014_v44, %v4010_v41  ;;  %v7610_v18 = vsel %vm1895_vm0, %v1639_v22, -100000.0  ;;  %vm1910_vm2 = vcmp.gt.f32.partialorder %v1782_v62, 0.5 }
 0x444   : > { %vm1891_vm3 = vcmp.gt.f32.partialorder %v1763_v3, 0.5  ;;  %v4016_v58 = vmul.f32 %v4015_v29, %v7509_v54  ;;  %v7615_v15 = vsel %vm2044_vm1, %v7598_v4, -inf  ;;  %v8603_v39 = vmax.f32 %v7514_v8, %v7400_v26 }
 0x445   : > { %v7617_v63 = vsel %vm1891_vm3, %v1635_v20, -100000.0  ;;  %v2417_v23 = vsub.f32 %v6786_v56, %v6985_v21  ;;  %v2416_v54 = vsub.f32 %v6788_v46, %v6985_v21  ;;  %v3314_v51 = vmul.f32 %v7049_v30, %v3008_v10  ;;  %v1780_v20 = vld [vmem:[%s5012_s16 + $0x3c0] sm:$0xff] }
 0x446   : > { %v2279_v60 = vmax.f32 %v8603_v39, %v7493_v61  ;;  %v2280_v44 = vsel %vm2044_vm1, %v7617_v63, -inf  ;;  %v4540_v33 = vpop.eup %4539  ;;  %v4082_v17 = vadd.f32 %v6407_v14, %v4016_v58  ;;  %v7633_v26 = vsel %vm2044_vm1, %v7610_v18, -inf  ;;  %v7659_v39 = vpop.permute.xlu1 %3011 }
 0x447   : > { %v7635_v61 = vsel %vm1910_vm2, %v1654_v12, -100000.0  ;;  %v4542_v7 = vpop.eup %4541  ;;  %v3310_v56 = vmul.f32 %v4540_v33, %v7517_v36  ;;  %v2621_v28 = vmul.f32 1.442695, %v2417_v23  ;;  %v2619_v46 = vmul.f32 1.442695, %v2416_v54 }
 0x448   : > { %v2281_v8 = vmax.f32 %v2279_v60, %v2280_v44  ;;  %v1656_v30 = vadd.f32 %v5681_v24, %v7539_v19  ;;  %v4544_v25 = vpop.eup %4543  ;;  %4091 = vst.msk [vmem:[%s5007_s11 + $0x3] sm:$0x1] %vm4087_vm11, %v4082_v17  ;;  %v3826_v34 = vsel %vm2044_vm1, %v4540_v33, 0.0  ;;  %v3824_v22 = vsel %vm2044_vm1, %v4542_v7, 0.0  ;;  %v1768_v19 = vld [vmem:[%s5012_s16 + $0x360] sm:$0xff]  ;;  %v7665_v44 = vpop.permute.xlu0 %3009  ;;  %v7674_v33 = vld [vmem:[#allocation2 + $0x270] sm:$0xff] }
 0x449   : > { %v3309_v62 = vmul.f32 %v4542_v7, %v7534_v37  ;;  %v3825_v41 = vadd.f32 %v3824_v22, %v3823_v50  ;;  %v3311_v36 = vmul.f32 %v4544_v25, %v7549_v52  ;;  %v7651_v12 = vsel %vm2044_vm1, %v3314_v51, 0.0  ;;  %v8606_v7 = vld [vmem:[#allocation94_spill] sm:$0xff]  ;;  %3103 = vrot.lane.b32.xlu0 %v7674_v33, %s4815_s4 }
 0x44a   : > { %v7647_v3 = vmax.f32 %v2281_v8, %v7497_v45  ;;  %vm1912_vm4 = vcmp.gt.f32.partialorder %v1784_v40, 0.5  ;;  %v3828_v58 = vsel %vm2044_vm1, %v4544_v25, 0.0  ;;  %4545 = vpow2.f32 %v2621_v28  ;;  %v7684_v40 = vpop.permute.xlu2 %3013 }
 0x44b   : > { %v3528_v29 = vsel %vm2044_vm1, %v3309_v62, 0.0  ;;  %v1640_v37 = vadd.f32 %v5681_v24, %v7541_v1  ;;  %v3530_v45 = vsel %vm2044_vm1, %v3310_v56, 0.0  ;;  %v3827_v52 = vadd.f32 %v3826_v34, %v3825_v41  ;;  %v8608_v62 = vld [vmem:[#allocation96_spill] sm:$0xff] }
 0x44c   : > { %v3529_v50 = vadd.f32 %v3528_v29, %v3527_v38  ;;  %4547 = vpow2.f32 %v2619_v46  ;;  %v3532_v60 = vsel %vm2044_vm1, %v3311_v36, 0.0  ;;  %vm1896_vm5 = vcmp.gt.f32.partialorder %v1768_v19, 0.5  ;;  %v7672_v38 = vld [vmem:[#allocation2 + $0xb8] sm:$0xff]  ;;  %v1508_v46 = vld [vmem:[#allocation2 + $0x170] sm:$0xff] }
 0x44d   : > { %v1652_v10 = vadd.f32 %v5681_v24, %v7555_v57  ;;  %vm1908_vm6 = vcmp.gt.f32.partialorder %v1780_v20, 0.5  ;;  %v3829_v23 = vadd.f32 %v3828_v58, %v3827_v52  ;;  %v7668_v1 = vsel %vm1912_vm4, %v1656_v30, -100000.0  ;;  %3073 = vrot.lane.b32.xlu1 %v7672_v38, %s4815_s4  ;;  %3065 = vrot.lane.b32.xlu2 %v1508_v46, %s4815_s4 }
 0x44e   : > { %v3531_v54 = vadd.f32 %v3530_v45, %v3529_v50  ;;  %8604 = vst [vmem:[#allocation115_spill] sm:$0xff] %v7668_v1  ;;  %v2318_v51 = vmax.f32 %v7587_v16, %v7521_v0  ;;  %v7676_v17 = vsel %vm1896_vm5, %v1640_v37, -100000.0  ;;  %v2420_v57 = vsub.f32 %v6815_v27, %v6985_v21  ;;  %v8607_v27 = vld [vmem:[#allocation99_spill] sm:$0xff]  ;;  %v1766_v50 = vld [vmem:[%s5012_s16 + $0x350] sm:$0xff] }
 0x44f   : > { %8605 = vst [vmem:[#allocation116_spill] sm:$0xff] %v7676_v17  ;;  %v7678_v8 = vsel %vm1908_vm6, %v1652_v10, -100000.0  ;;  %v2419_v56 = vsub.f32 %v8606_v7, %v6985_v21  ;;  %v2421_v28 = vsub.f32 %v6969_v53, %v7361_v35  ;;  %v2423_v30 = vsub.f32 %v8607_v27, %v7361_v35  ;;  %v8609_v27 = vld [vmem:[#allocation100_spill] sm:$0xff] }
 0x450   : > { %v3533_v0 = vadd.f32 %v3532_v60, %v3531_v54  ;;  %v2319_v16 = vsel %vm2044_vm1, %v7678_v8, -inf  ;;  %v4546_v21 = vpop.eup %4545  ;;  %v2627_v34 = vmul.f32 1.442695, %v2420_v57  ;;  %v2422_v41 = vsub.f32 %v8608_v62, %v7361_v35  ;;  %v8611_v62 = vld [vmem:[#allocation101_spill] sm:$0xff] }
 0x451   : > { %v7696_v25 = vmax.f32 %v2318_v51, %v2319_v16  ;;  %v2625_v22 = vmul.f32 1.442695, %v2419_v56  ;;  %v3832_v19 = vsel %vm2044_vm1, %v4546_v21, 0.0  ;;  %v3313_v53 = vmul.f32 %v4546_v21, %v7591_v32  ;;  %v3018_v51 = vpop.permute.xlu1 %3017  ;;  %v1529_v56 = vld [vmem:[#allocation2 + $0x190] sm:$0xff]  ;;  %v7715_v16 = vld [vmem:[#allocation2 + $0x38] sm:$0xff] }
 0x452   : > { %v4548_v36 = vpop.eup %4547  ;;  %v2629_v20 = vmul.f32 1.442695, %v2421_v28  ;;  %v2633_v29 = vmul.f32 1.442695, %v2423_v30  ;;  %4549 = vpow2.f32 %v2627_v34  ;;  %v1638_v10 = vadd.f32 %v5681_v24, %v1508_v46  ;;  %v3016_v46 = vpop.permute.xlu0 %3015  ;;  %3075 = vrot.lane.b32.xlu0 %v7715_v16, %s4815_s4 }
 0x453   : > { %v3830_v58 = vsel %vm2044_vm1, %v4548_v36, 0.0  ;;  %v3312_v37 = vmul.f32 %v4548_v36, %v7606_v31  ;;  %v3536_v52 = vsel %vm2044_vm1, %v3313_v53, 0.0  ;;  %4551 = vpow2.f32 %v2625_v22  ;;  %v1525_v22 = vld [vmem:[#allocation2] sm:$0xff] }
 0x454   : > { %v3831_v60 = vadd.f32 %v3830_v58, %v3829_v23  ;;  %4553 = vpow2.f32 %v2629_v20  ;;  %vm1894_vm7 = vcmp.gt.f32.partialorder %v1766_v50, 0.5  ;;  %v2285_v32 = vmax.f32 %v7647_v3, %v7615_v15  ;;  %v8610_v15 = vld [vmem:[#allocation95_spill] sm:$0xff] }
 0x455   : > { %v3534_v54 = vsel %vm2044_vm1, %v3312_v37, 0.0  ;;  %v7713_v7 = vsel %vm1894_vm7, %v1638_v10, -100000.0  ;;  %4555 = vpow2.f32 %v2633_v29  ;;  %v2631_v28 = vmul.f32 1.442695, %v2422_v41  ;;  %3107 = vrot.lane.b32.xlu1 %v1529_v56, %s4815_s4  ;;  %v3020_v29 = vpop.permute.xlu2 %3019  ;;  %3099 = vrot.lane.b32.xlu2 %v1525_v22, %s4815_s4 }
 0x456   : > { %v3833_v31 = vadd.f32 %v3832_v19, %v3831_v60  ;;  %v3535_v57 = vadd.f32 %v3534_v54, %v3533_v0  ;;  %v2286_v23 = vsel %vm2044_vm1, %v7713_v7, -inf  ;;  %v2424_v30 = vsub.f32 %v8609_v27, %v7361_v35  ;;  %v1786_v60 = vld [vmem:[%s5012_s16 + $0x3f0] sm:$0xff] }
 0x457   : > { %v2426_v3 = vsub.f32 %v8610_v15, %v7361_v35  ;;  %v7727_v34 = vmax.f32 %v2285_v32, %v2286_v23  ;;  %v7733_v19 = vsel %vm2044_vm1, %v7635_v61, -inf  ;;  %v7737_v53 = vsel %vm2044_vm1, %v7668_v1, -inf }
 0x458   : > { %v3537_v0 = vadd.f32 %v3536_v52, %v3535_v57  ;;  %v3835_v21 = vadd.f32 %v7288_v42, %v3833_v31  ;;  %v4550_v36 = vpop.eup %4549  ;;  %4557 = vpow2.f32 %v2631_v28  ;;  %v2635_v20 = vmul.f32 1.442695, %v2424_v30  ;;  %v1511_v42 = vld [vmem:[#allocation2 + $0x378] sm:$0xff]  ;;  %v1770_v57 = vld [vmem:[%s5012_s16 + $0x370] sm:$0xff] }
 0x459   : > { %v4552_v58 = vpop.eup %4551  ;;  %v7743_v50 = vsel %vm2044_vm1, %v7676_v17, -inf  ;;  %v3316_v52 = vmul.f32 %v4550_v36, %v7659_v39  ;;  %v3838_v54 = vsel %vm2044_vm1, %v4550_v36, 0.0  ;;  %v7754_v27 = vadd.f32 %v5681_v24, %v1511_v42 }
 0x45a   : > { %v3539_v37 = vadd.f32 %v7651_v12, %v3537_v0  ;;  %v4554_v10 = vpop.eup %4553  ;;  %v3836_v32 = vsel %vm2044_vm1, %v4552_v58, 0.0  ;;  %v3315_v31 = vmul.f32 %v4552_v58, %v7665_v44  ;;  %4559 = vpow2.f32 %v2635_v20  ;;  %v1783_v44 = vld [vmem:[%s5012_s16 + $0x3d8] sm:$0xff] }
 0x45b   : > { %v4556_v12 = vpop.eup %4555  ;;  %v3837_v23 = vadd.f32 %v3836_v32, %v3835_v21  ;;  %v3317_v28 = vmul.f32 %v4554_v10, %v7684_v40  ;;  %v7756_v39 = vmul.f32 1.442695, %v2426_v3  ;;  %v3542_v30 = vsel %vm2044_vm1, %v3316_v52, 0.0 }
 0x45c   : > { %v3540_v15 = vsel %vm2044_vm1, %v3315_v31, 0.0  ;;  %v1642_v0 = vadd.f32 %v5681_v24, %v7672_v38  ;;  %v3319_v36 = vmul.f32 %v4556_v12, %v3018_v51  ;;  %v3846_v21 = vsel %vm2044_vm1, %v4554_v10, 0.0  ;;  %v7767_v31 = vpop.permute.xlu1 %3023 }
 0x45d   : > { %v3839_v58 = vadd.f32 %v3838_v54, %v3837_v23  ;;  %v3541_v20 = vadd.f32 %v3540_v15, %v3539_v37  ;;  %vm1898_vm8 = vcmp.gt.f32.partialorder %v1770_v57, 0.5  ;;  %v3550_v32 = vsel %vm2044_vm1, %v3317_v28, 0.0  ;;  %v1785_v23 = vld [vmem:[%s5012_s16 + $0x3e8] sm:$0xff]  ;;  %v7775_v15 = vpop.permute.xlu0 %3021  ;;  %3071 = vrot.lane.b32.xlu2 %v1511_v42, %s4815_s4 }
 0x45e   : > { %v4558_v40 = vpop.eup %4557  ;;  %v3849_v3 = vsel %vm2044_vm1, %v4556_v12, 0.0  ;;  %v1655_v52 = vadd.f32 %v5681_v24, %v1525_v22  ;;  %vm1911_vm9 = vcmp.gt.f32.partialorder %v1783_v44, 0.5  ;;  %v1657_v10 = vadd.f32 %v5681_v24, %v7674_v33 }
 0x45f   : > { %v3840_v41 = vrot.slane %v3839_v58, 4  ;;  %v3543_v38 = vadd.f32 %v3542_v30, %v3541_v20  ;;  %v3847_v51 = vsel %vm2044_vm1, %v4558_v40, 0.0  ;;  %v3318_v54 = vmul.f32 %v4558_v40, %v3016_v46  ;;  %v1528_v40 = vld [vmem:[#allocation2 + $0x310] sm:$0xff] }
 0x460   : > { %v4560_v37 = vpop.eup %4559  ;;  %v3553_v28 = vsel %vm2044_vm1, %v3319_v36, 0.0  ;;  %v3848_v12 = vadd.f32 %v3847_v51, %v3846_v21  ;;  %v1659_v22 = vadd.f32 %v5681_v24, %v1529_v56  ;;  %vm1913_vm10 = vcmp.gt.f32.partialorder %v1785_v23, 0.5  ;;  %v1787_v36 = vld [vmem:[%s5012_s16 + $0x3f8] sm:$0xff]  ;;  %v7785_v56 = vpop.permute.xlu2 %3025 }
 0x461   : > { %v3841_v30 = vadd.f32 %v3840_v41, %v3839_v58  ;;  %v3544_v20 = vrot.slane %v3543_v38, 4  ;;  %v3551_v46 = vsel %vm2044_vm1, %v3318_v54, 0.0  ;;  %v3851_v17 = vsel %vm2044_vm1, %v4560_v37, 0.0 }
 0x462   : > { %v3552_v45 = vadd.f32 %v3551_v46, %v3550_v32  ;;  %v3850_v33 = vadd.f32 %v3849_v3, %v3848_v12  ;;  %v7783_v21 = vsel %vm1911_vm9, %v1655_v52, -100000.0  ;;  %v7787_v41 = vsel %vm1913_vm10, %v1657_v10, -100000.0  ;;  %v1769_v52 = vld [vmem:[%s5012_s16 + $0x368] sm:$0xff] }
 0x463   : > { %v3842_v51 = vrot.slane %v3841_v30, 2  ;;  %v3545_v42 = vadd.f32 %v3544_v20, %v3543_v38  ;;  %8612 = vst [vmem:[#allocation118_spill] sm:$0xff] %v7787_v41  ;;  %v3320_v58 = vmul.f32 %v4560_v37, %v3020_v29  ;;  %v1658_v32 = vadd.f32 %v5681_v24, %v1528_v40  ;;  %v1771_v29 = vld [vmem:[%s5012_s16 + $0x378] sm:$0xff] }
 0x464   : > { %v7789_v54 = vadd.f32 %v3851_v17, %v3850_v33  ;;  %v3554_v23 = vadd.f32 %v3553_v28, %v3552_v45  ;;  %vm1914_vm12 = vcmp.gt.f32.partialorder %v1786_v60, 0.5  ;;  %vm1915_vm13 = vcmp.gt.f32.partialorder %v1787_v36, 0.5  ;;  %v7814_v33 = vpop.permute.xlu1 %3029 }
 0x465   : > { %v3843_v3 = vadd.f32 %v3842_v51, %v3841_v30  ;;  %v3546_v12 = vrot.slane %v3545_v42, 2  ;;  %v3555_v44 = vsel %vm2044_vm1, %v3320_v58, 0.0  ;;  %v7795_v46 = vsel %vm1898_vm8, %v1642_v0, -100000.0  ;;  %3105 = vrot.lane.b32.xlu2 %v1528_v40, %s4815_s4  ;;  %v7831_v40 = vpop.permute.xlu0 %3027 }
 0x466   : > { %8613 = vst [vmem:[#allocation94_spill] sm:$0xff] %v7795_v46  ;;  %v2329_v38 = vsel %vm2044_vm1, %v7787_v41, -inf  ;;  %v7799_v10 = vadd.f32 %v3555_v44, %v3554_v23  ;;  %v8614_v17 = vmax.f32 %v7696_v25, %v7595_v43  ;;  %v7806_v28 = vsel %vm1914_vm12, %v1658_v32, -100000.0 }
 0x467   : > { %v3844_v60 = vrot.slane %v3843_v3, 1  ;;  %v3547_v37 = vadd.f32 %v3546_v12, %v3545_v42  ;;  %v2325_v57 = vsel %vm2044_vm1, %v7783_v21, -inf  ;;  %v7810_v0 = vsel %vm1915_vm13, %v1659_v22, -100000.0 }
 0x468   : > { %v2324_v45 = vmax.f32 %v8614_v17, %v7733_v19  ;;  %v1643_v20 = vadd.f32 %v5681_v24, %v7715_v16  ;;  %vm1897_vm14 = vcmp.gt.f32.partialorder %v1769_v52, 0.5  ;;  %vm1899_vm15 = vcmp.gt.f32.partialorder %v1771_v29, 0.5  ;;  %v7843_v23 = vpop.permute.xlu2 %3031 }
 0x469   : > { %v7817_v43 = vadd.f32 %v3844_v60, %v3843_v3  ;;  %v3548_v25 = vrot.slane %v3547_v37, 1  ;;  %v7820_v19 = vsel %vm1897_vm14, %v7754_v27, -100000.0  ;;  %v8615_v24 = vmax.f32 %v7727_v34, %v7633_v26  ;;  %v8618_v60 = vld [vmem:[#allocation97_spill] sm:$0xff] }
 0x46a   : > { %v2326_v30 = vmax.f32 %v2324_v45, %v2325_v57  ;;  %v7823_v22 = vsel %vm1899_vm15, %v1643_v20, -100000.0  ;;  %v2292_v51 = vsel %vm2044_vm1, %v7820_v19, -inf  ;;  %v2294_v27 = vsel %vm2044_vm1, %v7795_v46, -inf  ;;  %v8619_v57 = vld [vmem:[#allocation106_spill] sm:$0xff] }
 0x46b   : > { %v2291_v16 = vmax.f32 %v8615_v24, %v7743_v50  ;;  %4561 = vrcp.f32 %v7817_v43  ;;  %v2333_v42 = vsel %vm2044_vm1, %v7810_v0, -inf  ;;  %vm4022_vm0 = vweird.f32 %v7817_v43 }
 0x46c   : > { %v2328_v36 = vmax.f32 %v2326_v30, %v7737_v53  ;;  %v2331_v53 = vsel %vm2044_vm1, %v7806_v28, -inf  ;;  %v4026_v26 = vand.u32 2147483647, %v7817_v43  ;;  %v4028_v34 = vand.u32 2147483648, %v7817_v43 }
 0x46d   : > { %v2293_v58 = vmax.f32 %v2291_v16, %v2292_v51  ;;  %v7845_v32 = vadd.f32 %v3548_v25, %v3547_v37  ;;  %v2296_v3 = vsel %vm2044_vm1, %v7823_v22, -inf  ;;  %4563 = vpow2.f32 %v7756_v39  ;;  %v8620_v39 = vld [vmem:[#allocation105_spill] sm:$0xff] }
 0x46e   : > { %v2330_v50 = vmax.f32 %v2328_v36, %v2329_v38  ;;  %v8616_v12 = vsub.f32 %v8611_v62, %v7361_v35  ;;  %v2427_v45 = vsub.f32 %v7131_v55, %v7361_v35  ;;  %v8617_v38 = vld [vmem:[#allocation98_spill] sm:$0xff]  ;;  %v2428_v37 = vsub.f32 %v8618_v60, %v7361_v35  ;;  %v7870_v60 = vpop.permute.xlu1 %3035 }
 0x46f   : > { %v2295_v17 = vmax.f32 %v2293_v58, %v2294_v27  ;;  %v2429_v29 = vsub.f32 %v8617_v38, %v7361_v35  ;;  %v2430_v30 = vsub.f32 %v8619_v57, %v7361_v35  ;;  %v2432_v20 = vsub.f32 %v8620_v39, %v7361_v35 }
 0x470   : > { %v2637_v44 = vmul.f32 1.442695, %v8616_v12  ;;  %v2332_v52 = vmax.f32 %v2330_v50, %v2331_v53  ;;  %vm7863_vm2 = vcmp.eq.f32.partialorder %v4026_v26, 8.507059e+37  ;;  %v2641_v55 = vmul.f32 1.442695, %v2427_v45  ;;  %v8623_v53 = vld [vmem:[#allocation102_spill] sm:$0xff]  ;;  %v7881_v46 = vpop.permute.xlu2 %3037 }
 0x471   : > { %v2297_v36 = vmax.f32 %v2295_v17, %v2296_v3  ;;  %v4562_v24 = vpop.eup %4561  ;;  %v4029_v16 = vor.u32 1.1754944e-38, %v4028_v34  ;;  %v2645_v51 = vmul.f32 1.442695, %v2429_v29  ;;  %v2643_v27 = vmul.f32 1.442695, %v2428_v37  ;;  %v8624_v34 = vld [vmem:[#allocation103_spill] sm:$0xff]  ;;  %v7876_v29 = vpop.permute.xlu0 %3033 }
 0x472   : > { %4565 = vpow2.f32 %v2637_v44  ;;  %v2334_v25 = vmax.f32 %v2332_v52, %v2333_v42  ;;  %v2431_v50 = vsub.f32 %v8623_v53, %v7361_v35  ;;  %v4018_v58 = vmul.f32 %v4562_v24, %v7817_v43  ;;  %v8627_v43 = vld [vmem:[#allocation104_spill] sm:$0xff] }
 0x473   : > { %v2298_v44 = vrot.slane %v2297_v36, 4  ;;  %v2647_v38 = vmul.f32 1.442695, %v2430_v30  ;;  %v4564_v26 = vpop.eup %4563  ;;  %4567 = vpow2.f32 %v2641_v55  ;;  %v2651_v57 = vmul.f32 1.442695, %v2432_v20 }
 0x474   : > { %v2335_v12 = vrot.slane %v2334_v25, 4  ;;  %v4019_v52 = vsub.f32 1.0, %v4018_v58  ;;  %vm4023_vm3 = vweird.f32 %v4562_v24  ;;  %v3855_v30 = vsel %vm2044_vm1, %v4564_v26, 0.0 }
 0x475   : > { %v2299_v45 = vmax.f32 %v2297_v36, %v2298_v44  ;;  %v3322_v39 = vmul.f32 %v4564_v26, %v7767_v31  ;;  %4569 = vpow2.f32 %v2645_v51  ;;  %v2649_v55 = vmul.f32 1.442695, %v2431_v50  ;;  %vm7885_vm4 = vmor %vm4022_vm0, %vm4023_vm3 }
 0x476   : > { %v2336_v17 = vmax.f32 %v2334_v25, %v2335_v12  ;;  %v4020_v20 = vmul.f32 %v4562_v24, %v4019_v52  ;;  %4571 = vpow2.f32 %v2643_v27  ;;  %v2434_v3 = vsub.f32 %v8627_v43, %v7361_v35 }
 0x477   : > { %v2300_v41 = vrot.slane %v2299_v45, 2  ;;  %v3559_v36 = vsel %vm2044_vm1, %v3322_v39, 0.0  ;;  %4573 = vpow2.f32 %v2647_v38  ;;  %v8628_v62 = vsub.f32 %v7292_v5, %v7361_v35 }
 0x478   : > { %v4566_v37 = vpop.eup %4565  ;;  %v2337_v53 = vrot.slane %v2336_v17, 2  ;;  %v4021_v51 = vadd.f32 %v4562_v24, %v4020_v20  ;;  %4575 = vpow2.f32 %v2651_v57 }
 0x479   : > { %v3853_v42 = vsel %vm2044_vm1, %v4566_v37, 0.0  ;;  %v3321_v31 = vmul.f32 %v4566_v37, %v7775_v15  ;;  %v2301_v12 = vmax.f32 %v2299_v45, %v2300_v41  ;;  %v4568_v44 = vpop.eup %4567  ;;  %4577 = vpow2.f32 %v2649_v55  ;;  %v7907_v37 = vpop.permute.xlu1 %3041 }
 0x47a   : > { %v3854_v58 = vadd.f32 %v3853_v42, %v7789_v54  ;;  %v2338_v50 = vmax.f32 %v2336_v17, %v2337_v53  ;;  %v4025_v39 = vsel %vm7885_vm4, %v4562_v24, %v4021_v51  ;;  %v3857_v38 = vsel %vm2044_vm1, %v4568_v44, 0.0  ;;  %v7918_v53 = vpop.permute.xlu0 %3039 }
 0x47b   : > { %v3557_v26 = vsel %vm2044_vm1, %v3321_v31, 0.0  ;;  %v2302_v54 = vrot.slane %v2301_v12, 1  ;;  %v4570_v27 = vpop.eup %4569  ;;  %v4030_v41 = vsel %vm7863_vm2, %v4029_v16, %v4025_v39  ;;  %v3323_v42 = vmul.f32 %v4568_v44, %v7785_v56 }
 0x47c   : > { %v3856_v52 = vadd.f32 %v3855_v30, %v3854_v58  ;;  %v2339_v1 = vrot.slane %v2338_v50, 1  ;;  %v3558_v15 = vadd.f32 %v3557_v26, %v7799_v10  ;;  %v4031_v57 = vmul.f32 %v4030_v41, %v7845_v32  ;;  %v4572_v10 = vpop.eup %4571 }
 0x47d   : > { %v7905_v45 = vmax.f32 %v2301_v12, %v2302_v54  ;;  %v2659_v16 = vmul.f32 1.442695, %v8628_v62  ;;  %v3561_v20 = vsel %vm2044_vm1, %v3323_v42, 0.0  ;;  %v4574_v56 = vpop.eup %4573  ;;  %v3861_v31 = vsel %vm2044_vm1, %v4570_v27, 0.0 }
 0x47e   : > { %v7903_v17 = vmax.f32 %v2338_v50, %v2339_v1  ;;  %v3858_v24 = vadd.f32 %v3857_v38, %v3856_v52  ;;  %v3560_v30 = vadd.f32 %v3559_v36, %v3558_v15  ;;  %v4083_v55 = vadd.f32 %v6407_v14, %v4031_v57  ;;  %v4576_v25 = vpop.eup %4575 }
 0x47f   : > { %v2452_v32 = vsub.f32 %v7823_v22, %v7905_v45  ;;  %v3325_v5 = vmul.f32 %v4570_v27, %v7814_v33  ;;  %v3859_v36 = vsel %vm2044_vm1, %v4572_v10, 0.0  ;;  %v3324_v12 = vmul.f32 %v4572_v10, %v7831_v40  ;;  %v4578_v44 = vpop.eup %4577 }
 0x480   : > { %v2468_v1 = vsub.f32 %v7810_v0, %v7903_v17  ;;  %v3562_v58 = vadd.f32 %v3561_v20, %v3560_v30  ;;  %4092 = vst.msk [vmem:[%s5007_s11 + $0x4] sm:$0x1] %vm4087_vm11, %v4083_v55  ;;  %v3860_v50 = vadd.f32 %v3859_v36, %v3858_v24  ;;  %v3044_v0 = vpop.permute.xlu2 %3043  ;;  %4579 = vpow2.f32 %v2659_v16 }
 0x481   : > { %v3863_v22 = vsel %vm2044_vm1, %v4574_v56, 0.0  ;;  %v3326_v26 = vmul.f32 %v4574_v56, %v7843_v23  ;;  %v2691_v52 = vmul.f32 1.442695, %v2452_v32  ;;  %v3563_v43 = vsel %vm2044_vm1, %v3324_v12, 0.0  ;;  %v7943_v30 = vpop.permute.xlu1 %3047 }
 0x482   : > { %v2723_v51 = vmul.f32 1.442695, %v2468_v1  ;;  %v3862_v39 = vadd.f32 %v3861_v31, %v3860_v50  ;;  %v8629_v33 = vsub.f32 %v7244_v13, %v7361_v35  ;;  %v2464_v15 = vsub.f32 %v7783_v21, %v7903_v17 }
 0x483   : > { %v3565_v40 = vsel %vm2044_vm1, %v3325_v5, 0.0  ;;  %v3564_v27 = vadd.f32 %v3563_v43, %v3562_v58  ;;  %v8630_v41 = vsub.f32 %v8624_v34, %v7361_v35  ;;  %v3567_v42 = vsel %vm2044_vm1, %v3326_v26, 0.0  ;;  %v7945_v35 = vpop.permute.xlu0 %3045  ;;  %v8633_v26 = vld [vmem:[#allocation108_spill] sm:$0xff] }
 0x484   : > { %v2653_v54 = vmul.f32 1.442695, %v8629_v33  ;;  %4581 = vpow2.f32 %v2723_v51  ;;  %v3864_v23 = vadd.f32 %v3863_v22, %v3862_v39  ;;  %v3867_v57 = vsel %vm2044_vm1, %v4576_v25, 0.0 }
 0x485   : > { %v2657_v38 = vmul.f32 1.442695, %v8630_v41  ;;  %v3566_v24 = vadd.f32 %v3565_v40, %v3564_v27  ;;  %v3328_v13 = vmul.f32 %v4576_v25, %v7870_v60  ;;  %v3865_v10 = vsel %vm2044_vm1, %v4578_v44, 0.0  ;;  %v8631_v60 = vld [vmem:[#allocation112_spill] sm:$0xff] }
 0x486   : > { %v3327_v21 = vmul.f32 %v4578_v44, %v7876_v29  ;;  %4583 = vpow2.f32 %v2691_v52  ;;  %v3866_v62 = vadd.f32 %v3865_v10, %v3864_v23  ;;  %v2655_v16 = vmul.f32 1.442695, %v2434_v3  ;;  %v4580_v34 = vpop.eup %4579  ;;  %v8632_v29 = vld [vmem:[#allocation107_spill] sm:$0xff] }
 0x487   : > { %v2715_v20 = vmul.f32 1.442695, %v2464_v15  ;;  %v3568_v56 = vadd.f32 %v3567_v42, %v3566_v24  ;;  %4585 = vpow2.f32 %v2653_v54  ;;  %v2438_v32 = vsub.f32 %v8631_v60, %v7905_v45 }
 0x488   : > { %v3569_v55 = vsel %vm2044_vm1, %v3327_v21, 0.0  ;;  %v3868_v1 = vadd.f32 %v3867_v57, %v3866_v62  ;;  %4587 = vpow2.f32 %v2657_v38  ;;  %v2437_v25 = vsub.f32 %v8632_v29, %v7905_v45  ;;  %v7952_v58 = vpop.permute.xlu2 %3049 }
 0x489   : > { %v3571_v3 = vsel %vm2044_vm1, %v3328_v13, 0.0  ;;  %v3570_v31 = vadd.f32 %v3569_v55, %v3568_v56  ;;  %4589 = vpow2.f32 %v2655_v16  ;;  %v3332_v36 = vmul.f32 %v4580_v34, %v3044_v0  ;;  %v3080_v23 = vpop.permute.xlu1 %3079 }
 0x48a   : > { %v7955_v5 = vpop.eup %4581  ;;  %v2663_v51 = vmul.f32 1.442695, %v2438_v32  ;;  %v2661_v50 = vmul.f32 1.442695, %v2437_v25  ;;  %v2439_v12 = vsub.f32 %v7333_v48, %v7905_v45  ;;  %4591 = vpow2.f32 %v2715_v20  ;;  %v8634_v32 = vld [vmem:[#allocation109_spill] sm:$0xff] }
 0x48b   : > { %v3572_v44 = vadd.f32 %v3571_v3, %v3570_v31  ;;  %v2454_v22 = vsub.f32 %v7218_v49, %v7903_v17  ;;  %v2453_v52 = vsub.f32 %v8633_v26, %v7903_v17  ;;  %v3875_v39 = vsel %vm2044_vm1, %v4580_v34, 0.0  ;;  %v3078_v42 = vpop.permute.xlu0 %3077 }
 0x48c   : > { %v7963_v43 = vpop.eup %4583  ;;  %4593 = vpow2.f32 %v2663_v51  ;;  %v2665_v33 = vmul.f32 1.442695, %v2439_v12  ;;  %v2455_v0 = vsub.f32 %v7441_v2, %v7903_v17  ;;  %v2450_v48 = vsub.f32 %v7820_v19, %v7905_v45 }
 0x48d   : > { %v4586_v54 = vpop.eup %4585  ;;  %4595 = vpow2.f32 %v2661_v50  ;;  %v2695_v15 = vmul.f32 1.442695, %v2454_v22  ;;  %v2693_v40 = vmul.f32 1.442695, %v2453_v52  ;;  %v3579_v38 = vsel %vm2044_vm1, %v3332_v36, 0.0 }
 0x48e   : > { %v4588_v49 = vpop.eup %4587  ;;  %v3869_v27 = vsel %vm2044_vm1, %v4586_v54, 0.0  ;;  %v3329_v41 = vmul.f32 %v4586_v54, %v7881_v46  ;;  %4597 = vpow2.f32 %v2665_v33  ;;  %v2697_v13 = vmul.f32 1.442695, %v2455_v0 }
 0x48f   : > { %v4590_v57 = vpop.eup %4589  ;;  %v3870_v24 = vadd.f32 %v3869_v27, %v3868_v1  ;;  %v3331_v2 = vmul.f32 %v4588_v49, %v7907_v37  ;;  %4599 = vpow2.f32 %v2695_v15  ;;  %v3873_v21 = vsel %vm2044_vm1, %v4588_v49, 0.0 }
 0x490   : > { %v3573_v10 = vsel %vm2044_vm1, %v3329_v41, 0.0  ;;  %v3871_v62 = vsel %vm2044_vm1, %v4590_v57, 0.0  ;;  %v3330_v16 = vmul.f32 %v4590_v57, %v7918_v53  ;;  %v3082_v46 = vpop.permute.xlu2 %3081  ;;  %v7978_v34 = vpop.eup %4591  ;;  %4601 = vpow2.f32 %v2693_v40 }
 0x491   : > { %v3574_v20 = vadd.f32 %v3573_v10, %v3572_v44  ;;  %v3577_v56 = vsel %vm2044_vm1, %v3331_v2, 0.0  ;;  %v3872_v55 = vadd.f32 %v3871_v62, %v3870_v24  ;;  %v2456_v60 = vsub.f32 %v7294_v59, %v7903_v17  ;;  %v3084_v15 = vpop.permute.xlu1 %3083 }
 0x492   : > { %v4594_v1 = vpop.eup %4593  ;;  %v3575_v37 = vsel %vm2044_vm1, %v3330_v16, 0.0  ;;  %v2440_v29 = vsub.f32 %v8634_v32, %v7905_v45  ;;  %v2441_v53 = vsub.f32 %v7504_v9, %v7905_v45  ;;  %4603 = vpow2.f32 %v2697_v13 }
 0x493   : > { %v4596_v25 = vpop.eup %4595  ;;  %v3874_v3 = vadd.f32 %v3873_v21, %v3872_v55  ;;  %v3576_v31 = vadd.f32 %v3575_v37, %v3574_v20  ;;  %v3334_v36 = vmul.f32 %v4594_v1, %v7943_v30  ;;  %v2699_v12 = vmul.f32 1.442695, %v2456_v60  ;;  %v7993_v30 = vpop.permute.xlu0 %3051 }
 0x494   : > { %v4598_v51 = vpop.eup %4597  ;;  %v3333_v50 = vmul.f32 %v4596_v25, %v7945_v35  ;;  %v2667_v44 = vmul.f32 1.442695, %v2440_v29  ;;  %v2669_v22 = vmul.f32 1.442695, %v2441_v53  ;;  %v2442_v35 = vsub.f32 %v7376_v6, %v7905_v45 }
 0x495   : > { %v4600_v26 = vpop.eup %4599  ;;  %v3876_v59 = vadd.f32 %v3875_v39, %v3874_v3  ;;  %v3578_v52 = vadd.f32 %v3577_v56, %v3576_v31  ;;  %v3588_v33 = vsel %vm2044_vm1, %v3334_v36, 0.0  ;;  %v3335_v0 = vmul.f32 %v4598_v51, %v7952_v58 }
 0x496   : > { %v3587_v9 = vsel %vm2044_vm1, %v3333_v50, 0.0  ;;  %v3350_v54 = vmul.f32 %v4600_v26, %v3080_v23  ;;  %4605 = vpow2.f32 %v2699_v12  ;;  %v4602_v40 = vpop.eup %4601  ;;  %v3884_v57 = vsel %vm2044_vm1, %v4594_v1, 0.0 }
 0x497   : > { %v3877_v49 = vrot.slane %v3876_v59, 4  ;;  %v3580_v27 = vadd.f32 %v3579_v38, %v3578_v52  ;;  %v3589_v41 = vadd.f32 %v3588_v33, %v3587_v9  ;;  %v3590_v39 = vsel %vm2044_vm1, %v3335_v0, 0.0 }
 0x498   : > { %v3883_v58 = vsel %vm2044_vm1, %v4596_v25, 0.0  ;;  %v3886_v24 = vsel %vm2044_vm1, %v4598_v51, 0.0  ;;  %v3921_v23 = vsel %vm2044_vm1, %v4600_v26, 0.0  ;;  %v8002_v2 = vpop.permute.xlu2 %3053  ;;  %v4604_v13 = vpop.eup %4603  ;;  %v3625_v38 = vsel %vm2044_vm1, %v3350_v54, 0.0  ;;  %v8635_v54 = vld [vmem:[#allocation114_spill] sm:$0xff] }
 0x499   : > { %v3878_v10 = vadd.f32 %v3877_v49, %v3876_v59  ;;  %v3581_v21 = vrot.slane %v3580_v27, 4  ;;  %v3885_v6 = vadd.f32 %v3884_v57, %v3883_v58  ;;  %v8004_v62 = vadd.f32 %v3590_v39, %v3589_v41  ;;  %v3056_v26 = vpop.permute.xlu1 %3055 }
 0x49a   : > { %v3920_v16 = vsel %vm2044_vm1, %v4602_v40, 0.0  ;;  %v3349_v20 = vmul.f32 %v4602_v40, %v3078_v42  ;;  %v3923_v56 = vsel %vm2044_vm1, %v4604_v13, 0.0  ;;  %v3351_v53 = vmul.f32 %v4604_v13, %v3082_v46 }
 0x49b   : > { %v3879_v55 = vrot.slane %v3878_v10, 2  ;;  %v3582_v1 = vadd.f32 %v3581_v21, %v3580_v27  ;;  %v3887_v37 = vadd.f32 %v3886_v24, %v3885_v6  ;;  %v3922_v60 = vadd.f32 %v3921_v23, %v3920_v16  ;;  %v3086_v59 = vpop.permute.xlu0 %3085  ;;  %v8636_v27 = vld [vmem:[#allocation117_spill] sm:$0xff]  ;;  %v8637_v24 = vld [vmem:[#allocation110_spill] sm:$0xff] }
 0x49c   : > { %v4606_v32 = vpop.eup %4605  ;;  %v3624_v29 = vsel %vm2044_vm1, %v3349_v20, 0.0  ;;  %4607 = vpow2.f32 %v2667_v44  ;;  %v2671_v25 = vmul.f32 1.442695, %v2442_v35  ;;  %v3627_v50 = vsel %vm2044_vm1, %v3351_v53, 0.0 }
 0x49d   : > { %v3880_v3 = vadd.f32 %v3879_v55, %v3878_v10  ;;  %v3583_v31 = vrot.slane %v3582_v1, 2  ;;  %v3626_v36 = vadd.f32 %v3625_v38, %v3624_v29  ;;  %v3924_v51 = vadd.f32 %v3923_v56, %v3922_v60 }
 0x49e   : > { %v3925_v42 = vsel %vm2044_vm1, %v4606_v32, 0.0  ;;  %v3352_v12 = vmul.f32 %v4606_v32, %v3084_v15  ;;  %4609 = vpow2.f32 %v2669_v22  ;;  %v2457_v44 = vsub.f32 %v7393_v47, %v7903_v17 }
 0x49f   : > { %v3881_v52 = vrot.slane %v3880_v3, 1  ;;  %v3584_v33 = vadd.f32 %v3583_v31, %v3582_v1  ;;  %v3628_v0 = vadd.f32 %v3627_v50, %v3626_v36  ;;  %v3926_v9 = vadd.f32 %v3925_v42, %v3924_v51 }
 0x4a0   : > { %v3629_v46 = vsel %vm2044_vm1, %v3352_v12, 0.0  ;;  %4611 = vpow2.f32 %v2671_v25  ;;  %v2458_v35 = vsub.f32 %v8635_v54, %v7903_v17  ;;  %v3088_v40 = vpop.permute.xlu2 %3087  ;;  %v2459_v41 = vsub.f32 %v8636_v27, %v7903_v17 }
 0x4a1   : > { %v8017_v49 = vadd.f32 %v3881_v52, %v3880_v3  ;;  %v3585_v15 = vrot.slane %v3584_v33, 1  ;;  %v8019_v22 = vadd.f32 %v3629_v46, %v3628_v0  ;;  %v2701_v57 = vmul.f32 1.442695, %v2457_v44  ;;  %v3090_v29 = vpop.permute.xlu1 %3089  ;;  %v8641_v44 = vld [vmem:[#allocation113_spill] sm:$0xff] }
 0x4a2   : > { %v4608_v39 = vpop.eup %4607  ;;  %v2703_v58 = vmul.f32 1.442695, %v2458_v35  ;;  %v2443_v23 = vsub.f32 %v8637_v24, %v7905_v45  ;;  %v2444_v47 = vsub.f32 %v7617_v63, %v7905_v45  ;;  %v8030_v13 = vmul.f32 1.442695, %v2450_v48 }
 0x4a3   : > { %v2467_v10 = vsub.f32 %v7806_v28, %v7903_v17  ;;  %4613 = vrcp.f32 %v8017_v49  ;;  %v4043_v21 = vand.u32 2147483648, %v8017_v49  ;;  %vm4037_vm5 = vweird.f32 %v8017_v49  ;;  %v3058_v53 = vpop.permute.xlu0 %3057 }
 0x4a4   : > { %v4610_v6 = vpop.eup %4609  ;;  %v4041_v38 = vand.u32 2147483647, %v8017_v49  ;;  %v3888_v16 = vsel %vm2044_vm1, %v4608_v39, 0.0  ;;  %v3336_v63 = vmul.f32 %v4608_v39, %v7993_v30  ;;  %4615 = vpow2.f32 %v2701_v57 }
 0x4a5   : > { %v8040_v19 = vor.u32 1.1754944e-38, %v4043_v21  ;;  %v8042_v48 = vadd.f32 %v3585_v15, %v3584_v33  ;;  %v3889_v20 = vadd.f32 %v3888_v16, %v3887_v37  ;;  %v3890_v56 = vsel %vm2044_vm1, %v4610_v6, 0.0 }
 0x4a6   : > { %v4612_v55 = vpop.eup %4611  ;;  %v3592_v1 = vsel %vm2044_vm1, %v3336_v63, 0.0  ;;  %v3337_v60 = vmul.f32 %v4610_v6, %v8002_v2  ;;  %4617 = vpow2.f32 %v2703_v58  ;;  %v2705_v32 = vmul.f32 1.442695, %v2459_v41 }
 0x4a7   : > { %v3593_v25 = vadd.f32 %v3592_v1, %v8004_v62  ;;  %v3891_v30 = vadd.f32 %v3890_v56, %v3889_v20  ;;  %v3892_v3 = vsel %vm2044_vm1, %v4612_v55, 0.0  ;;  %v3338_v31 = vmul.f32 %v4612_v55, %v3056_v26  ;;  %v8640_v62 = vld [vmem:[#allocation111_spill] sm:$0xff] }
 0x4a8   : > { %vm8049_vm6 = vcmp.eq.f32.partialorder %v4041_v38, 8.507059e+37  ;;  %v3594_v37 = vsel %vm2044_vm1, %v3337_v60, 0.0  ;;  %4619 = vpow2.f32 %v2705_v32  ;;  %v2673_v51 = vmul.f32 1.442695, %v2443_v23  ;;  %v3060_v2 = vpop.permute.xlu2 %3059 }
 0x4a9   : > { %v2675_v50 = vmul.f32 1.442695, %v2444_v47  ;;  %v4614_v42 = vpop.eup %4613  ;;  %v3595_v12 = vadd.f32 %v3594_v37, %v3593_v25  ;;  %v3893_v52 = vadd.f32 %v3892_v3, %v3891_v30  ;;  %v3596_v33 = vsel %vm2044_vm1, %v3338_v31, 0.0 }
 0x4aa   : > { %v2445_v0 = vsub.f32 %v8640_v62, %v7905_v45  ;;  %v4616_v46 = vpop.eup %4615  ;;  %v4033_v26 = vmul.f32 %v4614_v42, %v8017_v49  ;;  %vm4038_vm7 = vweird.f32 %v4614_v42  ;;  %4621 = vpow2.f32 %v2673_v51 }
 0x4ab   : > { %v2460_v54 = vsub.f32 %v8641_v44, %v7903_v17  ;;  %v3597_v35 = vadd.f32 %v3596_v33, %v3595_v12  ;;  %v3927_v15 = vsel %vm2044_vm1, %v4616_v46, 0.0  ;;  %v3353_v27 = vmul.f32 %v4616_v46, %v3086_v59  ;;  %v3062_v59 = vpop.permute.xlu1 %3061  ;;  %v3092_v56 = vpop.permute.xlu0 %3091  ;;  %vm8069_vm8 = vmor %vm4037_vm5, %vm4038_vm7 }
 0x4ac   : > { %4623 = vpow2.f32 %v2675_v50  ;;  %v4618_v41 = vpop.eup %4617  ;;  %v4034_v39 = vsub.f32 1.0, %v4033_v26  ;;  %v3928_v57 = vadd.f32 %v3927_v15, %v3926_v9  ;;  %v2677_v58 = vmul.f32 1.442695, %v2445_v0 }
 0x4ad   : > { %v2707_v24 = vmul.f32 1.442695, %v2460_v54  ;;  %v3631_v23 = vsel %vm2044_vm1, %v3353_v27, 0.0  ;;  %v3929_v47 = vsel %vm2044_vm1, %v4618_v41, 0.0  ;;  %v3354_v21 = vmul.f32 %v4618_v41, %v3088_v40 }
 0x4ae   : > { %v2461_v6 = vsub.f32 %v7678_v8, %v7903_v17  ;;  %v4620_v38 = vpop.eup %4619  ;;  %v4035_v16 = vmul.f32 %v4614_v42, %v4034_v39  ;;  %v3632_v63 = vadd.f32 %v3631_v23, %v8019_v22  ;;  %v3930_v20 = vadd.f32 %v3929_v47, %v3928_v57 }
 0x4af   : > { %4625 = vpow2.f32 %v2677_v58  ;;  %v3633_v40 = vsel %vm2044_vm1, %v3354_v21, 0.0  ;;  %v3931_v55 = vsel %vm2044_vm1, %v4620_v38, 0.0  ;;  %v3355_v8 = vmul.f32 %v4620_v38, %v3090_v29 }
 0x4b0   : > { %4627 = vpow2.f32 %v2707_v24  ;;  %v4622_v1 = vpop.eup %4621  ;;  %v4036_v60 = vadd.f32 %v4614_v42, %v4035_v16  ;;  %v3634_v22 = vadd.f32 %v3633_v40, %v3632_v63  ;;  %v3932_v32 = vadd.f32 %v3931_v55, %v3930_v20  ;;  %v3094_v30 = vpop.permute.xlu2 %3093  ;;  %v8644_v20 = vld [vmem:[#allocation115_spill] sm:$0xff] }
 0x4b1   : > { %v2709_v25 = vmul.f32 1.442695, %v2461_v6  ;;  %v3635_v31 = vsel %vm2044_vm1, %v3355_v8, 0.0  ;;  %v3894_v49 = vsel %vm2044_vm1, %v4622_v1, 0.0  ;;  %v3339_v37 = vmul.f32 %v4622_v1, %v3058_v53 }
 0x4b2   : > { %v4624_v3 = vpop.eup %4623  ;;  %v2462_v51 = vsub.f32 %v7545_v11, %v7903_v17  ;;  %v4040_v50 = vsel %vm8069_vm8, %v4614_v42, %v4036_v60  ;;  %v3636_v29 = vadd.f32 %v3635_v31, %v3634_v22  ;;  %v3895_v12 = vadd.f32 %v3894_v49, %v3893_v52 }
 0x4b3   : > { %v3896_v33 = vsel %vm2044_vm1, %v4624_v3, 0.0  ;;  %v4045_v62 = vsel %vm8049_vm6, %v8040_v19, %v4040_v50  ;;  %v3598_v0 = vsel %vm2044_vm1, %v3339_v37, 0.0  ;;  %v3340_v46 = vmul.f32 %v4624_v3, %v3060_v2 }
 0x4b4   : > { %4629 = vpow2.f32 %v2709_v25  ;;  %v4046_v53 = vmul.f32 %v4045_v62, %v8042_v48  ;;  %v3599_v44 = vadd.f32 %v3598_v0, %v3597_v35  ;;  %v3897_v11 = vadd.f32 %v3896_v33, %v3895_v12  ;;  %v3096_v48 = vpop.permute.xlu1 %3095  ;;  %v3064_v35 = vpop.permute.xlu0 %3063 }
 0x4b5   : > { %v4626_v26 = vpop.eup %4625  ;;  %v2711_v54 = vmul.f32 1.442695, %v2462_v51  ;;  %v3600_v52 = vsel %vm2044_vm1, %v3340_v46, 0.0  ;;  %v2446_v19 = vsub.f32 %v7598_v4, %v7905_v45  ;;  %v2447_v4 = vsub.f32 %v7713_v7, %v7905_v45 }
 0x4b6   : > { %v4628_v42 = vpop.eup %4627  ;;  %v3898_v15 = vsel %vm2044_vm1, %v4626_v26, 0.0  ;;  %v3341_v27 = vmul.f32 %v4626_v26, %v3062_v59  ;;  %v4084_v36 = vadd.f32 %v6407_v14, %v4046_v53  ;;  %v3601_v2 = vadd.f32 %v3600_v52, %v3599_v44 }
 0x4b7   : > { %v3899_v41 = vadd.f32 %v3898_v15, %v3897_v11  ;;  %v3933_v39 = vsel %vm2044_vm1, %v4628_v42, 0.0  ;;  %v3356_v24 = vmul.f32 %v4628_v42, %v3092_v56  ;;  %4631 = vpow2.f32 %v2711_v54  ;;  %v8645_v56 = vld [vmem:[#allocation116_spill] sm:$0xff] }
 0x4b8   : > { %v3602_v57 = vsel %vm2044_vm1, %v3341_v27, 0.0  ;;  %v3934_v58 = vadd.f32 %v3933_v39, %v3932_v32  ;;  %4093 = vst.msk [vmem:[%s5007_s11 + $0x5] sm:$0x1] %vm4087_vm11, %v4084_v36  ;;  %v2679_v47 = vmul.f32 1.442695, %v2446_v19  ;;  %v3066_v21 = vpop.permute.xlu2 %3065  ;;  %v2448_v6 = vsub.f32 %v7610_v18, %v7905_v45  ;;  %v8646_v32 = vld [vmem:[#allocation94_spill] sm:$0xff] }
 0x4b9   : > { %v3603_v23 = vadd.f32 %v3602_v57, %v3601_v2  ;;  %v3637_v16 = vsel %vm2044_vm1, %v3356_v24, 0.0  ;;  %v2463_v63 = vsub.f32 %v7635_v61, %v7903_v17  ;;  %v2465_v59 = vsub.f32 %v8644_v20, %v7903_v17 }
 0x4ba   : > { %v4630_v38 = vpop.eup %4629  ;;  %v2449_v9 = vsub.f32 %v8645_v56, %v7905_v45  ;;  %v3638_v40 = vadd.f32 %v3637_v16, %v3636_v29  ;;  %4633 = vpow2.f32 %v2679_v47  ;;  %v2681_v1 = vmul.f32 1.442695, %v2447_v4 }
 0x4bb   : > { %v3935_v55 = vsel %vm2044_vm1, %v4630_v38, 0.0  ;;  %v3357_v7 = vmul.f32 %v4630_v38, %v3094_v30  ;;  %v2683_v18 = vmul.f32 1.442695, %v2448_v6  ;;  %v2713_v60 = vmul.f32 1.442695, %v2463_v63  ;;  %v8647_v30 = vld [vmem:[#allocation118_spill] sm:$0xff] }
 0x4bc   : > { %v3936_v8 = vadd.f32 %v3935_v55, %v3934_v58  ;;  %4635 = vpow2.f32 %v8030_v13  ;;  %v2717_v61 = vmul.f32 1.442695, %v2465_v59  ;;  %v2451_v25 = vsub.f32 %v8646_v32, %v7905_v45  ;;  %v3068_v13 = vpop.permute.xlu1 %3067  ;;  %v3098_v29 = vpop.permute.xlu0 %3097 }
 0x4bd   : > { %v3639_v22 = vsel %vm2044_vm1, %v3357_v7, 0.0  ;;  %v4632_v3 = vpop.eup %4631  ;;  %v2721_v31 = vmul.f32 1.442695, %v2467_v10  ;;  %4637 = vpow2.f32 %v2681_v1  ;;  %v2466_v37 = vsub.f32 %v8647_v30, %v7903_v17 }
 0x4be   : > { %v3640_v49 = vadd.f32 %v3639_v22, %v3638_v40  ;;  %v3937_v51 = vsel %vm2044_vm1, %v4632_v3, 0.0  ;;  %v3358_v50 = vmul.f32 %v4632_v3, %v3096_v48  ;;  %4639 = vpow2.f32 %v2683_v18 }
 0x4bf   : > { %v2685_v12 = vmul.f32 1.442695, %v2449_v9  ;;  %v3938_v33 = vadd.f32 %v3937_v51, %v3936_v8  ;;  %4641 = vpow2.f32 %v2713_v60  ;;  %v2689_v45 = vmul.f32 1.442695, %v2451_v25 }
 0x4c0   : > { %v4634_v62 = vpop.eup %4633  ;;  %v3641_v0 = vsel %vm2044_vm1, %v3358_v50, 0.0  ;;  %v3100_v28 = vpop.permute.xlu2 %3099  ;;  %4643 = vpow2.f32 %v2717_v61  ;;  %v2719_v10 = vmul.f32 1.442695, %v2466_v37  ;;  %v3941_v2 = vsel %vm2044_vm1, %v7978_v34, 0.0 }
 0x4c1   : > { %4645 = vpow2.f32 %v2721_v31  ;;  %v3642_v46 = vadd.f32 %v3641_v0, %v3640_v49  ;;  %v3900_v17 = vsel %vm2044_vm1, %v4634_v62, 0.0  ;;  %v3342_v26 = vmul.f32 %v4634_v62, %v3064_v35 }
 0x4c2   : > { %v4636_v53 = vpop.eup %4635  ;;  %v3901_v44 = vadd.f32 %v3900_v17, %v3899_v41  ;;  %4647 = vpow2.f32 %v2685_v12  ;;  %v3360_v42 = vmul.f32 %v7978_v34, %v3100_v28  ;;  %v3949_v62 = vsel %vm2044_vm1, %v7955_v5, 0.0 }
 0x4c3   : > { %v4638_v11 = vpop.eup %4637  ;;  %v3604_v54 = vsel %vm2044_vm1, %v3342_v26, 0.0  ;;  %4649 = vpow2.f32 %v2689_v45  ;;  %v3908_v57 = vsel %vm2044_vm1, %v4636_v53, 0.0 }
 0x4c4   : > { %v4640_v52 = vpop.eup %4639  ;;  %v3605_v15 = vadd.f32 %v3604_v54, %v3603_v23  ;;  %v3902_v27 = vsel %vm2044_vm1, %v4638_v11, 0.0  ;;  %v3343_v19 = vmul.f32 %v4638_v11, %v3066_v21  ;;  %4651 = vpow2.f32 %v2719_v10  ;;  %v3102_v47 = vpop.permute.xlu1 %3101 }
 0x4c5   : > { %v4642_v36 = vpop.eup %4641  ;;  %v3903_v39 = vadd.f32 %v3902_v27, %v3901_v44  ;;  %v3904_v41 = vsel %vm2044_vm1, %v4640_v52, 0.0  ;;  %v3344_v48 = vmul.f32 %v4640_v52, %v3068_v13  ;;  %v3070_v4 = vpop.permute.xlu0 %3069  ;;  %v3645_v59 = vsel %vm2044_vm1, %v3360_v42, 0.0 }
 0x4c6   : > { %v4644_v35 = vpop.eup %4643  ;;  %v3606_v58 = vsel %vm2044_vm1, %v3343_v19, 0.0  ;;  %v3939_v24 = vsel %vm2044_vm1, %v4642_v36, 0.0  ;;  %v3359_v23 = vmul.f32 %v4642_v36, %v3098_v29  ;;  %v3912_v29 = vsel %vm2044_vm1, %v7963_v43, 0.0 }
 0x4c7   : > { %v4646_v21 = vpop.eup %4645  ;;  %v3607_v6 = vadd.f32 %v3606_v58, %v3605_v15  ;;  %v3905_v38 = vadd.f32 %v3904_v41, %v3903_v39  ;;  %v3608_v16 = vsel %vm2044_vm1, %v3344_v48, 0.0  ;;  %v3940_v34 = vadd.f32 %v3939_v24, %v3938_v33 }
 0x4c8   : > { %v4648_v63 = vpop.eup %4647  ;;  %v3643_v20 = vsel %vm2044_vm1, %v3359_v23, 0.0  ;;  %v3943_v56 = vsel %vm2044_vm1, %v4644_v35, 0.0  ;;  %v3361_v9 = vmul.f32 %v4644_v35, %v3102_v47  ;;  %v3072_v40 = vpop.permute.xlu2 %3071  ;;  %v3947_v37 = vsel %vm2044_vm1, %v4646_v21, 0.0 }
 0x4c9   : > { %v4650_v55 = vpop.eup %4649  ;;  %v3609_v7 = vadd.f32 %v3608_v16, %v3607_v6  ;;  %v3942_v8 = vadd.f32 %v3941_v2, %v3940_v34  ;;  %v3644_v1 = vadd.f32 %v3643_v20, %v3642_v46  ;;  %v3906_v18 = vsel %vm2044_vm1, %v4648_v63, 0.0 }
 0x4ca   : > { %v4652_v60 = vpop.eup %4651  ;;  %v3647_v22 = vsel %vm2044_vm1, %v3361_v9, 0.0  ;;  %v3907_v61 = vadd.f32 %v3906_v18, %v3905_v38  ;;  %v3345_v32 = vmul.f32 %v4648_v63, %v3070_v4  ;;  %v3346_v25 = vmul.f32 %v4636_v53, %v3072_v40 }
 0x4cb   : > { %v3646_v3 = vadd.f32 %v3645_v59, %v3644_v1  ;;  %v3944_v31 = vadd.f32 %v3943_v56, %v3942_v8  ;;  %v3910_v49 = vsel %vm2044_vm1, %v4650_v55, 0.0  ;;  %v3945_v30 = vsel %vm2044_vm1, %v4652_v60, 0.0 }
 0x4cc   : > { %v3909_v51 = vadd.f32 %v3908_v57, %v3907_v61  ;;  %v3610_v50 = vsel %vm2044_vm1, %v3345_v32, 0.0  ;;  %v3612_v13 = vsel %vm2044_vm1, %v3346_v25, 0.0  ;;  %v3074_v28 = vpop.permute.xlu1 %3073 }
 0x4cd   : > { %v3648_v12 = vadd.f32 %v3647_v22, %v3646_v3  ;;  %v3611_v33 = vadd.f32 %v3610_v50, %v3609_v7  ;;  %v3946_v45 = vadd.f32 %v3945_v30, %v3944_v31  ;;  %v3104_v10 = vpop.permute.xlu0 %3103  ;;  %v3347_v17 = vmul.f32 %v4650_v55, %v3074_v28 }
 0x4ce   : > { %v3911_v0 = vadd.f32 %v3910_v49, %v3909_v51  ;;  %v3362_v53 = vmul.f32 %v4652_v60, %v3104_v10 }
 0x4cf   : > { %v3613_v46 = vadd.f32 %v3612_v13, %v3611_v33  ;;  %v3948_v26 = vadd.f32 %v3947_v37, %v3946_v45  ;;  %v3614_v54 = vsel %vm2044_vm1, %v3347_v17, 0.0 }
 0x4d0   : > { %v3913_v44 = vadd.f32 %v3912_v29, %v3911_v0  ;;  %v3106_v11 = vpop.permute.xlu2 %3105  ;;  %v3649_v52 = vsel %vm2044_vm1, %v3362_v53, 0.0 }
 0x4d1   : > { %v3950_v42 = vadd.f32 %v3949_v62, %v3948_v26  ;;  %v3363_v15 = vmul.f32 %v4646_v21, %v3106_v11  ;;  %v3615_v19 = vadd.f32 %v3614_v54, %v3613_v46  ;;  %v3650_v36 = vadd.f32 %v3649_v52, %v3648_v12 }
 0x4d2   : > { %v3914_v27 = vrot.slane %v3913_v44, 4 }
 0x4d3   : > { %v3951_v2 = vrot.slane %v3950_v42, 4  ;;  %v3651_v39 = vsel %vm2044_vm1, %v3363_v15, 0.0 }
 0x4d4   : > { %v3915_v41 = vadd.f32 %v3914_v27, %v3913_v44  ;;  %v3652_v48 = vadd.f32 %v3651_v39, %v3650_v36  ;;  %v3108_v58 = vpop.permute.xlu1 %3107 }
 0x4d5   : > { %v3952_v35 = vadd.f32 %v3951_v2, %v3950_v42  ;;  %v3076_v24 = vpop.permute.xlu0 %3075  ;;  %v3364_v47 = vmul.f32 %v7955_v5, %v3108_v58 }
 0x4d6   : > { %v3916_v57 = vrot.slane %v3915_v41, 2  ;;  %v3348_v4 = vmul.f32 %v7963_v43, %v3076_v24 }
 0x4d7   : > { %v3953_v23 = vrot.slane %v3952_v35, 2  ;;  %v3653_v21 = vsel %vm2044_vm1, %v3364_v47, 0.0 }
 0x4d8   : > { %v3917_v6 = vadd.f32 %v3916_v57, %v3915_v41  ;;  %v3616_v16 = vsel %vm2044_vm1, %v3348_v4, 0.0  ;;  %v3654_v63 = vadd.f32 %v3653_v21, %v3652_v48 }
 0x4d9   : > { %v3954_v38 = vadd.f32 %v3953_v23, %v3952_v35  ;;  %v3617_v20 = vadd.f32 %v3616_v16, %v3615_v19 }
 0x4da   : > { %v3918_v34 = vrot.slane %v3917_v6, 1  ;;  %v3655_v9 = vrot.slane %v3654_v63, 4 }
 0x4db   : > { %v3955_v59 = vrot.slane %v3954_v38, 1  ;;  %v3618_v40 = vrot.slane %v3617_v20, 4 }
 0x4dc   : > { %v3919_v56 = vadd.f32 %v3918_v34, %v3917_v6  ;;  %v3656_v7 = vadd.f32 %v3655_v9, %v3654_v63 }
 0x4dd   : > { %v3956_v55 = vadd.f32 %v3955_v59, %v3954_v38  ;;  %v3619_v8 = vadd.f32 %v3618_v40, %v3617_v20 }
 0x4de   : > { %4653 = vrcp.f32 %v3919_v56  ;;  %v3657_v5 = vrot.slane %v3656_v7, 2  ;;  %vm4052_vm1 = vweird.f32 %v3919_v56  ;;  %v4056_v25 = vand.u32 2147483647, %v3919_v56 }
 0x4df   : > { %4655 = vrcp.f32 %v3956_v55  ;;  %v3620_v43 = vrot.slane %v3619_v8, 2  ;;  %vm4067_vm9 = vweird.f32 %v3956_v55  ;;  %v4058_v3 = vand.u32 2147483648, %v3919_v56 }
 0x4e0   : > { %v3658_v18 = vadd.f32 %v3657_v5, %v3656_v7  ;;  %v4073_v31 = vand.u32 2147483648, %v3956_v55  ;;  %v4071_v51 = vand.u32 2147483647, %v3956_v55  ;;  %vm4057_vm15 = vcmp.eq.f32.partialorder %v4056_v25, 8.507059e+37 }
 0x4e1   : > { %v3621_v60 = vadd.f32 %v3620_v43, %v3619_v8  ;;  %v4059_v12 = vor.u32 1.1754944e-38, %v4058_v3 }
 0x4e2   : > { %v3659_v50 = vrot.slane %v3658_v18, 1  ;;  %v4074_v33 = vor.u32 1.1754944e-38, %v4073_v31  ;;  %vm4072_vm0 = vcmp.eq.f32.partialorder %v4071_v51, 8.507059e+37 }
 0x4e3   : > { %v3622_v30 = vrot.slane %v3621_v60, 1 }
 0x4e4   : > { %v4654_v1 = vpop.eup %4653  ;;  %v3660_v28 = vadd.f32 %v3659_v50, %v3658_v18 }
 0x4e5   : > { %v4656_v22 = vpop.eup %4655  ;;  %v4048_v61 = vmul.f32 %v4654_v1, %v3919_v56  ;;  %vm4053_vm10 = vweird.f32 %v4654_v1  ;;  %v3623_v62 = vadd.f32 %v3622_v30, %v3621_v60 }
 0x4e6   : > { %v4063_v32 = vmul.f32 %v4656_v22, %v3956_v55  ;;  %vm4068_vm12 = vweird.f32 %v4656_v22  ;;  %vm4054_vm13 = vmor %vm4052_vm1, %vm4053_vm10 }
 0x4e7   : > { %v4049_v49 = vsub.f32 1.0, %v4048_v61  ;;  %vm4069_vm14 = vmor %vm4067_vm9, %vm4068_vm12 }
 0x4e8   : > { %v4064_v37 = vsub.f32 1.0, %v4063_v32 }
 0x4e9   : > { %v4050_v13 = vmul.f32 %v4654_v1, %v4049_v49 }
 0x4ea   : > { %v4065_v29 = vmul.f32 %v4656_v22, %v4064_v37 }
 0x4eb   : > { %v4051_v45 = vadd.f32 %v4654_v1, %v4050_v13 }
 0x4ec   : > { %v4066_v0 = vadd.f32 %v4656_v22, %v4065_v29 }
 0x4ed   : > { %v4055_v10 = vsel %vm4054_vm13, %v4654_v1, %v4051_v45 }
 0x4ee   : > { %v4070_v46 = vsel %vm4069_vm14, %v4656_v22, %v4066_v0  ;;  %v4060_v17 = vsel %vm4057_vm15, %v4059_v12, %v4055_v10 }
 0x4ef   : > { %v4075_v26 = vsel %vm4072_vm0, %v4074_v33, %v4070_v46  ;;  %v4061_v53 = vmul.f32 %v4060_v17, %v3623_v62 }
 0x4f0   : > { %v4076_v44 = vmul.f32 %v4075_v26, %v3660_v28 }
 0x4f1   : > { %v4085_v11 = vadd.f32 %v6407_v14, %v4061_v53 }
 0x4f2   : > { %v4086_v54 = vadd.f32 %v6407_v14, %v4076_v44 }
 0x4f3   : > { %4094 = vst.msk [vmem:[%s5007_s11 + $0x6] sm:$0x1] %vm4087_vm11, %v4085_v11 }
 0x4f4   : > { %4095 = vst.msk [vmem:[%s5007_s11 + $0x7] sm:$0x1] %vm4087_vm11, %v4086_v54 }
 0x4f5 PF: > { %s23_s30 = sadd.s32 1, %s4811_s30   ;;  %s8648_s3 = sld [smem:[#allocation11_spill]] }
 0x4f6   : > { %p20_p10 = scmp.ge.s32.totalorder %s23_s30, 10   ;;  %s8649_s28 = sld [smem:[#allocation12_spill]] }
 0x4f7   : > { %s8650_s4 = sld [smem:[#allocation13_spill]]  ;;  %s8652_s22 = smov %s4775_s23 }
 0x4f8   : > { %s8651_s29 = sld [smem:[#allocation14_spill]]  ;;  %s8653_s23 = smov %s4779_s24 }
 0x4f9   : > { %s8654_s24 = smov %s4966_s9  ;;  %s8655_s25 = smov %s4787_s26 }
 0x4fa   : > { %s8656_s26 = smov %s4791_s27  ;;  %s8657_s27 = smov %s4945_s18 }
 0x4fb   :  { %22 = sbr.rel (!%p20_p10) target bundleno = 13 (0xd), region = 108 }
 0x500   :  { %4116 = vsyncpa [#allocation6], 1 }
 0x501   :  { %4118 = vsyncpa [#allocation6 + $0x1], 1 }
 0x502   :  { %4119 = vsyncpa [#allocation8], 1 }
 0x503   :  { %4121 = vsyncpa [#allocation8 + $0x1], 1 }

</bundles_post_ra>
